<compile_context>
chip_gen: v7x
topology: tpu7x:2x2x1
jax: 0.10.0
libtpu: 0.0.40
codegen_flags: <defaults>
</compile_context>

<pallas_src>
import functools

import jax
import jax.numpy as jnp
from jax import lax
from jax.experimental import pallas as pl
from jax.experimental.pallas import tpu as pltpu


_LANES = 128  # lane-dense output rows -> unmasked vector stores


# ------------------------- host-side sizing helpers ------------------------- #

def _cores_per_device() -> int:
    """Best-effort TensorCores-per-device (v7x / megacore chips expose 2)."""
    try:
        d = jax.devices()[0]
        n = getattr(d, "num_cores", None)
        if n:
            return int(n)
        kind = str(getattr(d, "device_kind", "")).lower()
        if any(tag in kind for tag in ("v4", "v5p", "v7")):
            return 2
    except Exception:
        pass
    return 1


def _block_bytes(tb, R, D, n_way, H, x_itemsize):
    """Double-buffered VMEM footprint (bytes) of one grid step's blocks."""
    x_blk = tb * R * D * x_itemsize
    y_blk = tb * R * n_way * 4
    w_blk = (D * H + H + H * n_way + n_way) * 4
    o_blk = 2 * tb * _LANES * 4
    return 2 * (x_blk + y_blk + w_blk + o_blk)


def _pick_task_block(T, R, D, n_way, H, x_itemsize, vmem_budget, two_cores):
    """Largest divisor of T whose block fits the VMEM budget.  On 2-TC devices
    prefer an even number of grid steps so the 'parallel' task axis shards
    across both cores; on single-TC devices NB=1 is fine (fewest grid steps)."""
    divisors = sorted((d for d in range(1, T + 1) if T % d == 0), reverse=True)
    fitting = [d for d in divisors
               if _block_bytes(d, R, D, n_way, H, x_itemsize) <= vmem_budget]
    if not fitting:
        return 1
    if two_cores:
        for d in fitting:
            if (T // d) % 2 == 0:
                return d
    return fitting[0]


# ----------------------------- in-kernel math ------------------------------ #

def _forward(x, W1, b1, W2, b2, mm):
    """2-layer MLP forward.  MXU operands optionally cast to mm (bf16);
    accumulation & elementwise stay f32."""
    if mm is not None:
        x = x.astype(mm)
        W1 = W1.astype(mm)
        W2 = W2.astype(mm)
    h_pre = jnp.dot(x, W1, preferred_element_type=jnp.float32) + b1
    h = jnp.maximum(h_pre, 0.0)
    h_in = h.astype(mm) if mm is not None else h
    logits = jnp.dot(h_in, W2, preferred_element_type=jnp.float32) + b2
    return h_pre, h, logits


def _softmax_stats(logits):
    m = jnp.max(logits, axis=1, keepdims=True)
    z = logits - m
    e = jnp.exp(z)
    s = jnp.sum(e, axis=1, keepdims=True)
    return z, e, s


def _query_metrics(logits_q, z_q, s_q, yq_oh, n_way, Q):
    """Mean cross-entropy over the query rows and #correct, both as [1, 1].
    log-softmax only (no probabilities needed for metrics).  argmax(softmax(x))
    == argmax(x); first-maximal-index tie-break matches torch.argmax."""
    logp_q = z_q - jnp.log(s_q)
    loss = -jnp.sum(yq_oh * logp_q, axis=(0, 1), keepdims=True) / Q          # [1,1]
    col = lax.broadcasted_iota(jnp.int32, logits_q.shape, 1)
    maxv = jnp.max(logits_q, axis=1, keepdims=True)
    pred = jnp.min(jnp.where(logits_q == maxv, col, n_way), axis=1,
                   keepdims=True)                                            # [Q,1]
    pred_oh = (col == pred).astype(jnp.float32)
    correct = jnp.sum(pred_oh * yq_oh, axis=(0, 1), keepdims=True)           # [1,1]
    return loss, correct


def _support_dlogits(e_s, s_s, ys_oh, S):
    """d(mean CE)/d(logits) for support rows.  Exact reciprocal is kept so the
    inner-SGD trajectory is not perturbed (pl.reciprocal(approx=True) would)."""
    p_s = e_s / s_s
    return (p_s - ys_oh) / S


def _inner_grads(xs, h_pre_s, h_s, dlogits, fW2, mm):
    """Analytic backward of mean CE over the support rows.
    NOTE: dW2/dW1 dot_generals contract over axis 0 of both operands; Mosaic may
    insert an XLU transpose.  At S=8 / H=32 this is off the critical path;
    re-check with pl.lower_as_mlir when the real learner lands."""
    cast = (lambda v: v.astype(mm)) if mm is not None else (lambda v: v)
    dl = cast(dlogits)
    dW2 = lax.dot_general(cast(h_s), dl, (((0,), (0,)), ((), ())),
                          preferred_element_type=jnp.float32)
    db2 = jnp.sum(dlogits, axis=0, keepdims=True)
    dh = lax.dot_general(dl, cast(fW2), (((1,), (1,)), ((), ())),
                         preferred_element_type=jnp.float32)
    dhp = dh * (h_pre_s > 0.0).astype(jnp.float32)
    dW1 = lax.dot_general(cast(xs), cast(dhp), (((0,), (0,)), ((), ())),
                          preferred_element_type=jnp.float32)
    db1 = jnp.sum(dhp, axis=0, keepdims=True)
    return dW1, db1, dW2, db2


# --------------------------------- kernel ---------------------------------- #

def maml_block_kernel(x_ref, y_ref, W1_ref, b1_ref, W2_ref, b2_ref,
                      losses_ref, corrects_ref, *,
                      S, Q, n_way, update_lr, update_step, task_block,
                      matmul_dtype):
    K = update_step + 1
    R = Q + S                  # rows per task: [query ; support]
    mm = matmul_dtype

    W1 = W1_ref[...]
    b1 = b1_ref[...]
    W2 = W2_ref[...]
    b2 = b2_ref[...]
    x_block = x_ref[...]       # [TB*R, D]      (bf16 when matmul_dtype=bf16)
    y_block = y_ref[...]       # [TB*R, n_way]  f32 one-hot

    # Lane masks for scattering K scalars into a 128-lane row; hoisted out of
    # the task loop (JAX does not CSE broadcast_in_dim).
    slot = lax.broadcasted_iota(jnp.int32, (1, _LANES), 1)
    lane_masks = [(slot == k).astype(jnp.float32) for k in range(K)]

    # ---- step 0: all tasks share theta -> ONE batched forward over TB*R rows ----
    h_pre0, h0, logits0 = _forward(x_block, W1, b1, W2, b2, mm)
    z0, e0, s0 = _softmax_stats(logits0)

    loss_rows, corr_rows = [], []

    for t in range(task_block):        # static unroll over folded tasks
        base = t * R
        x_cat = x_block[base:base + R]         # [Q+S, D]     (query rows first)
        y_cat = y_block[base:base + R]         # [Q+S, n_way]
        xq, xs = x_cat[:Q], x_cat[Q:]
        yq_oh, ys_oh = y_cat[:Q], y_cat[Q:]

        losses, corrects = [], []

        # losses_q[0] / corrects[0] and the theta support gradient, reusing
        # the batched step-0 forward (no per-task matmul for step 0).
        lg0 = logits0[base:base + R]
        loss_q, corr_q = _query_metrics(lg0[:Q], z0[base:base + Q],
                                        s0[base:base + Q], yq_oh, n_way, Q)
        losses.append(loss_q)
        corrects.append(corr_q)

        dlog = _support_dlogits(e0[base + Q:base + R], s0[base + Q:base + R],
                                ys_oh, S)
        dW1, db1, dW2, db2 = _inner_grads(xs, h_pre0[base + Q:base + R],
                                          h0[base + Q:base + R], dlog, W2, mm)
        fW1 = W1 - update_lr * dW1
        fb1 = b1 - update_lr * db1
        fW2 = W2 - update_lr * dW2
        fb2 = b2 - update_lr * db2

        # steps 1..update_step-1: fused query-eval + support-grad forward with
        # the task's own fast weights (one [Q+S, D] matmul pair per step).
        for _ in range(1, update_step):
            h_pre, h, logits = _forward(x_cat, fW1, fb1, fW2, fb2, mm)
            z, e, s = _softmax_stats(logits)
            loss_q, corr_q = _query_metrics(logits[:Q], z[:Q], s[:Q],
                                            yq_oh, n_way, Q)
            losses.append(loss_q)
            corrects.append(corr_q)

            dlog = _support_dlogits(e[Q:], s[Q:], ys_oh, S)
            dW1, db1, dW2, db2 = _inner_grads(xs, h_pre[Q:], h[Q:], dlog,
                                              fW2, mm)
            fW1 = fW1 - update_lr * dW1
            fb1 = fb1 - update_lr * db1
            fW2 = fW2 - update_lr * dW2
            fb2 = fb2 - update_lr * db2

        # losses_q[update_step]: query-only eval with fully adapted weights.
        _, _, logits_q = _forward(xq, fW1, fb1, fW2, fb2, mm)
        zq, _, sq = _softmax_stats(logits_q)
        loss_q, corr_q = _query_metrics(logits_q, zq, sq, yq_oh, n_way, Q)
        losses.append(loss_q)
        corrects.append(corr_q)

        # scatter the K scalars into one lane-dense 128-wide row
        loss_row = jnp.zeros((1, _LANES), jnp.float32)
        corr_row = jnp.zeros((1, _LANES), jnp.float32)
        for k in range(K):
            loss_row = loss_row + losses[k] * lane_masks[k]
            corr_row = corr_row + corrects[k] * lane_masks[k]
        loss_rows.append(loss_row)
        corr_rows.append(corr_row)

    # one sublane-dense [TB, 128] store per output (single vst each)
    losses_ref[...] = jnp.concatenate(loss_rows, axis=0)
    corrects_ref[...] = jnp.concatenate(corr_rows, axis=0)


# --------------------------------- wrapper --------------------------------- #

def meta_forward(params, x_spt, y_spt, x_qry, y_qry, *, n_way, update_lr,
                 update_step, flag=False, matmul_dtype=jnp.bfloat16):
    """Functional equivalent of Meta.forward; returns (accs, loss_q).

    matmul_dtype: MXU-operand dtype.  Default bf16 (f32 accumulation); pass
    None for exact-f32 matmuls when checking parity with the PyTorch reference.
    """
    W1, b1, W2, b2 = params
    T, S = y_spt.shape
    Q = y_qry.shape[1]

    x_spt_f = x_spt.reshape(T, S, -1)
    x_qry_f = x_qry.reshape(T, Q, -1)
    D = x_spt_f.shape[-1]
    H = W1.shape[1]
    K = update_step + 1
    assert K <= _LANES, "update_step+1 must fit in one 128-lane output row"
    assert update_step >= 1

    # Per-task row layout [query ; support] so the weight-sharing forwards fuse.
    # x is cast to matmul_dtype HERE so the only large HBM->VMEM stream is half
    # the bytes (and the double-buffered block half the VMEM) when bf16 is on.
    x_dtype = jnp.float32 if matmul_dtype is None else matmul_dtype
    ys_oh = jax.nn.one_hot(y_spt, n_way, dtype=jnp.float32)
    yq_oh = jax.nn.one_hot(y_qry, n_way, dtype=jnp.float32)
    x_all = jnp.concatenate([x_qry_f, x_spt_f], axis=1).astype(x_dtype)  # [T,Q+S,D]
    y_all = jnp.concatenate([yq_oh, ys_oh], axis=1)                      # [T,Q+S,n_way]

    R = Q + S
    x_itemsize = jnp.dtype(x_dtype).itemsize
    two_cores = _cores_per_device() >= 2
    VMEM_BUDGET = 48 << 20   # fits under v7x's 64 MiB physical VMEM with headroom
    TB = _pick_task_block(T, R, D, n_way, H, x_itemsize, VMEM_BUDGET, two_cores)
    NB = T // TB
    blk_bytes = _block_bytes(TB, R, D, n_way, H, x_itemsize)
    vmem_limit = int(min(56 << 20, max(16 << 20, blk_bytes + (4 << 20))))

    x_all = x_all.reshape(NB, TB * R, D)
    y_all = y_all.reshape(NB, TB * R, n_way)

    kernel = functools.partial(
        maml_block_kernel, S=S, Q=Q, n_way=n_way, update_lr=update_lr,
        update_step=update_step, task_block=TB, matmul_dtype=matmul_dtype)

    # Weights use constant index_maps (fetched once by the pipeline); at
    # D=64/H=32 the default double-buffer is ~8 KiB so pl.Buffered(1) is skipped.
    grid_spec = pltpu.PrefetchScalarGridSpec(
        num_scalar_prefetch=0,
        grid=(NB,),
        in_specs=[
            pl.BlockSpec((pl.Squeezed(), TB * R, D), lambda i: (i, 0, 0)),
            pl.BlockSpec((pl.Squeezed(), TB * R, n_way), lambda i: (i, 0, 0)),
            pl.BlockSpec((D, H), lambda i: (0, 0)),
            pl.BlockSpec((1, H), lambda i: (0, 0)),
            pl.BlockSpec((H, n_way), lambda i: (0, 0)),
            pl.BlockSpec((1, n_way), lambda i: (0, 0)),
        ],
        out_specs=[
            pl.BlockSpec((pl.Squeezed(), TB, _LANES), lambda i: (i, 0, 0)),
            pl.BlockSpec((pl.Squeezed(), TB, _LANES), lambda i: (i, 0, 0)),
        ],
    )

    losses_rows, corrects_rows = pl.pallas_call(
        kernel,
        out_shape=(jax.ShapeDtypeStruct((NB, TB, _LANES), jnp.float32),
                   jax.ShapeDtypeStruct((NB, TB, _LANES), jnp.float32)),
        grid_spec=grid_spec,
        compiler_params=pltpu.CompilerParams(
            dimension_semantics=("parallel",),
            vmem_limit_bytes=vmem_limit),
    )(x_all, y_all, W1, b1, W2, b2)

    losses_per_task = losses_rows.reshape(T, _LANES)[:, :K]       # [T, K]
    corrects_per_task = corrects_rows.reshape(T, _LANES)[:, :K]   # [T, K]

    loss_q = jnp.sum(losses_per_task[:, -1]) / T
    accs = jnp.sum(corrects_per_task, axis=0) / (Q * T)
    # TODO(synk): flag=True branch (Adam meta-optimizer step, in-place training
    # state mutation) has no functional Pallas equivalent; omitted.
    del flag
    return accs, loss_q


# ---------------------------------- main ------------------------------------ #

if __name__ == "__main__":
    key = jax.random.PRNGKey(0)

    task_num, n_way, k_spt, k_qry = 2, 2, 4, 4
    C_, Himg, Wimg = 1, 8, 8
    setsz, querysz = n_way * k_spt, n_way * k_qry
    D = C_ * Himg * Wimg
    hidden = 32
    update_lr, update_step = 0.1, 3

    k1, k2, k3, k4, k5, k6 = jax.random.split(key, 6)
    x_spt = jax.random.normal(k1, (task_num, setsz, C_, Himg, Wimg), jnp.float32)
    x_qry = jax.random.normal(k2, (task_num, querysz, C_, Himg, Wimg), jnp.float32)
    y_spt = jax.random.randint(k3, (task_num, setsz), 0, n_way, jnp.int32)
    y_qry = jax.random.randint(k4, (task_num, querysz), 0, n_way, jnp.int32)

    # deterministic learner parameters (stand-in for Learner(config))
    W1 = 0.1 * jax.random.normal(k5, (D, hidden), jnp.float32)
    b1 = jnp.zeros((1, hidden), jnp.float32)
    W2 = 0.1 * jax.random.normal(k6, (hidden, n_way), jnp.float32)
    b2 = jnp.zeros((1, n_way), jnp.float32)

    accs, loss_q = meta_forward((W1, b1, W2, b2), x_spt, y_spt, x_qry, y_qry,
                                n_way=n_way, update_lr=update_lr,
                                update_step=update_step, flag=False,
                                matmul_dtype=jnp.bfloat16)
    jax.block_until_ready((accs, loss_q))
    print("KERNEL_OK")
</pallas_src>

<mosaic_0001>
module attributes {stable_mosaic.version = 11 : i64} {
  func.func @maml_block_kernel(%arg0: i32, %arg1: memref<1x32x64xbf16, #tpu.memory_space<vmem>>, %arg2: memref<1x32x2xf32, #tpu.memory_space<vmem>>, %arg3: memref<64x32xf32, #tpu.memory_space<vmem>>, %arg4: memref<1x32xf32, #tpu.memory_space<vmem>>, %arg5: memref<32x2xf32, #tpu.memory_space<vmem>>, %arg6: memref<1x2xf32, #tpu.memory_space<vmem>>, %arg7: memref<1x2x128xf32, #tpu.memory_space<vmem>>, %arg8: memref<1x2x128xf32, #tpu.memory_space<vmem>>) attributes {dimension_semantics = [#tpu.dimension_semantics<parallel>], iteration_bounds = array<i64: 1>, scalar_prefetch = 0 : i64, scratch_operands = 0 : i64, tpu.core_type = #tpu.core_type<tc>, window_params = [{transform_indices = @transform_0, window_bounds = array<i64: 1, 32, 64>}, {transform_indices = @transform_1, window_bounds = array<i64: 1, 32, 2>}, {pipeline_mode = #tpu.pipeline_mode<synchronous>, transform_indices = @transform_2, window_bounds = array<i64: 64, 32>}, {pipeline_mode = #tpu.pipeline_mode<synchronous>, transform_indices = @transform_3, window_bounds = array<i64: 1, 32>}, {pipeline_mode = #tpu.pipeline_mode<synchronous>, transform_indices = @transform_4, window_bounds = array<i64: 32, 2>}, {pipeline_mode = #tpu.pipeline_mode<synchronous>, transform_indices = @transform_5, window_bounds = array<i64: 1, 2>}, {transform_indices = @transform_6, window_bounds = array<i64: 1, 2, 128>}, {transform_indices = @transform_7, window_bounds = array<i64: 1, 2, 128>}]} {
    %c0 = arith.constant 0 : index
    %c0_0 = arith.constant 0 : index
    %0 = vector.load %arg3[%c0, %c0_0] : memref<64x32xf32, #tpu.memory_space<vmem>>, vector<64x32xf32>
    %c0_1 = arith.constant 0 : index
    %c0_2 = arith.constant 0 : index
    %1 = vector.load %arg4[%c0_1, %c0_2] : memref<1x32xf32, #tpu.memory_space<vmem>>, vector<1x32xf32>
    %c0_3 = arith.constant 0 : index
    %c0_4 = arith.constant 0 : index
    %2 = vector.load %arg5[%c0_3, %c0_4] : memref<32x2xf32, #tpu.memory_space<vmem>>, vector<32x2xf32>
    %c0_5 = arith.constant 0 : index
    %c0_6 = arith.constant 0 : index
    %3 = vector.load %arg6[%c0_5, %c0_6] : memref<1x2xf32, #tpu.memory_space<vmem>>, vector<1x2xf32>
    %c0_7 = arith.constant 0 : index
    %c0_8 = arith.constant 0 : index
    %c0_9 = arith.constant 0 : index
    %4 = vector.load %arg1[%c0_7, %c0_8, %c0_9] : memref<1x32x64xbf16, #tpu.memory_space<vmem>>, vector<1x32x64xbf16>
    %5 = vector.shape_cast %4 : vector<1x32x64xbf16> to vector<32x64xbf16>
    %c0_10 = arith.constant 0 : index
    %c0_11 = arith.constant 0 : index
    %c0_12 = arith.constant 0 : index
    %6 = vector.load %arg2[%c0_10, %c0_11, %c0_12] : memref<1x32x2xf32, #tpu.memory_space<vmem>>, vector<1x32x2xf32>
    %7 = vector.shape_cast %6 : vector<1x32x2xf32> to vector<32x2xf32>
    %8 = tpu.iota {dimensions = array<i32: 1>} : vector<1x128xi32>
    %c0_i32 = arith.constant 0 : i32
    %9 = vector.broadcast %c0_i32 : i32 to vector<1x128xi32>
    %10 = arith.cmpi eq, %8, %9 : vector<1x128xi32>
    %11 = arith.extui %10 : vector<1x128xi1> to vector<1x128xi32>
    %12 = arith.sitofp %11 : vector<1x128xi32> to vector<1x128xf32>
    %c1_i32 = arith.constant 1 : i32
    %13 = vector.broadcast %c1_i32 : i32 to vector<1x128xi32>
    %14 = arith.cmpi eq, %8, %13 : vector<1x128xi32>
    %15 = arith.extui %14 : vector<1x128xi1> to vector<1x128xi32>
    %16 = arith.sitofp %15 : vector<1x128xi32> to vector<1x128xf32>
    %c2_i32 = arith.constant 2 : i32
    %17 = vector.broadcast %c2_i32 : i32 to vector<1x128xi32>
    %18 = arith.cmpi eq, %8, %17 : vector<1x128xi32>
    %19 = arith.extui %18 : vector<1x128xi1> to vector<1x128xi32>
    %20 = arith.sitofp %19 : vector<1x128xi32> to vector<1x128xf32>
    %c3_i32 = arith.constant 3 : i32
    %21 = vector.broadcast %c3_i32 : i32 to vector<1x128xi32>
    %22 = arith.cmpi eq, %8, %21 : vector<1x128xi32>
    %23 = arith.extui %22 : vector<1x128xi1> to vector<1x128xi32>
    %24 = arith.sitofp %23 : vector<1x128xi32> to vector<1x128xf32>
    %25 = arith.truncf %0 : vector<64x32xf32> to vector<64x32xbf16>
    %26 = arith.truncf %2 : vector<32x2xf32> to vector<32x2xbf16>
    %cst = arith.constant dense<0.000000e+00> : vector<32x32xf32>
    %27 = tpu.matmul %5, %25, %cst {dimension_numbers = #tpu.dot_dimension_numbers<[1], [0], [0], [1], [0, 0, 1, 1], [], []>} : vector<32x64xbf16>, vector<64x32xbf16>, vector<32x32xf32> -> vector<32x32xf32>
    %28 = vector.broadcast %1 : vector<1x32xf32> to vector<32x32xf32>
    %29 = arith.addf %27, %28 : vector<32x32xf32>
    %cst_13 = arith.constant 0.000000e+00 : f32
    %30 = vector.broadcast %cst_13 : f32 to vector<32x32xf32>
    %31 = arith.maximumf %29, %30 : vector<32x32xf32>
    %32 = arith.truncf %31 : vector<32x32xf32> to vector<32x32xbf16>
    %cst_14 = arith.constant dense<0.000000e+00> : vector<32x2xf32>
    %33 = tpu.matmul %32, %26, %cst_14 {dimension_numbers = #tpu.dot_dimension_numbers<[1], [0], [0], [1], [0, 0, 1, 1], [], []>} : vector<32x32xbf16>, vector<32x2xbf16>, vector<32x2xf32> -> vector<32x2xf32>
    %34 = vector.broadcast %3 : vector<1x2xf32> to vector<32x2xf32>
    %35 = arith.addf %33, %34 : vector<32x2xf32>
    %cst_15 = arith.constant dense<0xFF800000> : vector<32xf32>
    %36 = vector.multi_reduction <maximumf>, %35, %cst_15 [1] : vector<32x2xf32> to vector<32xf32>
    %37 = vector.shape_cast %36 : vector<32xf32> to vector<32x1xf32>
    %38 = vector.broadcast %37 : vector<32x1xf32> to vector<32x2xf32>
    %39 = arith.subf %35, %38 : vector<32x2xf32>
    %40 = math.exp %39 : vector<32x2xf32>
    %cst_16 = arith.constant dense<0.000000e+00> : vector<32xf32>
    %41 = vector.multi_reduction <add>, %40, %cst_16 [1] : vector<32x2xf32> to vector<32xf32>
    %42 = vector.shape_cast %41 : vector<32xf32> to vector<32x1xf32>
    %43 = vector.extract_strided_slice %5 {offsets = [0, 0], sizes = [16, 64], strides = [1, 1]} : vector<32x64xbf16> to vector<16x64xbf16>
    %44 = vector.extract_strided_slice %7 {offsets = [0, 0], sizes = [16, 2], strides = [1, 1]} : vector<32x2xf32> to vector<16x2xf32>
    %45 = vector.extract_strided_slice %43 {offsets = [0, 0], sizes = [8, 64], strides = [1, 1]} : vector<16x64xbf16> to vector<8x64xbf16>
    %46 = vector.extract_strided_slice %43 {offsets = [8, 0], sizes = [8, 64], strides = [1, 1]} : vector<16x64xbf16> to vector<8x64xbf16>
    %47 = vector.extract_strided_slice %44 {offsets = [0, 0], sizes = [8, 2], strides = [1, 1]} : vector<16x2xf32> to vector<8x2xf32>
    %48 = vector.extract_strided_slice %44 {offsets = [8, 0], sizes = [8, 2], strides = [1, 1]} : vector<16x2xf32> to vector<8x2xf32>
    %49 = vector.extract_strided_slice %35 {offsets = [0, 0], sizes = [16, 2], strides = [1, 1]} : vector<32x2xf32> to vector<16x2xf32>
    %50 = vector.extract_strided_slice %49 {offsets = [0, 0], sizes = [8, 2], strides = [1, 1]} : vector<16x2xf32> to vector<8x2xf32>
    %51 = vector.extract_strided_slice %39 {offsets = [0, 0], sizes = [8, 2], strides = [1, 1]} : vector<32x2xf32> to vector<8x2xf32>
    %52 = vector.extract_strided_slice %42 {offsets = [0, 0], sizes = [8, 1], strides = [1, 1]} : vector<32x1xf32> to vector<8x1xf32>
    %53 = math.log %52 : vector<8x1xf32>
    %54 = vector.broadcast %53 : vector<8x1xf32> to vector<8x2xf32>
    %55 = arith.subf %51, %54 : vector<8x2xf32>
    %56 = arith.mulf %47, %55 : vector<8x2xf32>
    %57 = vector.shape_cast %56 : vector<8x2xf32> to vector<1x8x2xf32>
    %cst_17 = arith.constant dense<0.000000e+00> : vector<1xf32>
    %58 = vector.multi_reduction <add>, %57, %cst_17 [1, 2] : vector<1x8x2xf32> to vector<1xf32>
    %59 = vector.shape_cast %58 : vector<1xf32> to vector<1x1x1xf32>
    %60 = vector.extract %59[0, 0, 0] : f32 from vector<1x1x1xf32>
    %61 = vector.broadcast %60 : f32 to vector<1x1xf32>
    %cst_18 = arith.constant 0.000000e+00 : f32
    %62 = vector.broadcast %cst_18 : f32 to vector<1x1xf32>
    %63 = arith.subf %62, %61 : vector<1x1xf32>
    %cst_19 = arith.constant 8.000000e+00 : f32
    %64 = vector.broadcast %cst_19 : f32 to vector<1x1xf32>
    %65 = arith.divf %63, %64 : vector<1x1xf32>
    %66 = tpu.iota {dimensions = array<i32: 1>} : vector<8x2xi32>
    %cst_20 = arith.constant dense<0xFF800000> : vector<8xf32>
    %67 = vector.multi_reduction <maximumf>, %50, %cst_20 [1] : vector<8x2xf32> to vector<8xf32>
    %68 = vector.shape_cast %67 : vector<8xf32> to vector<8x1xf32>
    %69 = vector.broadcast %68 : vector<8x1xf32> to vector<8x2xf32>
    %70 = arith.cmpf oeq, %50, %69 : vector<8x2xf32>
    %c2_i32_21 = arith.constant 2 : i32
    %71 = vector.broadcast %c2_i32_21 : i32 to vector<8x2xi32>
    %72 = arith.select %70, %66, %71 : vector<8x2xi1>, vector<8x2xi32>
    %cst_22 = arith.constant dense<2147483647> : vector<8xi32>
    %73 = vector.multi_reduction <minsi>, %72, %cst_22 [1] : vector<8x2xi32> to vector<8xi32>
    %74 = vector.shape_cast %73 : vector<8xi32> to vector<8x1xi32>
    %75 = vector.broadcast %74 : vector<8x1xi32> to vector<8x2xi32>
    %76 = arith.cmpi eq, %66, %75 : vector<8x2xi32>
    %77 = arith.extui %76 : vector<8x2xi1> to vector<8x2xi32>
    %78 = arith.sitofp %77 : vector<8x2xi32> to vector<8x2xf32>
    %79 = arith.mulf %78, %47 : vector<8x2xf32>
    %80 = vector.shape_cast %79 : vector<8x2xf32> to vector<1x8x2xf32>
    %cst_23 = arith.constant dense<0.000000e+00> : vector<1xf32>
    %81 = vector.multi_reduction <add>, %80, %cst_23 [1, 2] : vector<1x8x2xf32> to vector<1xf32>
    %82 = vector.shape_cast %81 : vector<1xf32> to vector<1x1x1xf32>
    %83 = vector.extract %82[0, 0, 0] : f32 from vector<1x1x1xf32>
    %84 = vector.broadcast %83 : f32 to vector<1x1xf32>
    %85 = vector.extract_strided_slice %40 {offsets = [8, 0], sizes = [8, 2], strides = [1, 1]} : vector<32x2xf32> to vector<8x2xf32>
    %86 = vector.extract_strided_slice %42 {offsets = [8, 0], sizes = [8, 1], strides = [1, 1]} : vector<32x1xf32> to vector<8x1xf32>
    %87 = vector.broadcast %86 : vector<8x1xf32> to vector<8x2xf32>
    %88 = arith.divf %85, %87 : vector<8x2xf32>
    %89 = arith.subf %88, %48 : vector<8x2xf32>
    %cst_24 = arith.constant 8.000000e+00 : f32
    %90 = vector.broadcast %cst_24 : f32 to vector<8x2xf32>
    %91 = arith.divf %89, %90 : vector<8x2xf32>
    %92 = vector.extract_strided_slice %29 {offsets = [8, 0], sizes = [8, 32], strides = [1, 1]} : vector<32x32xf32> to vector<8x32xf32>
    %93 = vector.extract_strided_slice %31 {offsets = [8, 0], sizes = [8, 32], strides = [1, 1]} : vector<32x32xf32> to vector<8x32xf32>
    %94 = arith.truncf %91 : vector<8x2xf32> to vector<8x2xbf16>
    %95 = arith.truncf %93 : vector<8x32xf32> to vector<8x32xbf16>
    %cst_25 = arith.constant dense<0.000000e+00> : vector<32x2xf32>
    %96 = tpu.matmul %95, %94, %cst_25 {dimension_numbers = #tpu.dot_dimension_numbers<[0], [0], [1], [1], [0, 1, 1, 1], [], []>} : vector<8x32xbf16>, vector<8x2xbf16>, vector<32x2xf32> -> vector<32x2xf32>
    %cst_26 = arith.constant dense<0.000000e+00> : vector<2xf32>
    %97 = vector.multi_reduction <add>, %91, %cst_26 [0] : vector<8x2xf32> to vector<2xf32>
    %98 = vector.shape_cast %97 : vector<2xf32> to vector<1x2xf32>
    %99 = arith.truncf %2 : vector<32x2xf32> to vector<32x2xbf16>
    %cst_27 = arith.constant dense<0.000000e+00> : vector<8x32xf32>
    %100 = tpu.matmul %94, %99, %cst_27 {dimension_numbers = #tpu.dot_dimension_numbers<[1], [1], [0], [0], [0, 0, 1, 0], [], []>} : vector<8x2xbf16>, vector<32x2xbf16>, vector<8x32xf32> -> vector<8x32xf32>
    %cst_28 = arith.constant 0.000000e+00 : f32
    %101 = vector.broadcast %cst_28 : f32 to vector<8x32xf32>
    %102 = arith.cmpf ogt, %92, %101 : vector<8x32xf32>
    %103 = arith.extui %102 : vector<8x32xi1> to vector<8x32xi32>
    %104 = arith.sitofp %103 : vector<8x32xi32> to vector<8x32xf32>
    %105 = arith.mulf %100, %104 : vector<8x32xf32>
    %106 = arith.truncf %105 : vector<8x32xf32> to vector<8x32xbf16>
    %cst_29 = arith.constant dense<0.000000e+00> : vector<64x32xf32>
    %107 = tpu.matmul %46, %106, %cst_29 {dimension_numbers = #tpu.dot_dimension_numbers<[0], [0], [1], [1], [0, 1, 1, 1], [], []>} : vector<8x64xbf16>, vector<8x32xbf16>, vector<64x32xf32> -> vector<64x32xf32>
    %cst_30 = arith.constant dense<0.000000e+00> : vector<32xf32>
    %108 = vector.multi_reduction <add>, %105, %cst_30 [0] : vector<8x32xf32> to vector<32xf32>
    %109 = vector.shape_cast %108 : vector<32xf32> to vector<1x32xf32>
    %cst_31 = arith.constant 1.000000e-01 : f32
    %110 = vector.broadcast %cst_31 : f32 to vector<64x32xf32>
    %111 = arith.mulf %110, %107 : vector<64x32xf32>
    %112 = arith.subf %0, %111 : vector<64x32xf32>
    %cst_32 = arith.constant 1.000000e-01 : f32
    %113 = vector.broadcast %cst_32 : f32 to vector<1x32xf32>
    %114 = arith.mulf %113, %109 : vector<1x32xf32>
    %115 = arith.subf %1, %114 : vector<1x32xf32>
    %cst_33 = arith.constant 1.000000e-01 : f32
    %116 = vector.broadcast %cst_33 : f32 to vector<32x2xf32>
    %117 = arith.mulf %116, %96 : vector<32x2xf32>
    %118 = arith.subf %2, %117 : vector<32x2xf32>
    %cst_34 = arith.constant 1.000000e-01 : f32
    %119 = vector.broadcast %cst_34 : f32 to vector<1x2xf32>
    %120 = arith.mulf %119, %98 : vector<1x2xf32>
    %121 = arith.subf %3, %120 : vector<1x2xf32>
    %122 = arith.truncf %112 : vector<64x32xf32> to vector<64x32xbf16>
    %123 = arith.truncf %118 : vector<32x2xf32> to vector<32x2xbf16>
    %cst_35 = arith.constant dense<0.000000e+00> : vector<16x32xf32>
    %124 = tpu.matmul %43, %122, %cst_35 {dimension_numbers = #tpu.dot_dimension_numbers<[1], [0], [0], [1], [0, 0, 1, 1], [], []>} : vector<16x64xbf16>, vector<64x32xbf16>, vector<16x32xf32> -> vector<16x32xf32>
    %125 = vector.broadcast %115 : vector<1x32xf32> to vector<16x32xf32>
    %126 = arith.addf %124, %125 : vector<16x32xf32>
    %cst_36 = arith.constant 0.000000e+00 : f32
    %127 = vector.broadcast %cst_36 : f32 to vector<16x32xf32>
    %128 = arith.maximumf %126, %127 : vector<16x32xf32>
    %129 = arith.truncf %128 : vector<16x32xf32> to vector<16x32xbf16>
    %cst_37 = arith.constant dense<0.000000e+00> : vector<16x2xf32>
    %130 = tpu.matmul %129, %123, %cst_37 {dimension_numbers = #tpu.dot_dimension_numbers<[1], [0], [0], [1], [0, 0, 1, 1], [], []>} : vector<16x32xbf16>, vector<32x2xbf16>, vector<16x2xf32> -> vector<16x2xf32>
    %131 = vector.broadcast %121 : vector<1x2xf32> to vector<16x2xf32>
    %132 = arith.addf %130, %131 : vector<16x2xf32>
    %cst_38 = arith.constant dense<0xFF800000> : vector<16xf32>
    %133 = vector.multi_reduction <maximumf>, %132, %cst_38 [1] : vector<16x2xf32> to vector<16xf32>
    %134 = vector.shape_cast %133 : vector<16xf32> to vector<16x1xf32>
    %135 = vector.broadcast %134 : vector<16x1xf32> to vector<16x2xf32>
    %136 = arith.subf %132, %135 : vector<16x2xf32>
    %137 = math.exp %136 : vector<16x2xf32>
    %cst_39 = arith.constant dense<0.000000e+00> : vector<16xf32>
    %138 = vector.multi_reduction <add>, %137, %cst_39 [1] : vector<16x2xf32> to vector<16xf32>
    %139 = vector.shape_cast %138 : vector<16xf32> to vector<16x1xf32>
    %140 = vector.extract_strided_slice %132 {offsets = [0, 0], sizes = [8, 2], strides = [1, 1]} : vector<16x2xf32> to vector<8x2xf32>
    %141 = vector.extract_strided_slice %136 {offsets = [0, 0], sizes = [8, 2], strides = [1, 1]} : vector<16x2xf32> to vector<8x2xf32>
    %142 = vector.extract_strided_slice %139 {offsets = [0, 0], sizes = [8, 1], strides = [1, 1]} : vector<16x1xf32> to vector<8x1xf32>
    %143 = math.log %142 : vector<8x1xf32>
    %144 = vector.broadcast %143 : vector<8x1xf32> to vector<8x2xf32>
    %145 = arith.subf %141, %144 : vector<8x2xf32>
    %146 = arith.mulf %47, %145 : vector<8x2xf32>
    %147 = vector.shape_cast %146 : vector<8x2xf32> to vector<1x8x2xf32>
    %cst_40 = arith.constant dense<0.000000e+00> : vector<1xf32>
    %148 = vector.multi_reduction <add>, %147, %cst_40 [1, 2] : vector<1x8x2xf32> to vector<1xf32>
    %149 = vector.shape_cast %148 : vector<1xf32> to vector<1x1x1xf32>
    %150 = vector.extract %149[0, 0, 0] : f32 from vector<1x1x1xf32>
    %151 = vector.broadcast %150 : f32 to vector<1x1xf32>
    %cst_41 = arith.constant 0.000000e+00 : f32
    %152 = vector.broadcast %cst_41 : f32 to vector<1x1xf32>
    %153 = arith.subf %152, %151 : vector<1x1xf32>
    %cst_42 = arith.constant 8.000000e+00 : f32
    %154 = vector.broadcast %cst_42 : f32 to vector<1x1xf32>
    %155 = arith.divf %153, %154 : vector<1x1xf32>
    %156 = tpu.iota {dimensions = array<i32: 1>} : vector<8x2xi32>
    %cst_43 = arith.constant dense<0xFF800000> : vector<8xf32>
    %157 = vector.multi_reduction <maximumf>, %140, %cst_43 [1] : vector<8x2xf32> to vector<8xf32>
    %158 = vector.shape_cast %157 : vector<8xf32> to vector<8x1xf32>
    %159 = vector.broadcast %158 : vector<8x1xf32> to vector<8x2xf32>
    %160 = arith.cmpf oeq, %140, %159 : vector<8x2xf32>
    %c2_i32_44 = arith.constant 2 : i32
    %161 = vector.broadcast %c2_i32_44 : i32 to vector<8x2xi32>
    %162 = arith.select %160, %156, %161 : vector<8x2xi1>, vector<8x2xi32>
    %cst_45 = arith.constant dense<2147483647> : vector<8xi32>
    %163 = vector.multi_reduction <minsi>, %162, %cst_45 [1] : vector<8x2xi32> to vector<8xi32>
    %164 = vector.shape_cast %163 : vector<8xi32> to vector<8x1xi32>
    %165 = vector.broadcast %164 : vector<8x1xi32> to vector<8x2xi32>
    %166 = arith.cmpi eq, %156, %165 : vector<8x2xi32>
    %167 = arith.extui %166 : vector<8x2xi1> to vector<8x2xi32>
    %168 = arith.sitofp %167 : vector<8x2xi32> to vector<8x2xf32>
    %169 = arith.mulf %168, %47 : vector<8x2xf32>
    %170 = vector.shape_cast %169 : vector<8x2xf32> to vector<1x8x2xf32>
    %cst_46 = arith.constant dense<0.000000e+00> : vector<1xf32>
    %171 = vector.multi_reduction <add>, %170, %cst_46 [1, 2] : vector<1x8x2xf32> to vector<1xf32>
    %172 = vector.shape_cast %171 : vector<1xf32> to vector<1x1x1xf32>
    %173 = vector.extract %172[0, 0, 0] : f32 from vector<1x1x1xf32>
    %174 = vector.broadcast %173 : f32 to vector<1x1xf32>
    %175 = vector.extract_strided_slice %137 {offsets = [8, 0], sizes = [8, 2], strides = [1, 1]} : vector<16x2xf32> to vector<8x2xf32>
    %176 = vector.extract_strided_slice %139 {offsets = [8, 0], sizes = [8, 1], strides = [1, 1]} : vector<16x1xf32> to vector<8x1xf32>
    %177 = vector.broadcast %176 : vector<8x1xf32> to vector<8x2xf32>
    %178 = arith.divf %175, %177 : vector<8x2xf32>
    %179 = arith.subf %178, %48 : vector<8x2xf32>
    %cst_47 = arith.constant 8.000000e+00 : f32
    %180 = vector.broadcast %cst_47 : f32 to vector<8x2xf32>
    %181 = arith.divf %179, %180 : vector<8x2xf32>
    %182 = vector.extract_strided_slice %126 {offsets = [8, 0], sizes = [8, 32], strides = [1, 1]} : vector<16x32xf32> to vector<8x32xf32>
    %183 = vector.extract_strided_slice %128 {offsets = [8, 0], sizes = [8, 32], strides = [1, 1]} : vector<16x32xf32> to vector<8x32xf32>
    %184 = arith.truncf %181 : vector<8x2xf32> to vector<8x2xbf16>
    %185 = arith.truncf %183 : vector<8x32xf32> to vector<8x32xbf16>
    %cst_48 = arith.constant dense<0.000000e+00> : vector<32x2xf32>
    %186 = tpu.matmul %185, %184, %cst_48 {dimension_numbers = #tpu.dot_dimension_numbers<[0], [0], [1], [1], [0, 1, 1, 1], [], []>} : vector<8x32xbf16>, vector<8x2xbf16>, vector<32x2xf32> -> vector<32x2xf32>
    %cst_49 = arith.constant dense<0.000000e+00> : vector<2xf32>
    %187 = vector.multi_reduction <add>, %181, %cst_49 [0] : vector<8x2xf32> to vector<2xf32>
    %188 = vector.shape_cast %187 : vector<2xf32> to vector<1x2xf32>
    %189 = arith.truncf %118 : vector<32x2xf32> to vector<32x2xbf16>
    %cst_50 = arith.constant dense<0.000000e+00> : vector<8x32xf32>
    %190 = tpu.matmul %184, %189, %cst_50 {dimension_numbers = #tpu.dot_dimension_numbers<[1], [1], [0], [0], [0, 0, 1, 0], [], []>} : vector<8x2xbf16>, vector<32x2xbf16>, vector<8x32xf32> -> vector<8x32xf32>
    %cst_51 = arith.constant 0.000000e+00 : f32
    %191 = vector.broadcast %cst_51 : f32 to vector<8x32xf32>
    %192 = arith.cmpf ogt, %182, %191 : vector<8x32xf32>
    %193 = arith.extui %192 : vector<8x32xi1> to vector<8x32xi32>
    %194 = arith.sitofp %193 : vector<8x32xi32> to vector<8x32xf32>
    %195 = arith.mulf %190, %194 : vector<8x32xf32>
    %196 = arith.truncf %195 : vector<8x32xf32> to vector<8x32xbf16>
    %cst_52 = arith.constant dense<0.000000e+00> : vector<64x32xf32>
    %197 = tpu.matmul %46, %196, %cst_52 {dimension_numbers = #tpu.dot_dimension_numbers<[0], [0], [1], [1], [0, 1, 1, 1], [], []>} : vector<8x64xbf16>, vector<8x32xbf16>, vector<64x32xf32> -> vector<64x32xf32>
    %cst_53 = arith.constant dense<0.000000e+00> : vector<32xf32>
    %198 = vector.multi_reduction <add>, %195, %cst_53 [0] : vector<8x32xf32> to vector<32xf32>
    %199 = vector.shape_cast %198 : vector<32xf32> to vector<1x32xf32>
    %cst_54 = arith.constant 1.000000e-01 : f32
    %200 = vector.broadcast %cst_54 : f32 to vector<64x32xf32>
    %201 = arith.mulf %200, %197 : vector<64x32xf32>
    %202 = arith.subf %112, %201 : vector<64x32xf32>
    %cst_55 = arith.constant 1.000000e-01 : f32
    %203 = vector.broadcast %cst_55 : f32 to vector<1x32xf32>
    %204 = arith.mulf %203, %199 : vector<1x32xf32>
    %205 = arith.subf %115, %204 : vector<1x32xf32>
    %cst_56 = arith.constant 1.000000e-01 : f32
    %206 = vector.broadcast %cst_56 : f32 to vector<32x2xf32>
    %207 = arith.mulf %206, %186 : vector<32x2xf32>
    %208 = arith.subf %118, %207 : vector<32x2xf32>
    %cst_57 = arith.constant 1.000000e-01 : f32
    %209 = vector.broadcast %cst_57 : f32 to vector<1x2xf32>
    %210 = arith.mulf %209, %188 : vector<1x2xf32>
    %211 = arith.subf %121, %210 : vector<1x2xf32>
    %212 = arith.truncf %202 : vector<64x32xf32> to vector<64x32xbf16>
    %213 = arith.truncf %208 : vector<32x2xf32> to vector<32x2xbf16>
    %cst_58 = arith.constant dense<0.000000e+00> : vector<16x32xf32>
    %214 = tpu.matmul %43, %212, %cst_58 {dimension_numbers = #tpu.dot_dimension_numbers<[1], [0], [0], [1], [0, 0, 1, 1], [], []>} : vector<16x64xbf16>, vector<64x32xbf16>, vector<16x32xf32> -> vector<16x32xf32>
    %215 = vector.broadcast %205 : vector<1x32xf32> to vector<16x32xf32>
    %216 = arith.addf %214, %215 : vector<16x32xf32>
    %cst_59 = arith.constant 0.000000e+00 : f32
    %217 = vector.broadcast %cst_59 : f32 to vector<16x32xf32>
    %218 = arith.maximumf %216, %217 : vector<16x32xf32>
    %219 = arith.truncf %218 : vector<16x32xf32> to vector<16x32xbf16>
    %cst_60 = arith.constant dense<0.000000e+00> : vector<16x2xf32>
    %220 = tpu.matmul %219, %213, %cst_60 {dimension_numbers = #tpu.dot_dimension_numbers<[1], [0], [0], [1], [0, 0, 1, 1], [], []>} : vector<16x32xbf16>, vector<32x2xbf16>, vector<16x2xf32> -> vector<16x2xf32>
    %221 = vector.broadcast %211 : vector<1x2xf32> to vector<16x2xf32>
    %222 = arith.addf %220, %221 : vector<16x2xf32>
    %cst_61 = arith.constant dense<0xFF800000> : vector<16xf32>
    %223 = vector.multi_reduction <maximumf>, %222, %cst_61 [1] : vector<16x2xf32> to vector<16xf32>
    %224 = vector.shape_cast %223 : vector<16xf32> to vector<16x1xf32>
    %225 = vector.broadcast %224 : vector<16x1xf32> to vector<16x2xf32>
    %226 = arith.subf %222, %225 : vector<16x2xf32>
    %227 = math.exp %226 : vector<16x2xf32>
    %cst_62 = arith.constant dense<0.000000e+00> : vector<16xf32>
    %228 = vector.multi_reduction <add>, %227, %cst_62 [1] : vector<16x2xf32> to vector<16xf32>
    %229 = vector.shape_cast %228 : vector<16xf32> to vector<16x1xf32>
    %230 = vector.extract_strided_slice %222 {offsets = [0, 0], sizes = [8, 2], strides = [1, 1]} : vector<16x2xf32> to vector<8x2xf32>
    %231 = vector.extract_strided_slice %226 {offsets = [0, 0], sizes = [8, 2], strides = [1, 1]} : vector<16x2xf32> to vector<8x2xf32>
    %232 = vector.extract_strided_slice %229 {offsets = [0, 0], sizes = [8, 1], strides = [1, 1]} : vector<16x1xf32> to vector<8x1xf32>
    %233 = math.log %232 : vector<8x1xf32>
    %234 = vector.broadcast %233 : vector<8x1xf32> to vector<8x2xf32>
    %235 = arith.subf %231, %234 : vector<8x2xf32>
    %236 = arith.mulf %47, %235 : vector<8x2xf32>
    %237 = vector.shape_cast %236 : vector<8x2xf32> to vector<1x8x2xf32>
    %cst_63 = arith.constant dense<0.000000e+00> : vector<1xf32>
    %238 = vector.multi_reduction <add>, %237, %cst_63 [1, 2] : vector<1x8x2xf32> to vector<1xf32>
    %239 = vector.shape_cast %238 : vector<1xf32> to vector<1x1x1xf32>
    %240 = vector.extract %239[0, 0, 0] : f32 from vector<1x1x1xf32>
    %241 = vector.broadcast %240 : f32 to vector<1x1xf32>
    %cst_64 = arith.constant 0.000000e+00 : f32
    %242 = vector.broadcast %cst_64 : f32 to vector<1x1xf32>
    %243 = arith.subf %242, %241 : vector<1x1xf32>
    %cst_65 = arith.constant 8.000000e+00 : f32
    %244 = vector.broadcast %cst_65 : f32 to vector<1x1xf32>
    %245 = arith.divf %243, %244 : vector<1x1xf32>
    %246 = tpu.iota {dimensions = array<i32: 1>} : vector<8x2xi32>
    %cst_66 = arith.constant dense<0xFF800000> : vector<8xf32>
    %247 = vector.multi_reduction <maximumf>, %230, %cst_66 [1] : vector<8x2xf32> to vector<8xf32>
    %248 = vector.shape_cast %247 : vector<8xf32> to vector<8x1xf32>
    %249 = vector.broadcast %248 : vector<8x1xf32> to vector<8x2xf32>
    %250 = arith.cmpf oeq, %230, %249 : vector<8x2xf32>
    %c2_i32_67 = arith.constant 2 : i32
    %251 = vector.broadcast %c2_i32_67 : i32 to vector<8x2xi32>
    %252 = arith.select %250, %246, %251 : vector<8x2xi1>, vector<8x2xi32>
    %cst_68 = arith.constant dense<2147483647> : vector<8xi32>
    %253 = vector.multi_reduction <minsi>, %252, %cst_68 [1] : vector<8x2xi32> to vector<8xi32>
    %254 = vector.shape_cast %253 : vector<8xi32> to vector<8x1xi32>
    %255 = vector.broadcast %254 : vector<8x1xi32> to vector<8x2xi32>
    %256 = arith.cmpi eq, %246, %255 : vector<8x2xi32>
    %257 = arith.extui %256 : vector<8x2xi1> to vector<8x2xi32>
    %258 = arith.sitofp %257 : vector<8x2xi32> to vector<8x2xf32>
    %259 = arith.mulf %258, %47 : vector<8x2xf32>
    %260 = vector.shape_cast %259 : vector<8x2xf32> to vector<1x8x2xf32>
    %cst_69 = arith.constant dense<0.000000e+00> : vector<1xf32>
    %261 = vector.multi_reduction <add>, %260, %cst_69 [1, 2] : vector<1x8x2xf32> to vector<1xf32>
    %262 = vector.shape_cast %261 : vector<1xf32> to vector<1x1x1xf32>
    %263 = vector.extract %262[0, 0, 0] : f32 from vector<1x1x1xf32>
    %264 = vector.broadcast %263 : f32 to vector<1x1xf32>
    %265 = vector.extract_strided_slice %227 {offsets = [8, 0], sizes = [8, 2], strides = [1, 1]} : vector<16x2xf32> to vector<8x2xf32>
    %266 = vector.extract_strided_slice %229 {offsets = [8, 0], sizes = [8, 1], strides = [1, 1]} : vector<16x1xf32> to vector<8x1xf32>
    %267 = vector.broadcast %266 : vector<8x1xf32> to vector<8x2xf32>
    %268 = arith.divf %265, %267 : vector<8x2xf32>
    %269 = arith.subf %268, %48 : vector<8x2xf32>
    %cst_70 = arith.constant 8.000000e+00 : f32
    %270 = vector.broadcast %cst_70 : f32 to vector<8x2xf32>
    %271 = arith.divf %269, %270 : vector<8x2xf32>
    %272 = vector.extract_strided_slice %216 {offsets = [8, 0], sizes = [8, 32], strides = [1, 1]} : vector<16x32xf32> to vector<8x32xf32>
    %273 = vector.extract_strided_slice %218 {offsets = [8, 0], sizes = [8, 32], strides = [1, 1]} : vector<16x32xf32> to vector<8x32xf32>
    %274 = arith.truncf %271 : vector<8x2xf32> to vector<8x2xbf16>
    %275 = arith.truncf %273 : vector<8x32xf32> to vector<8x32xbf16>
    %cst_71 = arith.constant dense<0.000000e+00> : vector<32x2xf32>
    %276 = tpu.matmul %275, %274, %cst_71 {dimension_numbers = #tpu.dot_dimension_numbers<[0], [0], [1], [1], [0, 1, 1, 1], [], []>} : vector<8x32xbf16>, vector<8x2xbf16>, vector<32x2xf32> -> vector<32x2xf32>
    %cst_72 = arith.constant dense<0.000000e+00> : vector<2xf32>
    %277 = vector.multi_reduction <add>, %271, %cst_72 [0] : vector<8x2xf32> to vector<2xf32>
    %278 = vector.shape_cast %277 : vector<2xf32> to vector<1x2xf32>
    %279 = arith.truncf %208 : vector<32x2xf32> to vector<32x2xbf16>
    %cst_73 = arith.constant dense<0.000000e+00> : vector<8x32xf32>
    %280 = tpu.matmul %274, %279, %cst_73 {dimension_numbers = #tpu.dot_dimension_numbers<[1], [1], [0], [0], [0, 0, 1, 0], [], []>} : vector<8x2xbf16>, vector<32x2xbf16>, vector<8x32xf32> -> vector<8x32xf32>
    %cst_74 = arith.constant 0.000000e+00 : f32
    %281 = vector.broadcast %cst_74 : f32 to vector<8x32xf32>
    %282 = arith.cmpf ogt, %272, %281 : vector<8x32xf32>
    %283 = arith.extui %282 : vector<8x32xi1> to vector<8x32xi32>
    %284 = arith.sitofp %283 : vector<8x32xi32> to vector<8x32xf32>
    %285 = arith.mulf %280, %284 : vector<8x32xf32>
    %286 = arith.truncf %285 : vector<8x32xf32> to vector<8x32xbf16>
    %cst_75 = arith.constant dense<0.000000e+00> : vector<64x32xf32>
    %287 = tpu.matmul %46, %286, %cst_75 {dimension_numbers = #tpu.dot_dimension_numbers<[0], [0], [1], [1], [0, 1, 1, 1], [], []>} : vector<8x64xbf16>, vector<8x32xbf16>, vector<64x32xf32> -> vector<64x32xf32>
    %cst_76 = arith.constant dense<0.000000e+00> : vector<32xf32>
    %288 = vector.multi_reduction <add>, %285, %cst_76 [0] : vector<8x32xf32> to vector<32xf32>
    %289 = vector.shape_cast %288 : vector<32xf32> to vector<1x32xf32>
    %cst_77 = arith.constant 1.000000e-01 : f32
    %290 = vector.broadcast %cst_77 : f32 to vector<64x32xf32>
    %291 = arith.mulf %290, %287 : vector<64x32xf32>
    %292 = arith.subf %202, %291 : vector<64x32xf32>
    %cst_78 = arith.constant 1.000000e-01 : f32
    %293 = vector.broadcast %cst_78 : f32 to vector<1x32xf32>
    %294 = arith.mulf %293, %289 : vector<1x32xf32>
    %295 = arith.subf %205, %294 : vector<1x32xf32>
    %cst_79 = arith.constant 1.000000e-01 : f32
    %296 = vector.broadcast %cst_79 : f32 to vector<32x2xf32>
    %297 = arith.mulf %296, %276 : vector<32x2xf32>
    %298 = arith.subf %208, %297 : vector<32x2xf32>
    %cst_80 = arith.constant 1.000000e-01 : f32
    %299 = vector.broadcast %cst_80 : f32 to vector<1x2xf32>
    %300 = arith.mulf %299, %278 : vector<1x2xf32>
    %301 = arith.subf %211, %300 : vector<1x2xf32>
    %302 = arith.truncf %292 : vector<64x32xf32> to vector<64x32xbf16>
    %303 = arith.truncf %298 : vector<32x2xf32> to vector<32x2xbf16>
    %cst_81 = arith.constant dense<0.000000e+00> : vector<8x32xf32>
    %304 = tpu.matmul %45, %302, %cst_81 {dimension_numbers = #tpu.dot_dimension_numbers<[1], [0], [0], [1], [0, 0, 1, 1], [], []>} : vector<8x64xbf16>, vector<64x32xbf16>, vector<8x32xf32> -> vector<8x32xf32>
    %305 = vector.broadcast %295 : vector<1x32xf32> to vector<8x32xf32>
    %306 = arith.addf %304, %305 : vector<8x32xf32>
    %cst_82 = arith.constant 0.000000e+00 : f32
    %307 = vector.broadcast %cst_82 : f32 to vector<8x32xf32>
    %308 = arith.maximumf %306, %307 : vector<8x32xf32>
    %309 = arith.truncf %308 : vector<8x32xf32> to vector<8x32xbf16>
    %cst_83 = arith.constant dense<0.000000e+00> : vector<8x2xf32>
    %310 = tpu.matmul %309, %303, %cst_83 {dimension_numbers = #tpu.dot_dimension_numbers<[1], [0], [0], [1], [0, 0, 1, 1], [], []>} : vector<8x32xbf16>, vector<32x2xbf16>, vector<8x2xf32> -> vector<8x2xf32>
    %311 = vector.broadcast %301 : vector<1x2xf32> to vector<8x2xf32>
    %312 = arith.addf %310, %311 : vector<8x2xf32>
    %cst_84 = arith.constant dense<0xFF800000> : vector<8xf32>
    %313 = vector.multi_reduction <maximumf>, %312, %cst_84 [1] : vector<8x2xf32> to vector<8xf32>
    %314 = vector.shape_cast %313 : vector<8xf32> to vector<8x1xf32>
    %315 = vector.broadcast %314 : vector<8x1xf32> to vector<8x2xf32>
    %316 = arith.subf %312, %315 : vector<8x2xf32>
    %317 = math.exp %316 : vector<8x2xf32>
    %cst_85 = arith.constant dense<0.000000e+00> : vector<8xf32>
    %318 = vector.multi_reduction <add>, %317, %cst_85 [1] : vector<8x2xf32> to vector<8xf32>
    %319 = vector.shape_cast %318 : vector<8xf32> to vector<8x1xf32>
    %320 = math.log %319 : vector<8x1xf32>
    %321 = vector.broadcast %320 : vector<8x1xf32> to vector<8x2xf32>
    %322 = arith.subf %316, %321 : vector<8x2xf32>
    %323 = arith.mulf %47, %322 : vector<8x2xf32>
    %324 = vector.shape_cast %323 : vector<8x2xf32> to vector<1x8x2xf32>
    %cst_86 = arith.constant dense<0.000000e+00> : vector<1xf32>
    %325 = vector.multi_reduction <add>, %324, %cst_86 [1, 2] : vector<1x8x2xf32> to vector<1xf32>
    %326 = vector.shape_cast %325 : vector<1xf32> to vector<1x1x1xf32>
    %327 = vector.extract %326[0, 0, 0] : f32 from vector<1x1x1xf32>
    %328 = vector.broadcast %327 : f32 to vector<1x1xf32>
    %cst_87 = arith.constant 0.000000e+00 : f32
    %329 = vector.broadcast %cst_87 : f32 to vector<1x1xf32>
    %330 = arith.subf %329, %328 : vector<1x1xf32>
    %cst_88 = arith.constant 8.000000e+00 : f32
    %331 = vector.broadcast %cst_88 : f32 to vector<1x1xf32>
    %332 = arith.divf %330, %331 : vector<1x1xf32>
    %333 = tpu.iota {dimensions = array<i32: 1>} : vector<8x2xi32>
    %cst_89 = arith.constant dense<0xFF800000> : vector<8xf32>
    %334 = vector.multi_reduction <maximumf>, %312, %cst_89 [1] : vector<8x2xf32> to vector<8xf32>
    %335 = vector.shape_cast %334 : vector<8xf32> to vector<8x1xf32>
    %336 = vector.broadcast %335 : vector<8x1xf32> to vector<8x2xf32>
    %337 = arith.cmpf oeq, %312, %336 : vector<8x2xf32>
    %c2_i32_90 = arith.constant 2 : i32
    %338 = vector.broadcast %c2_i32_90 : i32 to vector<8x2xi32>
    %339 = arith.select %337, %333, %338 : vector<8x2xi1>, vector<8x2xi32>
    %cst_91 = arith.constant dense<2147483647> : vector<8xi32>
    %340 = vector.multi_reduction <minsi>, %339, %cst_91 [1] : vector<8x2xi32> to vector<8xi32>
    %341 = vector.shape_cast %340 : vector<8xi32> to vector<8x1xi32>
    %342 = vector.broadcast %341 : vector<8x1xi32> to vector<8x2xi32>
    %343 = arith.cmpi eq, %333, %342 : vector<8x2xi32>
    %344 = arith.extui %343 : vector<8x2xi1> to vector<8x2xi32>
    %345 = arith.sitofp %344 : vector<8x2xi32> to vector<8x2xf32>
    %346 = arith.mulf %345, %47 : vector<8x2xf32>
    %347 = vector.shape_cast %346 : vector<8x2xf32> to vector<1x8x2xf32>
    %cst_92 = arith.constant dense<0.000000e+00> : vector<1xf32>
    %348 = vector.multi_reduction <add>, %347, %cst_92 [1, 2] : vector<1x8x2xf32> to vector<1xf32>
    %349 = vector.shape_cast %348 : vector<1xf32> to vector<1x1x1xf32>
    %350 = vector.extract %349[0, 0, 0] : f32 from vector<1x1x1xf32>
    %351 = vector.broadcast %350 : f32 to vector<1x1xf32>
    %cst_93 = arith.constant 0.000000e+00 : f32
    %352 = vector.broadcast %cst_93 : f32 to vector<1x128xf32>
    %cst_94 = arith.constant 0.000000e+00 : f32
    %353 = vector.broadcast %cst_94 : f32 to vector<1x128xf32>
    %354 = vector.broadcast %65 : vector<1x1xf32> to vector<1x128xf32>
    %355 = arith.mulf %354, %12 : vector<1x128xf32>
    %356 = arith.addf %352, %355 : vector<1x128xf32>
    %357 = vector.broadcast %84 : vector<1x1xf32> to vector<1x128xf32>
    %358 = arith.mulf %357, %12 : vector<1x128xf32>
    %359 = arith.addf %353, %358 : vector<1x128xf32>
    %360 = vector.broadcast %155 : vector<1x1xf32> to vector<1x128xf32>
    %361 = arith.mulf %360, %16 : vector<1x128xf32>
    %362 = arith.addf %356, %361 : vector<1x128xf32>
    %363 = vector.broadcast %174 : vector<1x1xf32> to vector<1x128xf32>
    %364 = arith.mulf %363, %16 : vector<1x128xf32>
    %365 = arith.addf %359, %364 : vector<1x128xf32>
    %366 = vector.broadcast %245 : vector<1x1xf32> to vector<1x128xf32>
    %367 = arith.mulf %366, %20 : vector<1x128xf32>
    %368 = arith.addf %362, %367 : vector<1x128xf32>
    %369 = vector.broadcast %264 : vector<1x1xf32> to vector<1x128xf32>
    %370 = arith.mulf %369, %20 : vector<1x128xf32>
    %371 = arith.addf %365, %370 : vector<1x128xf32>
    %372 = vector.broadcast %332 : vector<1x1xf32> to vector<1x128xf32>
    %373 = arith.mulf %372, %24 : vector<1x128xf32>
    %374 = arith.addf %368, %373 : vector<1x128xf32>
    %375 = vector.broadcast %351 : vector<1x1xf32> to vector<1x128xf32>
    %376 = arith.mulf %375, %24 : vector<1x128xf32>
    %377 = arith.addf %371, %376 : vector<1x128xf32>
    %378 = vector.extract_strided_slice %5 {offsets = [16, 0], sizes = [16, 64], strides = [1, 1]} : vector<32x64xbf16> to vector<16x64xbf16>
    %379 = vector.extract_strided_slice %7 {offsets = [16, 0], sizes = [16, 2], strides = [1, 1]} : vector<32x2xf32> to vector<16x2xf32>
    %380 = vector.extract_strided_slice %378 {offsets = [0, 0], sizes = [8, 64], strides = [1, 1]} : vector<16x64xbf16> to vector<8x64xbf16>
    %381 = vector.extract_strided_slice %378 {offsets = [8, 0], sizes = [8, 64], strides = [1, 1]} : vector<16x64xbf16> to vector<8x64xbf16>
    %382 = vector.extract_strided_slice %379 {offsets = [0, 0], sizes = [8, 2], strides = [1, 1]} : vector<16x2xf32> to vector<8x2xf32>
    %383 = vector.extract_strided_slice %379 {offsets = [8, 0], sizes = [8, 2], strides = [1, 1]} : vector<16x2xf32> to vector<8x2xf32>
    %384 = vector.extract_strided_slice %35 {offsets = [16, 0], sizes = [16, 2], strides = [1, 1]} : vector<32x2xf32> to vector<16x2xf32>
    %385 = vector.extract_strided_slice %384 {offsets = [0, 0], sizes = [8, 2], strides = [1, 1]} : vector<16x2xf32> to vector<8x2xf32>
    %386 = vector.extract_strided_slice %39 {offsets = [16, 0], sizes = [8, 2], strides = [1, 1]} : vector<32x2xf32> to vector<8x2xf32>
    %387 = vector.extract_strided_slice %42 {offsets = [16, 0], sizes = [8, 1], strides = [1, 1]} : vector<32x1xf32> to vector<8x1xf32>
    %388 = math.log %387 : vector<8x1xf32>
    %389 = vector.broadcast %388 : vector<8x1xf32> to vector<8x2xf32>
    %390 = arith.subf %386, %389 : vector<8x2xf32>
    %391 = arith.mulf %382, %390 : vector<8x2xf32>
    %392 = vector.shape_cast %391 : vector<8x2xf32> to vector<1x8x2xf32>
    %cst_95 = arith.constant dense<0.000000e+00> : vector<1xf32>
    %393 = vector.multi_reduction <add>, %392, %cst_95 [1, 2] : vector<1x8x2xf32> to vector<1xf32>
    %394 = vector.shape_cast %393 : vector<1xf32> to vector<1x1x1xf32>
    %395 = vector.extract %394[0, 0, 0] : f32 from vector<1x1x1xf32>
    %396 = vector.broadcast %395 : f32 to vector<1x1xf32>
    %cst_96 = arith.constant 0.000000e+00 : f32
    %397 = vector.broadcast %cst_96 : f32 to vector<1x1xf32>
    %398 = arith.subf %397, %396 : vector<1x1xf32>
    %cst_97 = arith.constant 8.000000e+00 : f32
    %399 = vector.broadcast %cst_97 : f32 to vector<1x1xf32>
    %400 = arith.divf %398, %399 : vector<1x1xf32>
    %401 = tpu.iota {dimensions = array<i32: 1>} : vector<8x2xi32>
    %cst_98 = arith.constant dense<0xFF800000> : vector<8xf32>
    %402 = vector.multi_reduction <maximumf>, %385, %cst_98 [1] : vector<8x2xf32> to vector<8xf32>
    %403 = vector.shape_cast %402 : vector<8xf32> to vector<8x1xf32>
    %404 = vector.broadcast %403 : vector<8x1xf32> to vector<8x2xf32>
    %405 = arith.cmpf oeq, %385, %404 : vector<8x2xf32>
    %c2_i32_99 = arith.constant 2 : i32
    %406 = vector.broadcast %c2_i32_99 : i32 to vector<8x2xi32>
    %407 = arith.select %405, %401, %406 : vector<8x2xi1>, vector<8x2xi32>
    %cst_100 = arith.constant dense<2147483647> : vector<8xi32>
    %408 = vector.multi_reduction <minsi>, %407, %cst_100 [1] : vector<8x2xi32> to vector<8xi32>
    %409 = vector.shape_cast %408 : vector<8xi32> to vector<8x1xi32>
    %410 = vector.broadcast %409 : vector<8x1xi32> to vector<8x2xi32>
    %411 = arith.cmpi eq, %401, %410 : vector<8x2xi32>
    %412 = arith.extui %411 : vector<8x2xi1> to vector<8x2xi32>
    %413 = arith.sitofp %412 : vector<8x2xi32> to vector<8x2xf32>
    %414 = arith.mulf %413, %382 : vector<8x2xf32>
    %415 = vector.shape_cast %414 : vector<8x2xf32> to vector<1x8x2xf32>
    %cst_101 = arith.constant dense<0.000000e+00> : vector<1xf32>
    %416 = vector.multi_reduction <add>, %415, %cst_101 [1, 2] : vector<1x8x2xf32> to vector<1xf32>
    %417 = vector.shape_cast %416 : vector<1xf32> to vector<1x1x1xf32>
    %418 = vector.extract %417[0, 0, 0] : f32 from vector<1x1x1xf32>
    %419 = vector.broadcast %418 : f32 to vector<1x1xf32>
    %420 = vector.extract_strided_slice %40 {offsets = [24, 0], sizes = [8, 2], strides = [1, 1]} : vector<32x2xf32> to vector<8x2xf32>
    %421 = vector.extract_strided_slice %42 {offsets = [24, 0], sizes = [8, 1], strides = [1, 1]} : vector<32x1xf32> to vector<8x1xf32>
    %422 = vector.broadcast %421 : vector<8x1xf32> to vector<8x2xf32>
    %423 = arith.divf %420, %422 : vector<8x2xf32>
    %424 = arith.subf %423, %383 : vector<8x2xf32>
    %cst_102 = arith.constant 8.000000e+00 : f32
    %425 = vector.broadcast %cst_102 : f32 to vector<8x2xf32>
    %426 = arith.divf %424, %425 : vector<8x2xf32>
    %427 = vector.extract_strided_slice %29 {offsets = [24, 0], sizes = [8, 32], strides = [1, 1]} : vector<32x32xf32> to vector<8x32xf32>
    %428 = vector.extract_strided_slice %31 {offsets = [24, 0], sizes = [8, 32], strides = [1, 1]} : vector<32x32xf32> to vector<8x32xf32>
    %429 = arith.truncf %426 : vector<8x2xf32> to vector<8x2xbf16>
    %430 = arith.truncf %428 : vector<8x32xf32> to vector<8x32xbf16>
    %cst_103 = arith.constant dense<0.000000e+00> : vector<32x2xf32>
    %431 = tpu.matmul %430, %429, %cst_103 {dimension_numbers = #tpu.dot_dimension_numbers<[0], [0], [1], [1], [0, 1, 1, 1], [], []>} : vector<8x32xbf16>, vector<8x2xbf16>, vector<32x2xf32> -> vector<32x2xf32>
    %cst_104 = arith.constant dense<0.000000e+00> : vector<2xf32>
    %432 = vector.multi_reduction <add>, %426, %cst_104 [0] : vector<8x2xf32> to vector<2xf32>
    %433 = vector.shape_cast %432 : vector<2xf32> to vector<1x2xf32>
    %434 = arith.truncf %2 : vector<32x2xf32> to vector<32x2xbf16>
    %cst_105 = arith.constant dense<0.000000e+00> : vector<8x32xf32>
    %435 = tpu.matmul %429, %434, %cst_105 {dimension_numbers = #tpu.dot_dimension_numbers<[1], [1], [0], [0], [0, 0, 1, 0], [], []>} : vector<8x2xbf16>, vector<32x2xbf16>, vector<8x32xf32> -> vector<8x32xf32>
    %cst_106 = arith.constant 0.000000e+00 : f32
    %436 = vector.broadcast %cst_106 : f32 to vector<8x32xf32>
    %437 = arith.cmpf ogt, %427, %436 : vector<8x32xf32>
    %438 = arith.extui %437 : vector<8x32xi1> to vector<8x32xi32>
    %439 = arith.sitofp %438 : vector<8x32xi32> to vector<8x32xf32>
    %440 = arith.mulf %435, %439 : vector<8x32xf32>
    %441 = arith.truncf %440 : vector<8x32xf32> to vector<8x32xbf16>
    %cst_107 = arith.constant dense<0.000000e+00> : vector<64x32xf32>
    %442 = tpu.matmul %381, %441, %cst_107 {dimension_numbers = #tpu.dot_dimension_numbers<[0], [0], [1], [1], [0, 1, 1, 1], [], []>} : vector<8x64xbf16>, vector<8x32xbf16>, vector<64x32xf32> -> vector<64x32xf32>
    %cst_108 = arith.constant dense<0.000000e+00> : vector<32xf32>
    %443 = vector.multi_reduction <add>, %440, %cst_108 [0] : vector<8x32xf32> to vector<32xf32>
    %444 = vector.shape_cast %443 : vector<32xf32> to vector<1x32xf32>
    %cst_109 = arith.constant 1.000000e-01 : f32
    %445 = vector.broadcast %cst_109 : f32 to vector<64x32xf32>
    %446 = arith.mulf %445, %442 : vector<64x32xf32>
    %447 = arith.subf %0, %446 : vector<64x32xf32>
    %cst_110 = arith.constant 1.000000e-01 : f32
    %448 = vector.broadcast %cst_110 : f32 to vector<1x32xf32>
    %449 = arith.mulf %448, %444 : vector<1x32xf32>
    %450 = arith.subf %1, %449 : vector<1x32xf32>
    %cst_111 = arith.constant 1.000000e-01 : f32
    %451 = vector.broadcast %cst_111 : f32 to vector<32x2xf32>
    %452 = arith.mulf %451, %431 : vector<32x2xf32>
    %453 = arith.subf %2, %452 : vector<32x2xf32>
    %cst_112 = arith.constant 1.000000e-01 : f32
    %454 = vector.broadcast %cst_112 : f32 to vector<1x2xf32>
    %455 = arith.mulf %454, %433 : vector<1x2xf32>
    %456 = arith.subf %3, %455 : vector<1x2xf32>
    %457 = arith.truncf %447 : vector<64x32xf32> to vector<64x32xbf16>
    %458 = arith.truncf %453 : vector<32x2xf32> to vector<32x2xbf16>
    %cst_113 = arith.constant dense<0.000000e+00> : vector<16x32xf32>
    %459 = tpu.matmul %378, %457, %cst_113 {dimension_numbers = #tpu.dot_dimension_numbers<[1], [0], [0], [1], [0, 0, 1, 1], [], []>} : vector<16x64xbf16>, vector<64x32xbf16>, vector<16x32xf32> -> vector<16x32xf32>
    %460 = vector.broadcast %450 : vector<1x32xf32> to vector<16x32xf32>
    %461 = arith.addf %459, %460 : vector<16x32xf32>
    %cst_114 = arith.constant 0.000000e+00 : f32
    %462 = vector.broadcast %cst_114 : f32 to vector<16x32xf32>
    %463 = arith.maximumf %461, %462 : vector<16x32xf32>
    %464 = arith.truncf %463 : vector<16x32xf32> to vector<16x32xbf16>
    %cst_115 = arith.constant dense<0.000000e+00> : vector<16x2xf32>
    %465 = tpu.matmul %464, %458, %cst_115 {dimension_numbers = #tpu.dot_dimension_numbers<[1], [0], [0], [1], [0, 0, 1, 1], [], []>} : vector<16x32xbf16>, vector<32x2xbf16>, vector<16x2xf32> -> vector<16x2xf32>
    %466 = vector.broadcast %456 : vector<1x2xf32> to vector<16x2xf32>
    %467 = arith.addf %465, %466 : vector<16x2xf32>
    %cst_116 = arith.constant dense<0xFF800000> : vector<16xf32>
    %468 = vector.multi_reduction <maximumf>, %467, %cst_116 [1] : vector<16x2xf32> to vector<16xf32>
    %469 = vector.shape_cast %468 : vector<16xf32> to vector<16x1xf32>
    %470 = vector.broadcast %469 : vector<16x1xf32> to vector<16x2xf32>
    %471 = arith.subf %467, %470 : vector<16x2xf32>
    %472 = math.exp %471 : vector<16x2xf32>
    %cst_117 = arith.constant dense<0.000000e+00> : vector<16xf32>
    %473 = vector.multi_reduction <add>, %472, %cst_117 [1] : vector<16x2xf32> to vector<16xf32>
    %474 = vector.shape_cast %473 : vector<16xf32> to vector<16x1xf32>
    %475 = vector.extract_strided_slice %467 {offsets = [0, 0], sizes = [8, 2], strides = [1, 1]} : vector<16x2xf32> to vector<8x2xf32>
    %476 = vector.extract_strided_slice %471 {offsets = [0, 0], sizes = [8, 2], strides = [1, 1]} : vector<16x2xf32> to vector<8x2xf32>
    %477 = vector.extract_strided_slice %474 {offsets = [0, 0], sizes = [8, 1], strides = [1, 1]} : vector<16x1xf32> to vector<8x1xf32>
    %478 = math.log %477 : vector<8x1xf32>
    %479 = vector.broadcast %478 : vector<8x1xf32> to vector<8x2xf32>
    %480 = arith.subf %476, %479 : vector<8x2xf32>
    %481 = arith.mulf %382, %480 : vector<8x2xf32>
    %482 = vector.shape_cast %481 : vector<8x2xf32> to vector<1x8x2xf32>
    %cst_118 = arith.constant dense<0.000000e+00> : vector<1xf32>
    %483 = vector.multi_reduction <add>, %482, %cst_118 [1, 2] : vector<1x8x2xf32> to vector<1xf32>
    %484 = vector.shape_cast %483 : vector<1xf32> to vector<1x1x1xf32>
    %485 = vector.extract %484[0, 0, 0] : f32 from vector<1x1x1xf32>
    %486 = vector.broadcast %485 : f32 to vector<1x1xf32>
    %cst_119 = arith.constant 0.000000e+00 : f32
    %487 = vector.broadcast %cst_119 : f32 to vector<1x1xf32>
    %488 = arith.subf %487, %486 : vector<1x1xf32>
    %cst_120 = arith.constant 8.000000e+00 : f32
    %489 = vector.broadcast %cst_120 : f32 to vector<1x1xf32>
    %490 = arith.divf %488, %489 : vector<1x1xf32>
    %491 = tpu.iota {dimensions = array<i32: 1>} : vector<8x2xi32>
    %cst_121 = arith.constant dense<0xFF800000> : vector<8xf32>
    %492 = vector.multi_reduction <maximumf>, %475, %cst_121 [1] : vector<8x2xf32> to vector<8xf32>
    %493 = vector.shape_cast %492 : vector<8xf32> to vector<8x1xf32>
    %494 = vector.broadcast %493 : vector<8x1xf32> to vector<8x2xf32>
    %495 = arith.cmpf oeq, %475, %494 : vector<8x2xf32>
    %c2_i32_122 = arith.constant 2 : i32
    %496 = vector.broadcast %c2_i32_122 : i32 to vector<8x2xi32>
    %497 = arith.select %495, %491, %496 : vector<8x2xi1>, vector<8x2xi32>
    %cst_123 = arith.constant dense<2147483647> : vector<8xi32>
    %498 = vector.multi_reduction <minsi>, %497, %cst_123 [1] : vector<8x2xi32> to vector<8xi32>
    %499 = vector.shape_cast %498 : vector<8xi32> to vector<8x1xi32>
    %500 = vector.broadcast %499 : vector<8x1xi32> to vector<8x2xi32>
    %501 = arith.cmpi eq, %491, %500 : vector<8x2xi32>
    %502 = arith.extui %501 : vector<8x2xi1> to vector<8x2xi32>
    %503 = arith.sitofp %502 : vector<8x2xi32> to vector<8x2xf32>
    %504 = arith.mulf %503, %382 : vector<8x2xf32>
    %505 = vector.shape_cast %504 : vector<8x2xf32> to vector<1x8x2xf32>
    %cst_124 = arith.constant dense<0.000000e+00> : vector<1xf32>
    %506 = vector.multi_reduction <add>, %505, %cst_124 [1, 2] : vector<1x8x2xf32> to vector<1xf32>
    %507 = vector.shape_cast %506 : vector<1xf32> to vector<1x1x1xf32>
    %508 = vector.extract %507[0, 0, 0] : f32 from vector<1x1x1xf32>
    %509 = vector.broadcast %508 : f32 to vector<1x1xf32>
    %510 = vector.extract_strided_slice %472 {offsets = [8, 0], sizes = [8, 2], strides = [1, 1]} : vector<16x2xf32> to vector<8x2xf32>
    %511 = vector.extract_strided_slice %474 {offsets = [8, 0], sizes = [8, 1], strides = [1, 1]} : vector<16x1xf32> to vector<8x1xf32>
    %512 = vector.broadcast %511 : vector<8x1xf32> to vector<8x2xf32>
    %513 = arith.divf %510, %512 : vector<8x2xf32>
    %514 = arith.subf %513, %383 : vector<8x2xf32>
    %cst_125 = arith.constant 8.000000e+00 : f32
    %515 = vector.broadcast %cst_125 : f32 to vector<8x2xf32>
    %516 = arith.divf %514, %515 : vector<8x2xf32>
    %517 = vector.extract_strided_slice %461 {offsets = [8, 0], sizes = [8, 32], strides = [1, 1]} : vector<16x32xf32> to vector<8x32xf32>
    %518 = vector.extract_strided_slice %463 {offsets = [8, 0], sizes = [8, 32], strides = [1, 1]} : vector<16x32xf32> to vector<8x32xf32>
    %519 = arith.truncf %516 : vector<8x2xf32> to vector<8x2xbf16>
    %520 = arith.truncf %518 : vector<8x32xf32> to vector<8x32xbf16>
    %cst_126 = arith.constant dense<0.000000e+00> : vector<32x2xf32>
    %521 = tpu.matmul %520, %519, %cst_126 {dimension_numbers = #tpu.dot_dimension_numbers<[0], [0], [1], [1], [0, 1, 1, 1], [], []>} : vector<8x32xbf16>, vector<8x2xbf16>, vector<32x2xf32> -> vector<32x2xf32>
    %cst_127 = arith.constant dense<0.000000e+00> : vector<2xf32>
    %522 = vector.multi_reduction <add>, %516, %cst_127 [0] : vector<8x2xf32> to vector<2xf32>
    %523 = vector.shape_cast %522 : vector<2xf32> to vector<1x2xf32>
    %524 = arith.truncf %453 : vector<32x2xf32> to vector<32x2xbf16>
    %cst_128 = arith.constant dense<0.000000e+00> : vector<8x32xf32>
    %525 = tpu.matmul %519, %524, %cst_128 {dimension_numbers = #tpu.dot_dimension_numbers<[1], [1], [0], [0], [0, 0, 1, 0], [], []>} : vector<8x2xbf16>, vector<32x2xbf16>, vector<8x32xf32> -> vector<8x32xf32>
    %cst_129 = arith.constant 0.000000e+00 : f32
    %526 = vector.broadcast %cst_129 : f32 to vector<8x32xf32>
    %527 = arith.cmpf ogt, %517, %526 : vector<8x32xf32>
    %528 = arith.extui %527 : vector<8x32xi1> to vector<8x32xi32>
    %529 = arith.sitofp %528 : vector<8x32xi32> to vector<8x32xf32>
    %530 = arith.mulf %525, %529 : vector<8x32xf32>
    %531 = arith.truncf %530 : vector<8x32xf32> to vector<8x32xbf16>
    %cst_130 = arith.constant dense<0.000000e+00> : vector<64x32xf32>
    %532 = tpu.matmul %381, %531, %cst_130 {dimension_numbers = #tpu.dot_dimension_numbers<[0], [0], [1], [1], [0, 1, 1, 1], [], []>} : vector<8x64xbf16>, vector<8x32xbf16>, vector<64x32xf32> -> vector<64x32xf32>
    %cst_131 = arith.constant dense<0.000000e+00> : vector<32xf32>
    %533 = vector.multi_reduction <add>, %530, %cst_131 [0] : vector<8x32xf32> to vector<32xf32>
    %534 = vector.shape_cast %533 : vector<32xf32> to vector<1x32xf32>
    %cst_132 = arith.constant 1.000000e-01 : f32
    %535 = vector.broadcast %cst_132 : f32 to vector<64x32xf32>
    %536 = arith.mulf %535, %532 : vector<64x32xf32>
    %537 = arith.subf %447, %536 : vector<64x32xf32>
    %cst_133 = arith.constant 1.000000e-01 : f32
    %538 = vector.broadcast %cst_133 : f32 to vector<1x32xf32>
    %539 = arith.mulf %538, %534 : vector<1x32xf32>
    %540 = arith.subf %450, %539 : vector<1x32xf32>
    %cst_134 = arith.constant 1.000000e-01 : f32
    %541 = vector.broadcast %cst_134 : f32 to vector<32x2xf32>
    %542 = arith.mulf %541, %521 : vector<32x2xf32>
    %543 = arith.subf %453, %542 : vector<32x2xf32>
    %cst_135 = arith.constant 1.000000e-01 : f32
    %544 = vector.broadcast %cst_135 : f32 to vector<1x2xf32>
    %545 = arith.mulf %544, %523 : vector<1x2xf32>
    %546 = arith.subf %456, %545 : vector<1x2xf32>
    %547 = arith.truncf %537 : vector<64x32xf32> to vector<64x32xbf16>
    %548 = arith.truncf %543 : vector<32x2xf32> to vector<32x2xbf16>
    %cst_136 = arith.constant dense<0.000000e+00> : vector<16x32xf32>
    %549 = tpu.matmul %378, %547, %cst_136 {dimension_numbers = #tpu.dot_dimension_numbers<[1], [0], [0], [1], [0, 0, 1, 1], [], []>} : vector<16x64xbf16>, vector<64x32xbf16>, vector<16x32xf32> -> vector<16x32xf32>
    %550 = vector.broadcast %540 : vector<1x32xf32> to vector<16x32xf32>
    %551 = arith.addf %549, %550 : vector<16x32xf32>
    %cst_137 = arith.constant 0.000000e+00 : f32
    %552 = vector.broadcast %cst_137 : f32 to vector<16x32xf32>
    %553 = arith.maximumf %551, %552 : vector<16x32xf32>
    %554 = arith.truncf %553 : vector<16x32xf32> to vector<16x32xbf16>
    %cst_138 = arith.constant dense<0.000000e+00> : vector<16x2xf32>
    %555 = tpu.matmul %554, %548, %cst_138 {dimension_numbers = #tpu.dot_dimension_numbers<[1], [0], [0], [1], [0, 0, 1, 1], [], []>} : vector<16x32xbf16>, vector<32x2xbf16>, vector<16x2xf32> -> vector<16x2xf32>
    %556 = vector.broadcast %546 : vector<1x2xf32> to vector<16x2xf32>
    %557 = arith.addf %555, %556 : vector<16x2xf32>
    %cst_139 = arith.constant dense<0xFF800000> : vector<16xf32>
    %558 = vector.multi_reduction <maximumf>, %557, %cst_139 [1] : vector<16x2xf32> to vector<16xf32>
    %559 = vector.shape_cast %558 : vector<16xf32> to vector<16x1xf32>
    %560 = vector.broadcast %559 : vector<16x1xf32> to vector<16x2xf32>
    %561 = arith.subf %557, %560 : vector<16x2xf32>
    %562 = math.exp %561 : vector<16x2xf32>
    %cst_140 = arith.constant dense<0.000000e+00> : vector<16xf32>
    %563 = vector.multi_reduction <add>, %562, %cst_140 [1] : vector<16x2xf32> to vector<16xf32>
    %564 = vector.shape_cast %563 : vector<16xf32> to vector<16x1xf32>
    %565 = vector.extract_strided_slice %557 {offsets = [0, 0], sizes = [8, 2], strides = [1, 1]} : vector<16x2xf32> to vector<8x2xf32>
    %566 = vector.extract_strided_slice %561 {offsets = [0, 0], sizes = [8, 2], strides = [1, 1]} : vector<16x2xf32> to vector<8x2xf32>
    %567 = vector.extract_strided_slice %564 {offsets = [0, 0], sizes = [8, 1], strides = [1, 1]} : vector<16x1xf32> to vector<8x1xf32>
    %568 = math.log %567 : vector<8x1xf32>
    %569 = vector.broadcast %568 : vector<8x1xf32> to vector<8x2xf32>
    %570 = arith.subf %566, %569 : vector<8x2xf32>
    %571 = arith.mulf %382, %570 : vector<8x2xf32>
    %572 = vector.shape_cast %571 : vector<8x2xf32> to vector<1x8x2xf32>
    %cst_141 = arith.constant dense<0.000000e+00> : vector<1xf32>
    %573 = vector.multi_reduction <add>, %572, %cst_141 [1, 2] : vector<1x8x2xf32> to vector<1xf32>
    %574 = vector.shape_cast %573 : vector<1xf32> to vector<1x1x1xf32>
    %575 = vector.extract %574[0, 0, 0] : f32 from vector<1x1x1xf32>
    %576 = vector.broadcast %575 : f32 to vector<1x1xf32>
    %cst_142 = arith.constant 0.000000e+00 : f32
    %577 = vector.broadcast %cst_142 : f32 to vector<1x1xf32>
    %578 = arith.subf %577, %576 : vector<1x1xf32>
    %cst_143 = arith.constant 8.000000e+00 : f32
    %579 = vector.broadcast %cst_143 : f32 to vector<1x1xf32>
    %580 = arith.divf %578, %579 : vector<1x1xf32>
    %581 = tpu.iota {dimensions = array<i32: 1>} : vector<8x2xi32>
    %cst_144 = arith.constant dense<0xFF800000> : vector<8xf32>
    %582 = vector.multi_reduction <maximumf>, %565, %cst_144 [1] : vector<8x2xf32> to vector<8xf32>
    %583 = vector.shape_cast %582 : vector<8xf32> to vector<8x1xf32>
    %584 = vector.broadcast %583 : vector<8x1xf32> to vector<8x2xf32>
    %585 = arith.cmpf oeq, %565, %584 : vector<8x2xf32>
    %c2_i32_145 = arith.constant 2 : i32
    %586 = vector.broadcast %c2_i32_145 : i32 to vector<8x2xi32>
    %587 = arith.select %585, %581, %586 : vector<8x2xi1>, vector<8x2xi32>
    %cst_146 = arith.constant dense<2147483647> : vector<8xi32>
    %588 = vector.multi_reduction <minsi>, %587, %cst_146 [1] : vector<8x2xi32> to vector<8xi32>
    %589 = vector.shape_cast %588 : vector<8xi32> to vector<8x1xi32>
    %590 = vector.broadcast %589 : vector<8x1xi32> to vector<8x2xi32>
    %591 = arith.cmpi eq, %581, %590 : vector<8x2xi32>
    %592 = arith.extui %591 : vector<8x2xi1> to vector<8x2xi32>
    %593 = arith.sitofp %592 : vector<8x2xi32> to vector<8x2xf32>
    %594 = arith.mulf %593, %382 : vector<8x2xf32>
    %595 = vector.shape_cast %594 : vector<8x2xf32> to vector<1x8x2xf32>
    %cst_147 = arith.constant dense<0.000000e+00> : vector<1xf32>
    %596 = vector.multi_reduction <add>, %595, %cst_147 [1, 2] : vector<1x8x2xf32> to vector<1xf32>
    %597 = vector.shape_cast %596 : vector<1xf32> to vector<1x1x1xf32>
    %598 = vector.extract %597[0, 0, 0] : f32 from vector<1x1x1xf32>
    %599 = vector.broadcast %598 : f32 to vector<1x1xf32>
    %600 = vector.extract_strided_slice %562 {offsets = [8, 0], sizes = [8, 2], strides = [1, 1]} : vector<16x2xf32> to vector<8x2xf32>
    %601 = vector.extract_strided_slice %564 {offsets = [8, 0], sizes = [8, 1], strides = [1, 1]} : vector<16x1xf32> to vector<8x1xf32>
    %602 = vector.broadcast %601 : vector<8x1xf32> to vector<8x2xf32>
    %603 = arith.divf %600, %602 : vector<8x2xf32>
    %604 = arith.subf %603, %383 : vector<8x2xf32>
    %cst_148 = arith.constant 8.000000e+00 : f32
    %605 = vector.broadcast %cst_148 : f32 to vector<8x2xf32>
    %606 = arith.divf %604, %605 : vector<8x2xf32>
    %607 = vector.extract_strided_slice %551 {offsets = [8, 0], sizes = [8, 32], strides = [1, 1]} : vector<16x32xf32> to vector<8x32xf32>
    %608 = vector.extract_strided_slice %553 {offsets = [8, 0], sizes = [8, 32], strides = [1, 1]} : vector<16x32xf32> to vector<8x32xf32>
    %609 = arith.truncf %606 : vector<8x2xf32> to vector<8x2xbf16>
    %610 = arith.truncf %608 : vector<8x32xf32> to vector<8x32xbf16>
    %cst_149 = arith.constant dense<0.000000e+00> : vector<32x2xf32>
    %611 = tpu.matmul %610, %609, %cst_149 {dimension_numbers = #tpu.dot_dimension_numbers<[0], [0], [1], [1], [0, 1, 1, 1], [], []>} : vector<8x32xbf16>, vector<8x2xbf16>, vector<32x2xf32> -> vector<32x2xf32>
    %cst_150 = arith.constant dense<0.000000e+00> : vector<2xf32>
    %612 = vector.multi_reduction <add>, %606, %cst_150 [0] : vector<8x2xf32> to vector<2xf32>
    %613 = vector.shape_cast %612 : vector<2xf32> to vector<1x2xf32>
    %614 = arith.truncf %543 : vector<32x2xf32> to vector<32x2xbf16>
    %cst_151 = arith.constant dense<0.000000e+00> : vector<8x32xf32>
    %615 = tpu.matmul %609, %614, %cst_151 {dimension_numbers = #tpu.dot_dimension_numbers<[1], [1], [0], [0], [0, 0, 1, 0], [], []>} : vector<8x2xbf16>, vector<32x2xbf16>, vector<8x32xf32> -> vector<8x32xf32>
    %cst_152 = arith.constant 0.000000e+00 : f32
    %616 = vector.broadcast %cst_152 : f32 to vector<8x32xf32>
    %617 = arith.cmpf ogt, %607, %616 : vector<8x32xf32>
    %618 = arith.extui %617 : vector<8x32xi1> to vector<8x32xi32>
    %619 = arith.sitofp %618 : vector<8x32xi32> to vector<8x32xf32>
    %620 = arith.mulf %615, %619 : vector<8x32xf32>
    %621 = arith.truncf %620 : vector<8x32xf32> to vector<8x32xbf16>
    %cst_153 = arith.constant dense<0.000000e+00> : vector<64x32xf32>
    %622 = tpu.matmul %381, %621, %cst_153 {dimension_numbers = #tpu.dot_dimension_numbers<[0], [0], [1], [1], [0, 1, 1, 1], [], []>} : vector<8x64xbf16>, vector<8x32xbf16>, vector<64x32xf32> -> vector<64x32xf32>
    %cst_154 = arith.constant dense<0.000000e+00> : vector<32xf32>
    %623 = vector.multi_reduction <add>, %620, %cst_154 [0] : vector<8x32xf32> to vector<32xf32>
    %624 = vector.shape_cast %623 : vector<32xf32> to vector<1x32xf32>
    %cst_155 = arith.constant 1.000000e-01 : f32
    %625 = vector.broadcast %cst_155 : f32 to vector<64x32xf32>
    %626 = arith.mulf %625, %622 : vector<64x32xf32>
    %627 = arith.subf %537, %626 : vector<64x32xf32>
    %cst_156 = arith.constant 1.000000e-01 : f32
    %628 = vector.broadcast %cst_156 : f32 to vector<1x32xf32>
    %629 = arith.mulf %628, %624 : vector<1x32xf32>
    %630 = arith.subf %540, %629 : vector<1x32xf32>
    %cst_157 = arith.constant 1.000000e-01 : f32
    %631 = vector.broadcast %cst_157 : f32 to vector<32x2xf32>
    %632 = arith.mulf %631, %611 : vector<32x2xf32>
    %633 = arith.subf %543, %632 : vector<32x2xf32>
    %cst_158 = arith.constant 1.000000e-01 : f32
    %634 = vector.broadcast %cst_158 : f32 to vector<1x2xf32>
    %635 = arith.mulf %634, %613 : vector<1x2xf32>
    %636 = arith.subf %546, %635 : vector<1x2xf32>
    %637 = arith.truncf %627 : vector<64x32xf32> to vector<64x32xbf16>
    %638 = arith.truncf %633 : vector<32x2xf32> to vector<32x2xbf16>
    %cst_159 = arith.constant dense<0.000000e+00> : vector<8x32xf32>
    %639 = tpu.matmul %380, %637, %cst_159 {dimension_numbers = #tpu.dot_dimension_numbers<[1], [0], [0], [1], [0, 0, 1, 1], [], []>} : vector<8x64xbf16>, vector<64x32xbf16>, vector<8x32xf32> -> vector<8x32xf32>
    %640 = vector.broadcast %630 : vector<1x32xf32> to vector<8x32xf32>
    %641 = arith.addf %639, %640 : vector<8x32xf32>
    %cst_160 = arith.constant 0.000000e+00 : f32
    %642 = vector.broadcast %cst_160 : f32 to vector<8x32xf32>
    %643 = arith.maximumf %641, %642 : vector<8x32xf32>
    %644 = arith.truncf %643 : vector<8x32xf32> to vector<8x32xbf16>
    %cst_161 = arith.constant dense<0.000000e+00> : vector<8x2xf32>
    %645 = tpu.matmul %644, %638, %cst_161 {dimension_numbers = #tpu.dot_dimension_numbers<[1], [0], [0], [1], [0, 0, 1, 1], [], []>} : vector<8x32xbf16>, vector<32x2xbf16>, vector<8x2xf32> -> vector<8x2xf32>
    %646 = vector.broadcast %636 : vector<1x2xf32> to vector<8x2xf32>
    %647 = arith.addf %645, %646 : vector<8x2xf32>
    %cst_162 = arith.constant dense<0xFF800000> : vector<8xf32>
    %648 = vector.multi_reduction <maximumf>, %647, %cst_162 [1] : vector<8x2xf32> to vector<8xf32>
    %649 = vector.shape_cast %648 : vector<8xf32> to vector<8x1xf32>
    %650 = vector.broadcast %649 : vector<8x1xf32> to vector<8x2xf32>
    %651 = arith.subf %647, %650 : vector<8x2xf32>
    %652 = math.exp %651 : vector<8x2xf32>
    %cst_163 = arith.constant dense<0.000000e+00> : vector<8xf32>
    %653 = vector.multi_reduction <add>, %652, %cst_163 [1] : vector<8x2xf32> to vector<8xf32>
    %654 = vector.shape_cast %653 : vector<8xf32> to vector<8x1xf32>
    %655 = math.log %654 : vector<8x1xf32>
    %656 = vector.broadcast %655 : vector<8x1xf32> to vector<8x2xf32>
    %657 = arith.subf %651, %656 : vector<8x2xf32>
    %658 = arith.mulf %382, %657 : vector<8x2xf32>
    %659 = vector.shape_cast %658 : vector<8x2xf32> to vector<1x8x2xf32>
    %cst_164 = arith.constant dense<0.000000e+00> : vector<1xf32>
    %660 = vector.multi_reduction <add>, %659, %cst_164 [1, 2] : vector<1x8x2xf32> to vector<1xf32>
    %661 = vector.shape_cast %660 : vector<1xf32> to vector<1x1x1xf32>
    %662 = vector.extract %661[0, 0, 0] : f32 from vector<1x1x1xf32>
    %663 = vector.broadcast %662 : f32 to vector<1x1xf32>
    %cst_165 = arith.constant 0.000000e+00 : f32
    %664 = vector.broadcast %cst_165 : f32 to vector<1x1xf32>
    %665 = arith.subf %664, %663 : vector<1x1xf32>
    %cst_166 = arith.constant 8.000000e+00 : f32
    %666 = vector.broadcast %cst_166 : f32 to vector<1x1xf32>
    %667 = arith.divf %665, %666 : vector<1x1xf32>
    %668 = tpu.iota {dimensions = array<i32: 1>} : vector<8x2xi32>
    %cst_167 = arith.constant dense<0xFF800000> : vector<8xf32>
    %669 = vector.multi_reduction <maximumf>, %647, %cst_167 [1] : vector<8x2xf32> to vector<8xf32>
    %670 = vector.shape_cast %669 : vector<8xf32> to vector<8x1xf32>
    %671 = vector.broadcast %670 : vector<8x1xf32> to vector<8x2xf32>
    %672 = arith.cmpf oeq, %647, %671 : vector<8x2xf32>
    %c2_i32_168 = arith.constant 2 : i32
    %673 = vector.broadcast %c2_i32_168 : i32 to vector<8x2xi32>
    %674 = arith.select %672, %668, %673 : vector<8x2xi1>, vector<8x2xi32>
    %cst_169 = arith.constant dense<2147483647> : vector<8xi32>
    %675 = vector.multi_reduction <minsi>, %674, %cst_169 [1] : vector<8x2xi32> to vector<8xi32>
    %676 = vector.shape_cast %675 : vector<8xi32> to vector<8x1xi32>
    %677 = vector.broadcast %676 : vector<8x1xi32> to vector<8x2xi32>
    %678 = arith.cmpi eq, %668, %677 : vector<8x2xi32>
    %679 = arith.extui %678 : vector<8x2xi1> to vector<8x2xi32>
    %680 = arith.sitofp %679 : vector<8x2xi32> to vector<8x2xf32>
    %681 = arith.mulf %680, %382 : vector<8x2xf32>
    %682 = vector.shape_cast %681 : vector<8x2xf32> to vector<1x8x2xf32>
    %cst_170 = arith.constant dense<0.000000e+00> : vector<1xf32>
    %683 = vector.multi_reduction <add>, %682, %cst_170 [1, 2] : vector<1x8x2xf32> to vector<1xf32>
    %684 = vector.shape_cast %683 : vector<1xf32> to vector<1x1x1xf32>
    %685 = vector.extract %684[0, 0, 0] : f32 from vector<1x1x1xf32>
    %686 = vector.broadcast %685 : f32 to vector<1x1xf32>
    %cst_171 = arith.constant 0.000000e+00 : f32
    %687 = vector.broadcast %cst_171 : f32 to vector<1x128xf32>
    %cst_172 = arith.constant 0.000000e+00 : f32
    %688 = vector.broadcast %cst_172 : f32 to vector<1x128xf32>
    %689 = vector.broadcast %400 : vector<1x1xf32> to vector<1x128xf32>
    %690 = arith.mulf %689, %12 : vector<1x128xf32>
    %691 = arith.addf %687, %690 : vector<1x128xf32>
    %692 = vector.broadcast %419 : vector<1x1xf32> to vector<1x128xf32>
    %693 = arith.mulf %692, %12 : vector<1x128xf32>
    %694 = arith.addf %688, %693 : vector<1x128xf32>
    %695 = vector.broadcast %490 : vector<1x1xf32> to vector<1x128xf32>
    %696 = arith.mulf %695, %16 : vector<1x128xf32>
    %697 = arith.addf %691, %696 : vector<1x128xf32>
    %698 = vector.broadcast %509 : vector<1x1xf32> to vector<1x128xf32>
    %699 = arith.mulf %698, %16 : vector<1x128xf32>
    %700 = arith.addf %694, %699 : vector<1x128xf32>
    %701 = vector.broadcast %580 : vector<1x1xf32> to vector<1x128xf32>
    %702 = arith.mulf %701, %20 : vector<1x128xf32>
    %703 = arith.addf %697, %702 : vector<1x128xf32>
    %704 = vector.broadcast %599 : vector<1x1xf32> to vector<1x128xf32>
    %705 = arith.mulf %704, %20 : vector<1x128xf32>
    %706 = arith.addf %700, %705 : vector<1x128xf32>
    %707 = vector.broadcast %667 : vector<1x1xf32> to vector<1x128xf32>
    %708 = arith.mulf %707, %24 : vector<1x128xf32>
    %709 = arith.addf %703, %708 : vector<1x128xf32>
    %710 = vector.broadcast %686 : vector<1x1xf32> to vector<1x128xf32>
    %711 = arith.mulf %710, %24 : vector<1x128xf32>
    %712 = arith.addf %706, %711 : vector<1x128xf32>
    %713 = tpu.concatenate %374, %709 in 0 : vector<1x128xf32>, vector<1x128xf32> -> vector<2x128xf32>
    %c0_173 = arith.constant 0 : index
    %c0_174 = arith.constant 0 : index
    %c0_175 = arith.constant 0 : index
    %714 = vector.load %arg7[%c0_173, %c0_174, %c0_175] : memref<1x2x128xf32, #tpu.memory_space<vmem>>, vector<1x2x128xf32>
    %715 = vector.shape_cast %714 : vector<1x2x128xf32> to vector<2x128xf32>
    %716 = vector.shape_cast %713 : vector<2x128xf32> to vector<1x2x128xf32>
    tpu.vector_store %arg7[%c0_173, %c0_174, %c0_175], %716 {strides = array<i32>} : memref<1x2x128xf32, #tpu.memory_space<vmem>>, vector<1x2x128xf32>,
    %717 = tpu.concatenate %377, %712 in 0 : vector<1x128xf32>, vector<1x128xf32> -> vector<2x128xf32>
    %c0_176 = arith.constant 0 : index
    %c0_177 = arith.constant 0 : index
    %c0_178 = arith.constant 0 : index
    %718 = vector.load %arg8[%c0_176, %c0_177, %c0_178] : memref<1x2x128xf32, #tpu.memory_space<vmem>>, vector<1x2x128xf32>
    %719 = vector.shape_cast %718 : vector<1x2x128xf32> to vector<2x128xf32>
    %720 = vector.shape_cast %717 : vector<2x128xf32> to vector<1x2x128xf32>
    tpu.vector_store %arg8[%c0_176, %c0_177, %c0_178], %720 {strides = array<i32>} : memref<1x2x128xf32, #tpu.memory_space<vmem>>, vector<1x2x128xf32>,
    return
  }
  func.func @transform_0(%arg0: i32) -> (i32, i32, i32) {
    %c0_i32 = arith.constant 0 : i32
    %c0_i32_0 = arith.constant 0 : i32
    %c0_i32_1 = arith.constant 0 : i32
    return %arg0, %c0_i32, %c0_i32_0 : i32, i32, i32
  }
  func.func @transform_1(%arg0: i32) -> (i32, i32, i32) {
    %c0_i32 = arith.constant 0 : i32
    %c0_i32_0 = arith.constant 0 : i32
    %c0_i32_1 = arith.constant 0 : i32
    return %arg0, %c0_i32, %c0_i32_0 : i32, i32, i32
  }
  func.func @transform_2(%arg0: i32) -> (i32, i32) {
    %c0_i32 = arith.constant 0 : i32
    %c0_i32_0 = arith.constant 0 : i32
    %c0_i32_1 = arith.constant 0 : i32
    return %c0_i32, %c0_i32_0 : i32, i32
  }
  func.func @transform_3(%arg0: i32) -> (i32, i32) {
    %c0_i32 = arith.constant 0 : i32
    %c0_i32_0 = arith.constant 0 : i32
    %c0_i32_1 = arith.constant 0 : i32
    return %c0_i32, %c0_i32_0 : i32, i32
  }
  func.func @transform_4(%arg0: i32) -> (i32, i32) {
    %c0_i32 = arith.constant 0 : i32
    %c0_i32_0 = arith.constant 0 : i32
    %c0_i32_1 = arith.constant 0 : i32
    return %c0_i32, %c0_i32_0 : i32, i32
  }
  func.func @transform_5(%arg0: i32) -> (i32, i32) {
    %c0_i32 = arith.constant 0 : i32
    %c0_i32_0 = arith.constant 0 : i32
    %c0_i32_1 = arith.constant 0 : i32
    return %c0_i32, %c0_i32_0 : i32, i32
  }
  func.func @transform_6(%arg0: i32) -> (i32, i32, i32) {
    %c0_i32 = arith.constant 0 : i32
    %c0_i32_0 = arith.constant 0 : i32
    %c0_i32_1 = arith.constant 0 : i32
    return %arg0, %c0_i32, %c0_i32_0 : i32, i32, i32
  }
  func.func @transform_7(%arg0: i32) -> (i32, i32, i32) {
    %c0_i32 = arith.constant 0 : i32
    %c0_i32_0 = arith.constant 0 : i32
    %c0_i32_1 = arith.constant 0 : i32
    return %arg0, %c0_i32, %c0_i32_0 : i32, i32, i32
  }
}

</mosaic_0001>

<bundles_post_ra>
// kernel: tpu_custom_call.1
= control target key start
LH: loop header
LB: loop body
LE: loop exit
PB: predicated region body
PF: predicated region fallthrough
CT: control target
= control target key end

     0   :  { %13 = vsyncpa [#allocation3], 0  ;;  %vm86_vm0 = vcmask 523264   ;;  %s4693_s0 = inlined_call_operand.vmem [shape: bf16[1,32,64], index: 0, kind: input, shape index: {}]   ;;  %s4694_s1 = inlined_call_operand.vmem [shape: f32[1,32,2], index: 1, kind: input, shape index: {}]   ;;  %s4695_s2 = inlined_call_operand.vmem [shape: f32[64,32], index: 2, kind: input, shape index: {}]   ;;  %s4696_s3 = inlined_call_operand.vmem [shape: f32[1,32], index: 3, kind: input, shape index: {}]   ;;  %s4697_s4 = inlined_call_operand.vmem [shape: f32[32,2], index: 4, kind: input, shape index: {}]   ;;  %s4698_s5 = inlined_call_operand.vmem [shape: f32[1,2], index: 5, kind: input, shape index: {}]   ;;  %s4699_s6 = inlined_call_operand.hbm [shape: f32[1,2,128], index: 6, kind: output, shape index: {0}]   ;;  %s4700_s7 = inlined_call_operand.hbm [shape: f32[1,2,128], index: 7, kind: output, shape index: {1}]  }
   0x1   :  { %v3644_v0 = vld [vmem:[%s4695_s2] sm:$0xff]  ;;  %v3649_v1 = vld [vmem:[%s4695_s2 + $0x8] sm:$0xff]  ;;  %v3654_v2 = vld [vmem:[%s4695_s2 + $0x10] sm:$0xff] }
   0x2   :  { %v64_v3 = vpack.c.bf16 %v3649_v1, %v3644_v0  ;;  %v3661_v4 = vld [vmem:[%s4695_s2 + $0x18] sm:$0xff]  ;;  %v3668_v6 = vld [vmem:[%s4695_s2 + $0x20] sm:$0xff]  ;;  %v3673_v7 = vld [vmem:[%s4695_s2 + $0x28] sm:$0xff] }
   0x3   :  { %v65_v5 = vpack.c.bf16 %v3661_v4, %v3654_v2  ;;  %v3678_v8 = vld [vmem:[%s4693_s0] sm:$0xf]  ;;  %v43_v9 = vld [vmem:[%s4693_s0 + $0x4] sm:$0xf] }
   0x4   :  { %3143 = vmatprep.subr.bf16.mxu0 %v64_v3  ;;  %v3684_v10 = vcombine.low %v3678_v8, %v43_v9 }
   0x5   :  { %3144 = vmatpush3.bf16.msra.mxu0 %v64_v3 }
   0x6   :  { %14 = vsyncpa [#allocation5], 0  ;;  %3145 = vmatprep.subr.bf16.mxu0 %v65_v5  ;;  %v66_v11 = vpack.c.bf16 %v3673_v7, %v3668_v6  ;;  %v3691_v12 = vld [vmem:[%s4695_s2 + $0x30] sm:$0xff]  ;;  %v3696_v13 = vld [vmem:[%s4695_s2 + $0x38] sm:$0xff]  ;;  %3151 = vmatprep.mubr.msk.bf16.mxu0 %vm86_vm0, %v3684_v10  ;;  %v3597_v24 = vmov 0.0   ;;  %v50_v25 = vlaneseq  ;;  %vm154_vm1 = vcmask 261120  }
   0x7   :  { %v67_v14 = vpack.c.bf16 %v3696_v13, %v3691_v12  ;;  %v44_v15 = vld [vmem:[%s4693_s0 + $0x8] sm:$0xf]  ;;  %v3708_v16 = vld [vmem:[%s4693_s0 + $0xc] sm:$0xf]  ;;  %v3718_v18 = vld [vmem:[%s4697_s4] sm:$0xff]  ;;  %vm210_vm2 = vcmask 15360  }
   0x8   :  { %v3711_v17 = vcombine.low %v44_v15, %v3708_v16  ;;  %v3723_v19 = vld [vmem:[%s4697_s4 + $0x8] sm:$0xff]  ;;  %v3730_v21 = vld [vmem:[%s4697_s4 + $0x10] sm:$0xff]  ;;  %v3735_v22 = vld [vmem:[%s4697_s4 + $0x18] sm:$0xff]  ;;  %v72_v26 = vshrl.u32 %v50_v25, 7  ;;  %vm3598_vm3 = vmmov 0   ;;  %vm318_vm4 = vcmask 64512  }
   0x9   :  { %3146 = vmatpush3.bf16.msra.mxu0 %v65_v5  ;;  %v68_v20 = vpack.c.bf16 %v3723_v19, %v3718_v18  ;;  %v69_v23 = vpack.c.bf16 %v3735_v22, %v3730_v21  ;;  %v3746_v28 = vld [vmem:[%s4696_s3] sm:$0x1]  ;;  %vm325_vm5 = vcmask 1043456   ;;  %s3599_s14 = smov [#allocation2]  }
   0xa   :  { %3147 = vmatprep.subr.bf16.mxu0 %v66_v11  ;;  %v3741_v27 = vsub.s32 0, %v72_v26  ;;  %v3764_v45 = vld [vmem:[%s4698_s5] sm:$0x1]  ;;  %s2919_s15 = sshll.u32 %s3599_s14, 4  ;;  %s2920_s15 = int_to_ptr.vmem [resolvable:$true] %s2919_s15 }
   0xb   :  { %3155 = vmatprep.subr.bf16.mxu1 %v68_v20  ;;  %v3777_v61 = vsel %vm210_vm2, %v68_v20, 0  ;;  %v3782_v62 = vsel %vm210_vm2, %v69_v23, 0  ;;  %s3549_s16 = scalar_lea.vmem %s2920_s15, 32  ;;  %p3554_p1 = scmp.lt.s32.totalorder %s2920_s15, %s2920_s15 }
   0xc   :  { %3156 = vmatpush3.bf16.msra.mxu1 %v68_v20  ;;  %v74_v29 = vrot.slane %v3746_v28, %v3741_v27  ;;  %v152_v46 = vrot.slane %v3764_v45, %v3741_v27  ;;  %p3550_p0 = scmp.ne.s32.totalorder %s2920_s15, %s3549_s16  ;;  %p3555_p2 = scmp.lt.s32.totalorder %s3549_s16, %s3549_s16 }
   0xd   :  { %3148 = vmatpush3.bf16.msra.mxu0 %v66_v11  ;;  %3157 = vmatprep.subr.bf16.mxu1 %v69_v23 }
   0xe   :  { %3149 = vmatprep.subr.bf16.mxu0 %v67_v14  ;;  %p3556_p3 = por %p3555_p2, %p3554_p1 }
  0x10   :  { %3158 = vmatpush3.bf16.msra.mxu1 %v69_v23  ;;  %p3557_p4 = pnand %p3556_p3, %p3550_p0 }
  0x11   :  { %3150 = vmatpush3.bf16.msra.mxu0 %v67_v14 }
  0x12   :  { %3169 = vmatprep.subr.bf16.mxu0 %v3597_v24 }
  0x14   :  { %3152 = vmatmul.mubr.msk.bf16.vlgmr.msra.gmra.mrb[0].mxu0 %vm86_vm0, %v3711_v17 }
  0x15   :  { %3173 = vmatprep.mubr.msk.bf16.mxu0 %vm3598_vm3, %v3597_v24 }
  0x1a   :  { %3170 = vmatpush3.bf16.xpose.msra.mxu0 %v3777_v61 }
  0x1b   :  { %3171 = vmatprep.subr.bf16.mxu0 %v3597_v24 }
  0x22   :  { %3172 = vmatpush3.bf16.xpose.msra.mxu0 %v3782_v62 }
  0x23   :  { %3199 = vmatprep.subr.bf16.mxu0 %v3597_v24 }
  0xe7   :  { %v3153_v30 = vpop.f32.mrb[0].mxu0 }
  0xe8   :  { %v136_v31 = vadd.f32 %v3153_v30, %v74_v29  ;;  %v127_v32 = vpop.f32.mrb[1].mxu0 }
  0xe9   :  { %v128_v33 = vadd.f32 %v127_v32, %v74_v29  ;;  %v3154_v34 = vpop.f32.mrb[2].mxu0 }
  0xea   :  { %v3750_v35 = vadd.f32 %v3154_v34, %v74_v29  ;;  %v130_v36 = vpop.f32.mrb[3].mxu0  ;;  %v144_v38 = vmax.f32 %v136_v31, 0.0 }
  0xeb   :  { %v3752_v37 = vadd.f32 %v130_v36, %v74_v29  ;;  %v142_v40 = vmax.f32 %v128_v33, 0.0 }
  0xec   :  { %v3755_v39 = vmax.f32 %v3750_v35, 0.0  ;;  %vm1759_vm9 = vcmp.gt.f32.partialorder %v3750_v35, 0.0 }
  0xed   :  { %v143_v41 = vmax.f32 %v3752_v37, 0.0  ;;  %vm433_vm6 = vcmp.gt.f32.partialorder %v3752_v37, 0.0 }
  0xee   :  { %v147_v42 = vpack.c.bf16 %v3755_v39, %v144_v38  ;;  %v2955_v31 = vsel %vm433_vm6, 1.0, %v3597_v24 }
  0xef   :  { %v301_v43 = vpack.c.bf16 %v143_v41, %v143_v41  ;;  %v146_v44 = vpack.c.bf16 %v143_v41, %v142_v40 }
  0xf1   :  { %302 = vxpose.xlu1.c.b16.start.end [1/1] (short) (narrow) %v301_v43, 32  ;;  %3159 = vmatprep.mubr.msk.bf16.mxu1 %vm154_vm1, %v146_v44 }
  0xf2   :  { %3160 = vmatmul.mubr.msk.bf16.vlgmr.msra.gmra.mrb[0].mxu1 %vm154_vm1, %v147_v42 }
  0xf6   :  { %438 = vxpose.xlu1.c.b16.start.end [1/1] (short) (narrow) %v43_v9, 64  ;;  %v3792_v9 = vld [vmem:[%s4694_s1 + $0x8] sm:$0xff] }
 0x157   :  { %v310_v63 = vpop.trf.xlu1 }
 0x158   :  { %3165 = vmatprep.mubr.msk.bf16.mxu1 %vm318_vm4, %v310_v63 }
 0x15b   :  { %v311_v26 = vpop.trf.xlu1 }
 0x15f   :  { %v3805_v29 = vpop.trf.xlu1 }
 0x163   :  { %v3813_v34 = vpop.trf.xlu1 }
 0x1c5   :  { %v3161_v47 = vpop.f32.mrb[0].mxu1 }
 0x1c6   :  { %v3768_v48 = vadd.f32 %v3161_v47, %v152_v46  ;;  %v195_v49 = vpop.f32.mrb[1].mxu1  ;;  %v3819_v47 = vpop.trf.xlu1 }
 0x1c7   :  { %v3770_v50 = vadd.f32 %v195_v49, %v152_v46  ;;  %v3162_v51 = vpop.f32.mrb[2].mxu1 }
 0x1c8   :  { %v3772_v52 = vadd.f32 %v3162_v51, %v152_v46  ;;  %v198_v53 = vpop.f32.mrb[3].mxu1 }
 0x1c9   :  { %v199_v54 = vadd.f32 %v198_v53, %v152_v46 }
 0x1cb   :  { %v214_v55 = vsel %vm210_vm2, %v199_v54, -inf }
 0x1cc   :  { %215 = vmax.xlane.f32.xlu0 %v214_v55 }
 0x259   :  { %v216_v56 = vpop.xlane.xlu0 %215 }
 0x25a   :  { %v224_v57 = vsub.f32 %v199_v54, %v216_v56 }
 0x25c   :  { %v229_v58 = vmul.f32 1.442695, %v224_v57 }
 0x25e   :  { %3478 = vpow2.f32 %v229_v58  ;;  %v3840_v58 = vpop.trf.xlu1 }
 0x268   :  { %v3479_v59 = vpop.eup %3478 }
 0x269   :  { %v238_v60 = vsel %vm210_vm2, %v3479_v59, 0.0 }
 0x26a   :  { %239 = vadd.xlane.f32.xlu0 %v238_v60 }
 0x2f7   :  { %v240_v3 = vpop.xlane.xlu0 %239 }
 0x2f8   :  { %3480 = vrcp.f32 %v240_v3 }
 0x302   :  { %v3481_v5 = vpop.eup %3480 }
 0x303   :  { %v297_v11 = vmul.f32 %v3481_v5, %v3479_v59 }
 0x305   :  { %v298_v14 = vsub.f32 %v297_v11, %v3792_v9 }
 0x307   :  { %v3795_v15 = vmul.f32 0.125, %v298_v14 }
 0x309   :  { %v300_v20 = vpack.c.bf16 %v3795_v15, %v3795_v15 }
 0x30b   :  { %3427 = vmatprep.subr.msk.bf16.mxu1 %vm325_vm5, %v300_v20  ;;  %3174 = vmatmul.mubr.msk.bf16.vlgmr.msra.gmra.mrb[4].mxu0 %vm210_vm2, %v300_v20  ;;  %v327_v23 = vsel %vm325_vm5, %v300_v20, 0 }
 0x30c   :  { %3164 = vmatpush3.bf16.msra.mxu1 %v327_v23  ;;  %3203 = vmatprep.mubr.msk.bf16.mxu0 %vm3598_vm3, %v3597_v24 }
 0x30f   :  { %3166 = vmatmul.mubr.msk.bf16.vlgmr.msra.gmra.mrb[4].mxu1 %vm318_vm4, %v311_v26 }
 0x310   :  { %3179 = vmatprep.mubr.msk.bf16.mxu1 %vm318_vm4, %v3805_v29 }
 0x3de   :  { %v427_v30 = vpop.f32.mrb[4].mxu0 }
 0x3df   :  { %v3811_v32 = vmul.f32 %v2955_v31, %v427_v30  ;;  %v3175_v33 = vpop.f32.mrb[5].mxu0 }
 0x3e0   :  { %v430_v36 = vpop.f32.mrb[6].mxu0 }
 0x3e1   :  { %v437_v38 = vpack.c.bf16 %v3811_v32, %v3811_v32  ;;  %v3176_v40 = vpop.f32.mrb[7].mxu0 }
 0x3e2   :  { %v3167_v41 = vpop.f32.mrb[4].mxu1 }
 0x3e3   :  { %3428 = vmatprep.subr.msk.bf16.mxu1 %vm325_vm5, %v437_v38  ;;  %v467_v42 = vsel %vm325_vm5, %v437_v38, 0  ;;  %v363_v43 = vpop.f32.mrb[5].mxu1  ;;  %v561_v37 = vmul.f32 0.1, %v3167_v41 }
 0x3e4   :  { %3178 = vmatpush3.bf16.msra.mxu1 %v467_v42  ;;  %v559_v44 = vmul.f32 0.1, %v363_v43  ;;  %v3168_v46 = vpop.f32.mrb[6].mxu1 }
 0x3e5   :  { %v562_v49 = vmul.f32 0.1, %v3168_v46  ;;  %v366_v51 = vpop.f32.mrb[7].mxu1  ;;  %3187 = vmatprep.subr.bf16.mxu1 %v3597_v24  ;;  %v3830_v55 = vsub.f32 %v3730_v21, %v561_v37 }
 0x3e6   :  { %v3823_v53 = vsub.f32 %v3718_v18, %v559_v44  ;;  %v560_v54 = vmul.f32 0.1, %v366_v51 }
 0x3e7   :  { %3180 = vmatmul.mubr.msk.bf16.vlgmr.msra.gmra.mrb[8].mxu1 %vm318_vm4, %v3813_v34  ;;  %v3833_v56 = vsub.f32 %v3735_v22, %v562_v49 }
 0x3e8   :  { %3183 = vmatprep.mubr.msk.bf16.mxu1 %vm318_vm4, %v3819_v47  ;;  %v3836_v57 = vsub.f32 %v3723_v19, %v560_v54 }
 0x3e9   :  { %v574_v59 = vpack.c.bf16 %v3833_v56, %v3830_v55 }
 0x3ea   :  { %v573_v18 = vpack.c.bf16 %v3836_v57, %v3823_v53 }
 0x3ec   :  { %3200 = vmatpush3.bf16.msra.mxu0 %v573_v18 }
 0x3ed   :  { %3201 = vmatprep.subr.bf16.mxu0 %v3597_v24 }
 0x3ef   :  { %3184 = vmatmul.mubr.msk.bf16.gmra.mrb[12].mxu1 %vm318_vm4, %v3840_v58 }
 0x3f0   :  { %3202 = vmatpush3.bf16.msra.mxu0 %v574_v59  ;;  %3195 = vmatprep.mubr.msk.bf16.mxu1 %vm3598_vm3, %v3597_v24 }
 0x4ba   :  { %v3181_v19 = vpop.f32.mrb[8].mxu1 }
 0x4bb   :  { %v503_v21 = vpop.f32.mrb[9].mxu1  ;;  %v543_v11 = vmul.f32 0.1, %v3181_v19 }
 0x4bc   :  { %v541_v22 = vmul.f32 0.1, %v503_v21  ;;  %v3182_v60 = vpop.f32.mrb[10].mxu1 }
 0x4bd   :  { %v506_v63 = vpop.f32.mrb[11].mxu1  ;;  %v544_v3 = vmul.f32 0.1, %v3182_v60  ;;  %v3861_v33 = vsub.f32 %v3654_v2, %v543_v11 }
 0x4be   :  { %v542_v5 = vmul.f32 0.1, %v506_v63  ;;  %v3850_v14 = vsub.f32 %v3644_v0, %v541_v22 }
 0x4bf   :  { %v3856_v23 = vsub.f32 %v3661_v4, %v544_v3 }
 0x4c0   :  { %v3853_v20 = vsub.f32 %v3649_v1, %v542_v5 }
 0x4c1   :  { %v570_v0 = vpack.c.bf16 %v3856_v23, %v3861_v33 }
 0x4c2   :  { %v569_v26 = vpack.c.bf16 %v3853_v20, %v3850_v14  ;;  %v3185_v30 = vpop.f32.mrb[12].mxu1 }
 0x4c3   :  { %v519_v31 = vpop.f32.mrb[13].mxu1  ;;  %v547_v41 = vmul.f32 0.1, %v3185_v30 }
 0x4c4   :  { %v545_v36 = vmul.f32 0.1, %v519_v31  ;;  %v3186_v38 = vpop.f32.mrb[14].mxu1  ;;  %3188 = vmatpush3.bf16.msra.mxu1 %v569_v26 }
 0x4c5   :  { %v522_v40 = vpop.f32.mrb[15].mxu1  ;;  %3189 = vmatprep.subr.bf16.mxu1 %v3597_v24  ;;  %v548_v1 = vmul.f32 0.1, %v3186_v38  ;;  %v3879_v44 = vsub.f32 %v3691_v12, %v547_v41  ;;  %v834_v12 = vsel %vm210_vm2, %v574_v59, 0 }
 0x4c6   :  { %v546_v4 = vmul.f32 0.1, %v522_v40  ;;  %v3867_v42 = vsub.f32 %v3668_v6, %v545_v36 }
 0x4c7   :  { %v3874_v2 = vsub.f32 %v3696_v13, %v548_v1  ;;  %v534_v13 = vsel %vm154_vm1, %v3811_v32, 0.0 }
 0x4c8   :  { %v3870_v43 = vsub.f32 %v3673_v7, %v546_v4  ;;  %3190 = vmatpush3.bf16.msra.mxu1 %v570_v0  ;;  %v831_v7 = vsel %vm210_vm2, %v573_v18, 0  ;;  %v535_v46 = vrot.slane %v534_v13, 4 }
 0x4c9   :  { %3191 = vmatprep.subr.bf16.mxu1 %v3597_v24  ;;  %v572_v6 = vpack.c.bf16 %v3874_v2, %v3879_v44 }
 0x4ca   :  { %v571_v37 = vpack.c.bf16 %v3870_v43, %v3867_v42  ;;  %v536_v49 = vadd.f32 %v535_v46, %v534_v13 }
 0x4cc   :  { %3192 = vmatpush3.bf16.msra.mxu1 %v571_v37  ;;  %v537_v51 = vrot.slane %v536_v49, 2 }
 0x4cd   :  { %3193 = vmatprep.subr.bf16.mxu1 %v3597_v24 }
 0x4ce   :  { %v538_v54 = vadd.f32 %v537_v51, %v536_v49 }
 0x4d0   :  { %3194 = vmatpush3.bf16.msra.mxu1 %v572_v6  ;;  %v539_v19 = vrot.slane %v538_v54, 1 }
 0x4d1   :  { %3213 = vmatprep.subr.bf16.mxu1 %v3597_v24 }
 0x4d2   :  { %v540_v21 = vadd.f32 %v539_v19, %v538_v54  ;;  %v220_v19 = vsel %vm210_vm2, %v3772_v52, -inf }
 0x4d3   :  { %3196 = vmatmul.mubr.msk.bf16.vlgmr.msra.gmra.mrb[16].mxu1 %vm86_vm0, %v3684_v10 }
 0x4d4   :  { %3217 = vmatprep.mubr.msk.bf16.mxu1 %vm3598_vm3, %v3597_v24  ;;  %v557_v22 = vmul.f32 0.1, %v540_v21 }
 0x4d6   :  { %v3896_v18 = vsub.f32 %v3746_v28, %v557_v22  ;;  %v378_v28 = vsel %vm210_vm2, %v3795_v15, 0.0 }
 0x4d7   :  { %v379_v36 = vrot.slane %v378_v28, 4 }
 0x4d8   :  { %v579_v60 = vrot.slane %v3896_v18, %v3741_v27 }
 0x4d9   :  { %3214 = vmatpush3.bf16.xpose.msra.mxu1 %v831_v7  ;;  %v380_v38 = vadd.f32 %v379_v36, %v378_v28  ;;  %v1635_v28 = vpack.c.bf16 %v3755_v39, %v3755_v39 }
 0x4da   :  { %3215 = vmatprep.subr.bf16.mxu1 %v3597_v24 }
 0x4db   :  { %v381_v40 = vrot.slane %v380_v38, 2 }
 0x4dd   :  { %v382_v0 = vadd.f32 %v381_v40, %v380_v38 }
 0x4df   :  { %v383_v1 = vrot.slane %v382_v0, 1 }
 0x4e1   :  { %3216 = vmatpush3.bf16.xpose.msra.mxu1 %v834_v12  ;;  %v384_v4 = vadd.f32 %v383_v1, %v382_v0 }
 0x4e2   :  { %3243 = vmatprep.subr.bf16.mxu1 %v3597_v24 }
 0x4e3   :  { %v567_v41 = vmul.f32 0.1, %v384_v4 }
 0x4e5   :  { %v3907_v37 = vsub.f32 %v3764_v45, %v567_v41 }
 0x4e7   :  { %v629_v6 = vrot.slane %v3907_v37, %v3741_v27 }
 0x5a6   :  { %v615_v59 = vpop.f32.mrb[16].mxu1 }
 0x5a7   :  { %v616_v63 = vadd.f32 %v615_v59, %v579_v60  ;;  %v3197_v3 = vpop.f32.mrb[17].mxu1 }
 0x5a8   :  { %v618_v5 = vpop.f32.mrb[18].mxu1 }
 0x5a9   :  { %v3900_v11 = vadd.f32 %v618_v5, %v579_v60  ;;  %v3198_v32 = vpop.f32.mrb[19].mxu1  ;;  %v622_v26 = vmax.f32 %v616_v63, 0.0 }
 0x5ab   :  { %v623_v30 = vmax.f32 %v3900_v11, 0.0  ;;  %vm876_vm7 = vcmp.gt.f32.partialorder %v3900_v11, 0.0 }
 0x5ac   :  { %v2966_v41 = vsel %vm876_vm7, 1.0, %v3597_v24 }
 0x5ad   :  { %v624_v31 = vpack.c.bf16 %v623_v30, %v622_v26  ;;  %v746_v54 = vpack.c.bf16 %v623_v30, %v623_v30 }
 0x5af   :  { %3204 = vmatmul.mubr.msk.bf16.vlgmr.msra.gmra.mrb[8].mxu0 %vm154_vm1, %v624_v31 }
 0x682   :  { %v668_v7 = vpop.f32.mrb[8].mxu0 }
 0x683   :  { %v3911_v12 = vadd.f32 %v668_v7, %v629_v6  ;;  %v3205_v13 = vpop.f32.mrb[9].mxu0 }
 0x684   :  { %v671_v46 = vpop.f32.mrb[10].mxu0 }
 0x685   :  { %v672_v49 = vadd.f32 %v671_v46, %v629_v6  ;;  %v3206_v15 = vpop.f32.mrb[11].mxu0 }
 0x687   :  { %v678_v51 = vsel %vm210_vm2, %v672_v49, -inf }
 0x688   :  { %679 = vmax.xlane.f32.xlu0 %v678_v51 }
 0x6b5   :  { %747 = vxpose.xlu0.c.b16.start.end [1/1] (short) (narrow) %v746_v54, 32 }
 0x6c6   :  { %221 = vmax.xlane.f32.xlu0 %v220_v19 }
 0x715   :  { %v680_v45 = vpop.xlane.xlu0 %679 }
 0x716   :  { %v682_v21 = vsub.f32 %v672_v49, %v680_v45 }
 0x718   :  { %v685_v22 = vmul.f32 1.442695, %v682_v21 }
 0x71a   :  { %3482 = vpow2.f32 %v685_v22 }
 0x71b   :  { %v755_v60 = vpop.trf.xlu0 }
 0x71c   :  { %3209 = vmatprep.mubr.msk.bf16.mxu0 %vm318_vm4, %v755_v60 }
 0x71f   :  { %v756_v3 = vpop.trf.xlu0 }
 0x724   :  { %v3483_v59 = vpop.eup %3482 }
 0x725   :  { %v690_v63 = vsel %vm210_vm2, %v3483_v59, 0.0 }
 0x726   :  { %691 = vadd.xlane.f32.xlu1 %v690_v63 }
 0x753   :  { %v222_v5 = vpop.xlane.xlu0 %221 }
 0x754   :  { %v226_v32 = vsub.f32 %v3772_v52, %v222_v5 }
 0x756   :  { %v233_v26 = vmul.f32 1.442695, %v226_v32 }
 0x758   :  { %3484 = vpow2.f32 %v233_v26 }
 0x762   :  { %v3919_v30 = vpop.eup %3484 }
 0x763   :  { %v244_v31 = vsel %vm210_vm2, %v3919_v30, 0.0 }
 0x764   :  { %245 = vadd.xlane.f32.xlu0 %v244_v31 }
 0x791   :  { %1636 = vxpose.xlu0.c.b16.start.end [1/1] (short) (narrow) %v1635_v28, 32 }
 0x7b3   :  { %v692_v36 = vpop.xlane.xlu1 %691 }
 0x7b4   :  { %3486 = vrcp.f32 %v692_v36 }
 0x7be   :  { %v3487_v38 = vpop.eup %3486 }
 0x7bf   :  { %v742_v40 = vmul.f32 %v3487_v38, %v3483_v59 }
 0x7c1   :  { %v743_v0 = vsub.f32 %v742_v40, %v3792_v9 }
 0x7c3   :  { %v3926_v1 = vmul.f32 0.125, %v743_v0 }
 0x7c5   :  { %v745_v52 = vpack.c.bf16 %v3926_v1, %v3926_v1 }
 0x7c7   :  { %3429 = vmatprep.subr.msk.bf16.mxu0 %vm325_vm5, %v745_v52  ;;  %3218 = vmatmul.mubr.msk.bf16.vlgmr.msra.gmra.mrb[20].mxu1 %vm210_vm2, %v745_v52  ;;  %v770_v4 = vsel %vm325_vm5, %v745_v52, 0 }
 0x7c8   :  { %3208 = vmatpush3.bf16.msra.mxu0 %v770_v4  ;;  %3247 = vmatprep.mubr.msk.bf16.mxu1 %vm3598_vm3, %v3597_v24 }
 0x7cb   :  { %3210 = vmatmul.mubr.msk.bf16.vlgmr.msra.gmra.mrb[12].mxu0 %vm318_vm4, %v756_v3 }
 0x7cc   :  { %3223 = vmatprep.mubr.msk.bf16.mxu0 %vm318_vm4, %v3805_v29 }
 0x89a   :  { %v870_v39 = vpop.f32.mrb[20].mxu1 }
 0x89b   :  { %v3940_v6 = vmul.f32 %v2966_v41, %v870_v39  ;;  %v3219_v7 = vpop.f32.mrb[21].mxu1 }
 0x89c   :  { %v873_v13 = vpop.f32.mrb[22].mxu1 }
 0x89d   :  { %v880_v46 = vpack.c.bf16 %v3940_v6, %v3940_v6  ;;  %v3220_v49 = vpop.f32.mrb[23].mxu1 }
 0x89e   :  { %v3211_v15 = vpop.f32.mrb[12].mxu0 }
 0x89f   :  { %v806_v51 = vpop.f32.mrb[13].mxu0  ;;  %3430 = vmatprep.subr.msk.bf16.mxu0 %vm325_vm5, %v880_v46  ;;  %v882_v54 = vsel %vm325_vm5, %v880_v46, 0  ;;  %v976_v60 = vmul.f32 0.1, %v3211_v15 }
 0x8a0   :  { %v974_v19 = vmul.f32 0.1, %v806_v51  ;;  %v3212_v45 = vpop.f32.mrb[14].mxu0  ;;  %3222 = vmatpush3.bf16.msra.mxu0 %v882_v54 }
 0x8a1   :  { %v809_v11 = vpop.f32.mrb[15].mxu0  ;;  %3231 = vmatprep.subr.bf16.mxu0 %v3597_v24  ;;  %v977_v21 = vmul.f32 0.1, %v3212_v45  ;;  %v3963_v32 = vsub.f32 %v3830_v55, %v976_v60 }
 0x8a2   :  { %v975_v22 = vmul.f32 0.1, %v809_v11  ;;  %v3950_v59 = vsub.f32 %v3823_v53, %v974_v19 }
 0x8a3   :  { %3224 = vmatmul.mubr.msk.bf16.vlgmr.msra.gmra.mrb[16].mxu0 %vm318_vm4, %v3813_v34  ;;  %v3958_v3 = vsub.f32 %v3833_v56, %v977_v21 }
 0x8a4   :  { %v3953_v63 = vsub.f32 %v3836_v57, %v975_v22  ;;  %3227 = vmatprep.mubr.msk.bf16.mxu0 %vm318_vm4, %v3819_v47 }
 0x8a5   :  { %v989_v53 = vpack.c.bf16 %v3958_v3, %v3963_v32 }
 0x8a6   :  { %v988_v5 = vpack.c.bf16 %v3953_v63, %v3950_v59 }
 0x8a8   :  { %3244 = vmatpush3.bf16.msra.mxu1 %v988_v5 }
 0x8a9   :  { %3245 = vmatprep.subr.bf16.mxu1 %v3597_v24 }
 0x8ab   :  { %3228 = vmatmul.mubr.msk.bf16.gmra.mrb[20].mxu0 %vm318_vm4, %v3840_v58 }
 0x8ac   :  { %3246 = vmatpush3.bf16.msra.mxu1 %v989_v53  ;;  %3239 = vmatprep.mubr.msk.bf16.mxu0 %vm3598_vm3, %v3597_v24 }
 0x976   :  { %v3225_v56 = vpop.f32.mrb[16].mxu0 }
 0x977   :  { %v918_v57 = vpop.f32.mrb[17].mxu0  ;;  %v958_v38 = vmul.f32 0.1, %v3225_v56 }
 0x978   :  { %v956_v26 = vmul.f32 0.1, %v918_v57  ;;  %v3226_v31 = vpop.f32.mrb[18].mxu0 }
 0x979   :  { %v921_v28 = vpop.f32.mrb[19].mxu0  ;;  %v959_v55 = vmul.f32 0.1, %v3226_v31  ;;  %v3984_v7 = vsub.f32 %v3861_v33, %v958_v38 }
 0x97a   :  { %v957_v36 = vmul.f32 0.1, %v921_v28  ;;  %v3973_v40 = vsub.f32 %v3850_v14, %v956_v26 }
 0x97b   :  { %v3979_v52 = vsub.f32 %v3856_v23, %v959_v55 }
 0x97c   :  { %v3976_v0 = vsub.f32 %v3853_v20, %v957_v36 }
 0x97d   :  { %v985_v14 = vpack.c.bf16 %v3979_v52, %v3984_v7 }
 0x97e   :  { %v984_v4 = vpack.c.bf16 %v3976_v0, %v3973_v40  ;;  %v3229_v39 = vpop.f32.mrb[20].mxu0 }
 0x97f   :  { %v934_v41 = vpop.f32.mrb[21].mxu0  ;;  %v962_v15 = vmul.f32 0.1, %v3229_v39 }
 0x980   :  { %v960_v13 = vmul.f32 0.1, %v934_v41  ;;  %v3230_v46 = vpop.f32.mrb[22].mxu0  ;;  %3232 = vmatpush3.bf16.msra.mxu0 %v984_v4  ;;  %v821_v41 = vsel %vm210_vm2, %v3926_v1, 0.0 }
 0x981   :  { %v937_v49 = vpop.f32.mrb[23].mxu0  ;;  %3233 = vmatprep.subr.bf16.mxu0 %v3597_v24  ;;  %v963_v20 = vmul.f32 0.1, %v3230_v46  ;;  %v4002_v45 = vsub.f32 %v3879_v44, %v962_v15  ;;  %v949_v44 = vsel %vm154_vm1, %v3940_v6, 0.0 }
 0x982   :  { %v961_v23 = vmul.f32 0.1, %v937_v49  ;;  %v3990_v51 = vsub.f32 %v3867_v42, %v960_v13  ;;  %v950_v11 = vrot.slane %v949_v44, 4  ;;  %v822_v13 = vrot.slane %v821_v41, 4 }
 0x983   :  { %v3997_v33 = vsub.f32 %v3874_v2, %v963_v20  ;;  %v1249_v2 = vsel %vm210_vm2, %v989_v53, 0 }
 0x984   :  { %v3993_v54 = vsub.f32 %v3870_v43, %v961_v23  ;;  %3234 = vmatpush3.bf16.msra.mxu0 %v985_v14  ;;  %v1246_v43 = vsel %vm210_vm2, %v988_v5, 0  ;;  %v951_v21 = vadd.f32 %v950_v11, %v949_v44 }
 0x985   :  { %3235 = vmatprep.subr.bf16.mxu0 %v3597_v24  ;;  %v987_v42 = vpack.c.bf16 %v3997_v33, %v4002_v45 }
 0x986   :  { %v986_v19 = vpack.c.bf16 %v3993_v54, %v3990_v51  ;;  %v952_v22 = vrot.slane %v951_v21, 2 }
 0x988   :  { %3236 = vmatpush3.bf16.msra.mxu0 %v986_v19 }
 0x989   :  { %3237 = vmatprep.subr.bf16.mxu0 %v3597_v24 }
 0x98c   :  { %3238 = vmatpush3.bf16.msra.mxu0 %v987_v42 }
 0x98d   :  { %3257 = vmatprep.subr.bf16.mxu0 %v3597_v24 }
 0x98f   :  { %3240 = vmatmul.mubr.msk.bf16.vlgmr.msra.gmra.mrb[24].mxu0 %vm86_vm0, %v3684_v10  ;;  %v953_v10 = vadd.f32 %v952_v22, %v951_v21 }
 0x990   :  { %3261 = vmatprep.mubr.msk.bf16.mxu0 %vm3598_vm3, %v3597_v24 }
 0x991   :  { %v954_v60 = vrot.slane %v953_v10, 1 }
 0x993   :  { %v955_v56 = vadd.f32 %v954_v60, %v953_v10 }
 0x995   :  { %3258 = vmatpush3.bf16.xpose.msra.mxu0 %v1246_v43  ;;  %v972_v57 = vmul.f32 0.1, %v955_v56 }
 0x996   :  { %3259 = vmatprep.subr.bf16.mxu0 %v3597_v24 }
 0x997   :  { %v4019_v5 = vsub.f32 %v3896_v18, %v972_v57  ;;  %v823_v18 = vadd.f32 %v822_v13, %v821_v41 }
 0x999   :  { %v994_v26 = vrot.slane %v4019_v5, %v3741_v27  ;;  %v824_v46 = vrot.slane %v823_v18, 2 }
 0x99b   :  { %v825_v49 = vadd.f32 %v824_v46, %v823_v18 }
 0x99d   :  { %3260 = vmatpush3.bf16.xpose.msra.mxu0 %v1249_v2  ;;  %v826_v14 = vrot.slane %v825_v49, 1 }
 0x99e   :  { %3287 = vmatprep.subr.bf16.mxu0 %v3597_v24 }
 0x99f   :  { %v827_v20 = vadd.f32 %v826_v14, %v825_v49 }
 0x9a1   :  { %v982_v23 = vmul.f32 0.1, %v827_v20 }
 0x9a3   :  { %v4027_v15 = vsub.f32 %v3907_v37, %v982_v23 }
 0x9a5   :  { %v1044_v19 = vrot.slane %v4027_v15, %v3741_v27 }
 0xa62   :  { %v1030_v53 = vpop.f32.mrb[24].mxu0 }
 0xa63   :  { %v1031_v31 = vadd.f32 %v1030_v53, %v994_v26  ;;  %v3241_v28 = vpop.f32.mrb[25].mxu0 }
 0xa64   :  { %v1033_v55 = vpop.f32.mrb[26].mxu0 }
 0xa65   :  { %v1034_v36 = vadd.f32 %v1033_v55, %v994_v26  ;;  %v3242_v38 = vpop.f32.mrb[27].mxu0  ;;  %v1037_v6 = vmax.f32 %v1031_v31, 0.0 }
 0xa67   :  { %v1038_v4 = vmax.f32 %v1034_v36, 0.0  ;;  %vm1291_vm8 = vcmp.gt.f32.partialorder %v1034_v36, 0.0 }
 0xa68   :  { %v2977_v41 = vsel %vm1291_vm8, 1.0, %v3597_v24 }
 0xa69   :  { %v1039_v39 = vpack.c.bf16 %v1038_v4, %v1037_v6  ;;  %v1161_v57 = vpack.c.bf16 %v1038_v4, %v1038_v4 }
 0xa6b   :  { %3248 = vmatmul.mubr.msk.bf16.vlgmr.msra.gmra.mrb[24].mxu1 %vm154_vm1, %v1039_v39 }
 0xb3e   :  { %v1083_v42 = vpop.f32.mrb[24].mxu1 }
 0xb3f   :  { %v4031_v43 = vadd.f32 %v1083_v42, %v1044_v19  ;;  %v3249_v2 = vpop.f32.mrb[25].mxu1 }
 0xb40   :  { %v1086_v44 = vpop.f32.mrb[26].mxu1 }
 0xb41   :  { %v1087_v11 = vadd.f32 %v1086_v44, %v1044_v19  ;;  %v3250_v1 = vpop.f32.mrb[27].mxu1 }
 0xb43   :  { %v1093_v21 = vsel %vm210_vm2, %v1087_v11, -inf }
 0xb44   :  { %1094 = vmax.xlane.f32.xlu1 %v1093_v21 }
 0xbd1   :  { %v1095_v22 = vpop.xlane.xlu1 %1094 }
 0xbd2   :  { %v1097_v10 = vsub.f32 %v1087_v11, %v1095_v22  ;;  %v4061_v11 = vld [vmem:[%s4694_s1 + $0x18] sm:$0xff] }
 0xbd4   :  { %v1100_v60 = vmul.f32 1.442695, %v1097_v10 }
 0xbd6   :  { %3488 = vpow2.f32 %v1100_v60 }
 0xbe0   :  { %v3489_v56 = vpop.eup %3488 }
 0xbe1   :  { %v1105_v37 = vsel %vm210_vm2, %v3489_v56, 0.0 }
 0xbe2   :  { %1106 = vadd.xlane.f32.xlu1 %v1105_v37 }
 0xc0f   :  { %1162 = vxpose.xlu1.c.b16.start.end [1/1] (short) (narrow) %v1161_v57, 32 }
 0xc14   :  { %1764 = vxpose.xlu1.c.b16.start.end [1/1] (short) (narrow) %v3708_v16, 64 }
 0xc6f   :  { %v1107_v26 = vpop.xlane.xlu1 %1106 }
 0xc70   :  { %3490 = vrcp.f32 %v1107_v26 }
 0xc75   :  { %v1170_v53 = vpop.trf.xlu1 }
 0xc76   :  { %3253 = vmatprep.mubr.msk.bf16.mxu1 %vm318_vm4, %v1170_v53 }
 0xc79   :  { %v1171_v4 = vpop.trf.xlu1 }
 0xc7a   :  { %v3491_v31 = vpop.eup %3490 }
 0xc7b   :  { %v1157_v28 = vmul.f32 %v3491_v31, %v3489_v56 }
 0xc7d   :  { %v1158_v55 = vsub.f32 %v1157_v28, %v3792_v9  ;;  %v246_v9 = vpop.xlane.xlu0 %245 }
 0xc7e   :  { %3492 = vrcp.f32 %v246_v9 }
 0xc7f   :  { %v4038_v38 = vmul.f32 0.125, %v1158_v55 }
 0xc81   :  { %v1160_v6 = vpack.c.bf16 %v4038_v38, %v4038_v38 }
 0xc83   :  { %3431 = vmatprep.subr.msk.bf16.mxu1 %vm325_vm5, %v1160_v6  ;;  %3262 = vmatmul.mubr.msk.bf16.vlgmr.msra.gmra.mrb[28].mxu0 %vm210_vm2, %v1160_v6  ;;  %v1185_v16 = vsel %vm325_vm5, %v1160_v6, 0 }
 0xc84   :  { %3252 = vmatpush3.bf16.msra.mxu1 %v1185_v16  ;;  %3291 = vmatprep.mubr.msk.bf16.mxu0 %vm3598_vm3, %v3597_v24 }
 0xc87   :  { %3254 = vmatmul.mubr.msk.bf16.vlgmr.msra.gmra.mrb[28].mxu1 %vm318_vm4, %v1171_v4 }
 0xc88   :  { %3267 = vmatprep.mubr.msk.bf16.mxu1 %vm318_vm4, %v3805_v29  ;;  %v3493_v46 = vpop.eup %3492 }
 0xc89   :  { %v1631_v19 = vmul.f32 %v3493_v46, %v3919_v30 }
 0xc8b   :  { %v1632_v60 = vsub.f32 %v1631_v19, %v4061_v11 }
 0xc8d   :  { %v4073_v53 = vmul.f32 0.125, %v1632_v60 }
 0xd56   :  { %v1285_v39 = vpop.f32.mrb[28].mxu0 }
 0xd57   :  { %v4051_v13 = vmul.f32 %v2977_v41, %v1285_v39  ;;  %v3263_v18 = vpop.f32.mrb[29].mxu0 }
 0xd58   :  { %v1288_v49 = vpop.f32.mrb[30].mxu0 }
 0xd59   :  { %v1295_v14 = vpack.c.bf16 %v4051_v13, %v4051_v13  ;;  %v3264_v20 = vpop.f32.mrb[31].mxu0 }
 0xd5a   :  { %v3255_v23 = vpop.f32.mrb[28].mxu1 }
 0xd5b   :  { %v1391_v42 = vmul.f32 0.1, %v3255_v23  ;;  %v1221_v29 = vpop.f32.mrb[29].mxu1  ;;  %3432 = vmatprep.subr.msk.bf16.mxu1 %vm325_vm5, %v1295_v14  ;;  %v1297_v36 = vsel %vm325_vm5, %v1295_v14, 0 }
 0xd5c   :  { %v1389_v2 = vmul.f32 0.1, %v1221_v29  ;;  %v3256_v44 = vpop.f32.mrb[30].mxu1  ;;  %3266 = vmatpush3.bf16.msra.mxu1 %v1297_v36 }
 0xd5d   :  { %v1392_v1 = vmul.f32 0.1, %v3256_v44  ;;  %v1224_v21 = vpop.f32.mrb[31].mxu1  ;;  %3275 = vmatprep.subr.bf16.mxu1 %v3597_v24  ;;  %v1395_v30 = vsub.f32 %v3963_v32, %v1391_v42 }
 0xd5e   :  { %v1390_v22 = vmul.f32 0.1, %v1224_v21  ;;  %v1393_v56 = vsub.f32 %v3950_v59, %v1389_v2 }
 0xd5f   :  { %v1396_v10 = vsub.f32 %v3958_v3, %v1392_v1  ;;  %3268 = vmatmul.mubr.msk.bf16.vlgmr.msra.gmra.mrb[32].mxu1 %vm318_vm4, %v3813_v34  ;;  %v4080_v34 = vpack.c.bf16 %v4073_v53, %v4073_v53 }
 0xd60   :  { %v1394_v37 = vsub.f32 %v3953_v63, %v1390_v22  ;;  %3271 = vmatprep.mubr.msk.bf16.mxu1 %vm318_vm4, %v3819_v47 }
 0xd61   :  { %v1404_v57 = vpack.c.bf16 %v1396_v10, %v1395_v30 }
 0xd62   :  { %v1403_v26 = vpack.c.bf16 %v1394_v37, %v1393_v56  ;;  %v1644_v37 = vpop.trf.xlu0 }
 0xd64   :  { %3288 = vmatpush3.bf16.msra.mxu0 %v1403_v26 }
 0xd65   :  { %3289 = vmatprep.subr.bf16.mxu0 %v3597_v24 }
 0xd67   :  { %3272 = vmatmul.mubr.msk.bf16.gmra.mrb[36].mxu1 %vm318_vm4, %v3840_v58 }
 0xd68   :  { %3290 = vmatpush3.bf16.msra.mxu0 %v1404_v57  ;;  %3283 = vmatprep.mubr.msk.bf16.mxu1 %vm3598_vm3, %v3597_v24  ;;  %v1645_v57 = vpop.trf.xlu0 }
 0xd69   :  { %3433 = vmatprep.subr.msk.bf16.mxu0 %vm325_vm5, %v4080_v34 }
 0xe32   :  { %v3269_v47 = vpop.f32.mrb[32].mxu1 }
 0xe33   :  { %v1373_v59 = vmul.f32 0.1, %v3269_v47  ;;  %v1333_v63 = vpop.f32.mrb[33].mxu1  ;;  %v2989_v47 = vsel %vm1759_vm9, 1.0, %v3597_v24 }
 0xe34   :  { %v1371_v3 = vmul.f32 0.1, %v1333_v63  ;;  %v3270_v32 = vpop.f32.mrb[34].mxu1 }
 0xe35   :  { %v1374_v31 = vmul.f32 0.1, %v3270_v32  ;;  %v1336_v28 = vpop.f32.mrb[35].mxu1  ;;  %v1381_v58 = vsub.f32 %v3984_v7, %v1373_v59 }
 0xe36   :  { %v1372_v55 = vmul.f32 0.1, %v1336_v28  ;;  %v1379_v16 = vsub.f32 %v3973_v40, %v1371_v3 }
 0xe37   :  { %v1382_v6 = vsub.f32 %v3979_v52, %v1374_v31 }
 0xe38   :  { %v1380_v4 = vsub.f32 %v3976_v0, %v1372_v55 }
 0xe39   :  { %v1400_v9 = vpack.c.bf16 %v1382_v6, %v1381_v58  ;;  %v1236_v58 = vsel %vm210_vm2, %v4038_v38, 0.0 }
 0xe3a   :  { %v1399_v39 = vpack.c.bf16 %v1380_v4, %v1379_v16  ;;  %v3273_v41 = vpop.f32.mrb[36].mxu1  ;;  %v1237_v6 = vrot.slane %v1236_v58, 4 }
 0xe3b   :  { %v1377_v18 = vmul.f32 0.1, %v3273_v41  ;;  %v1349_v46 = vpop.f32.mrb[37].mxu1 }
 0xe3c   :  { %v1375_v49 = vmul.f32 0.1, %v1349_v46  ;;  %v3274_v14 = vpop.f32.mrb[38].mxu1  ;;  %3276 = vmatpush3.bf16.msra.mxu1 %v1399_v39  ;;  %v1238_v16 = vadd.f32 %v1237_v6, %v1236_v58  ;;  %v3541_v6 = vld [vmem:[%s4695_s2 + $0x10] sm:$0xff] }
 0xe3d   :  { %v1378_v20 = vmul.f32 0.1, %v3274_v14  ;;  %v1352_v23 = vpop.f32.mrb[39].mxu1  ;;  %3277 = vmatprep.subr.bf16.mxu1 %v3597_v24  ;;  %v1385_v7 = vsub.f32 %v4002_v45, %v1377_v18 }
 0xe3e   :  { %v1376_v19 = vmul.f32 0.1, %v1352_v23  ;;  %v1383_v40 = vsub.f32 %v3990_v51, %v1375_v49  ;;  %v1239_v4 = vrot.slane %v1238_v16, 2 }
 0xe3f   :  { %v1386_v52 = vsub.f32 %v3997_v33, %v1378_v20 }
 0xe40   :  { %v1384_v0 = vsub.f32 %v3993_v54, %v1376_v19  ;;  %3278 = vmatpush3.bf16.msra.mxu1 %v1400_v9  ;;  %v1240_v9 = vadd.f32 %v1239_v4, %v1238_v16 }
 0xe41   :  { %v1402_v42 = vpack.c.bf16 %v1386_v52, %v1385_v7  ;;  %3279 = vmatprep.subr.bf16.mxu1 %v3597_v24 }
 0xe42   :  { %v1401_v29 = vpack.c.bf16 %v1384_v0, %v1383_v40  ;;  %v1241_v39 = vrot.slane %v1240_v9, 1 }
 0xe44   :  { %3280 = vmatpush3.bf16.msra.mxu1 %v1401_v29  ;;  %v1242_v41 = vadd.f32 %v1241_v39, %v1240_v9 }
 0xe45   :  { %3281 = vmatprep.subr.bf16.mxu1 %v3597_v24 }
 0xe46   :  { %v1397_v18 = vmul.f32 0.1, %v1242_v41 }
 0xe48   :  { %3282 = vmatpush3.bf16.msra.mxu1 %v1402_v42  ;;  %v1398_v46 = vsub.f32 %v4027_v15, %v1397_v18 }
 0xe49   :  { %3301 = vmatprep.subr.bf16.mxu1 %v3597_v24 }
 0xe4a   :  { %v1460_v49 = vrot.slane %v1398_v46, %v3741_v27 }
 0xe4b   :  { %3284 = vmatmul.mubr.msk.bf16.vlgmr.msra.gmra.mrb[40].mxu1 %vm86_vm0, %v3678_v8  ;;  %v1364_v8 = vsel %vm154_vm1, %v4051_v13, 0.0  ;;  %v1659_v13 = vsel %vm325_vm5, %v4080_v34, 0 }
 0xe4c   :  { %3305 = vmatprep.mubr.msk.bf16.mxu1 %vm3598_vm3, %v3597_v24  ;;  %v1365_v51 = vrot.slane %v1364_v8, 4 }
 0xe4e   :  { %v1366_v54 = vadd.f32 %v1365_v51, %v1364_v8  ;;  %v3534_v51 = vld [vmem:[%s4697_s4] sm:$0xff] }
 0xe50   :  { %v1367_v33 = vrot.slane %v1366_v54, 2 }
 0xe51   :  { %3302 = vmatpush3.bf16.xpose.msra.mxu1 %v3777_v61 }
 0xe52   :  { %3303 = vmatprep.subr.bf16.mxu1 %v3597_v24  ;;  %v1368_v45 = vadd.f32 %v1367_v33, %v1366_v54  ;;  %v3535_v33 = vld [vmem:[%s4697_s4 + $0x10] sm:$0xff] }
 0xe54   :  { %v1369_v61 = vrot.slane %v1368_v45, 1 }
 0xe56   :  { %v1370_v36 = vadd.f32 %v1369_v61, %v1368_v45  ;;  %v3536_v61 = vld [vmem:[%s4697_s4 + $0x18] sm:$0xff] }
 0xe58   :  { %v1387_v2 = vmul.f32 0.1, %v1370_v36 }
 0xe59   :  { %3304 = vmatpush3.bf16.xpose.msra.mxu1 %v3782_v62 }
 0xe5a   :  { %3331 = vmatprep.subr.bf16.mxu1 %v3597_v24  ;;  %v1388_v62 = vsub.f32 %v4019_v5, %v1387_v2  ;;  %v4118_v5 = vpop.trf.xlu1  ;;  %v3537_v2 = vld [vmem:[%s4697_s4 + $0x8] sm:$0xff] }
 0xe5c   :  { %v1409_v44 = vrot.slane %v1388_v62, %v3741_v27 }
 0xe60   :  { %3306 = vmatmul.mubr.msk.bf16.vlgmr.msra.gmra.mrb[44].mxu1 %vm210_vm2, %v4080_v34  ;;  %v4127_v34 = vpop.trf.xlu1 }
 0xe61   :  { %3335 = vmatprep.mubr.msk.bf16.mxu1 %vm3598_vm3, %v3597_v24 }
 0xe64   :  { %v4133_v55 = vpop.trf.xlu1 }
 0xe68   :  { %v4140_v35 = vpop.trf.xlu1 }
 0xf1e   :  { %v1448_v1 = vpop.f32.mrb[40].mxu1 }
 0xf1f   :  { %v1449_v21 = vadd.f32 %v1448_v1, %v1409_v44  ;;  %v3285_v22 = vpop.f32.mrb[41].mxu1 }
 0xf20   :  { %v1451_v30 = vpop.f32.mrb[42].mxu1 }
 0xf21   :  { %v1454_v10 = vmax.f32 %v1449_v21, 0.0  ;;  %v3286_v60 = vpop.f32.mrb[43].mxu1 }
 0xf23   :  { %v1455_v56 = vpack.c.bf16 %v1454_v10, %v1454_v10 }
 0xf25   :  { %3292 = vmatmul.mubr.msk.bf16.vlgmr.msra.gmra.mrb[32].mxu0 %vm154_vm1, %v1455_v56 }
 0xf26   :  { %3296 = vmatpush3.bf16.msra.mxu0 %v1659_v13  ;;  %3297 = vmatprep.mubr.msk.bf16.mxu0 %vm318_vm4, %v1644_v37 }
 0xf2d   :  { %3298 = vmatmul.mubr.msk.bf16.vlgmr.msra.gmra.mrb[36].mxu0 %vm318_vm4, %v1645_v57  ;;  %v3538_v57 = vld [vmem:[%s4695_s2] sm:$0xff] }
 0xf2e   :  { %3311 = vmatprep.mubr.msk.bf16.mxu0 %vm318_vm4, %v4118_v5 }
 0xf33   :  { %v1753_v26 = vpop.f32.mrb[44].mxu1 }
 0xf34   :  { %v4125_v59 = vmul.f32 %v2989_v47, %v1753_v26  ;;  %v3307_v63 = vpop.f32.mrb[45].mxu1  ;;  %v3539_v47 = vld [vmem:[%s4695_s2 + $0x8] sm:$0xff] }
 0xf35   :  { %v1756_v3 = vpop.f32.mrb[46].mxu1 }
 0xf36   :  { %v1763_v32 = vpack.c.bf16 %v4125_v59, %v4125_v59  ;;  %v3308_v31 = vpop.f32.mrb[47].mxu1  ;;  %v3540_v3 = vld [vmem:[%s4695_s2 + $0x18] sm:$0xff] }
 0xf38   :  { %3434 = vmatprep.subr.msk.bf16.mxu0 %vm325_vm5, %v1763_v32  ;;  %v1793_v28 = vsel %vm325_vm5, %v1763_v32, 0 }
 0xf39   :  { %3310 = vmatpush3.bf16.msra.mxu0 %v1793_v28 }
 0xf3a   :  { %3319 = vmatprep.subr.bf16.mxu0 %v3597_v24 }
 0xf3c   :  { %3312 = vmatmul.mubr.msk.bf16.vlgmr.msra.gmra.mrb[40].mxu0 %vm318_vm4, %v4127_v34 }
 0xf3d   :  { %3315 = vmatprep.mubr.msk.bf16.mxu0 %vm318_vm4, %v4133_v55 }
 0xf44   :  { %3316 = vmatmul.mubr.msk.bf16.gmra.mrb[44].mxu0 %vm318_vm4, %v4140_v35 }
 0xf45   :  { %3327 = vmatprep.mubr.msk.bf16.mxu0 %vm3598_vm3, %v3597_v24 }
 0xff8   :  { %v1499_v14 = vpop.f32.mrb[32].mxu0 }
 0xff9   :  { %v4150_v20 = vadd.f32 %v1499_v14, %v1460_v49  ;;  %v3293_v23 = vpop.f32.mrb[33].mxu0  ;;  %v3542_v14 = vld [vmem:[%s4695_s2 + $0x20] sm:$0xff] }
 0xffa   :  { %v1502_v19 = vpop.f32.mrb[34].mxu0 }
 0xffb   :  { %v3294_v7 = vpop.f32.mrb[35].mxu0  ;;  %v3543_v19 = vld [vmem:[%s4695_s2 + $0x28] sm:$0xff] }
0x1000   :  { %v3299_v52 = vpop.f32.mrb[36].mxu0 }
0x1001   :  { %v1695_v40 = vpop.f32.mrb[37].mxu0  ;;  %v1887_v38 = vmul.f32 0.1, %v3299_v52  ;;  %v3544_v52 = vld [vmem:[%s4695_s2 + $0x38] sm:$0xff] }
0x1002   :  { %v1885_v0 = vmul.f32 0.1, %v1695_v40  ;;  %v3300_v42 = vpop.f32.mrb[38].mxu0 }
0x1003   :  { %v1888_v29 = vmul.f32 0.1, %v3300_v42  ;;  %v1698_v8 = vpop.f32.mrb[39].mxu0  ;;  %v4160_v45 = vsub.f32 %v3535_v33, %v1887_v38 }
0x1004   :  { %v4155_v15 = vsub.f32 %v3534_v51, %v1885_v0  ;;  %v1886_v54 = vmul.f32 0.1, %v1698_v8  ;;  %v3545_v0 = vld [vmem:[%s4695_s2 + $0x30] sm:$0xff] }
0x1005   :  { %v4165_v36 = vsub.f32 %v3536_v61, %v1888_v29 }
0x1006   :  { %v4170_v62 = vsub.f32 %v3537_v2, %v1886_v54  ;;  %v1860_v54 = vsel %vm154_vm1, %v4125_v59, 0.0 }
0x1007   :  { %v1900_v1 = vpack.c.bf16 %v4165_v36, %v4160_v45  ;;  %v1861_v33 = vrot.slane %v1860_v54, 4 }
0x1008   :  { %v1899_v44 = vpack.c.bf16 %v4170_v62, %v4155_v15 }
0x1009   :  { %v2160_v51 = vsel %vm210_vm2, %v1900_v1, 0  ;;  %v1862_v61 = vadd.f32 %v1861_v33, %v1860_v54 }
0x100a   :  { %3332 = vmatpush3.bf16.msra.mxu1 %v1899_v44  ;;  %v2157_v8 = vsel %vm210_vm2, %v1899_v44, 0  ;;  %v3546_v44 = vld [vmem:[%s4696_s3] sm:$0x1] }
0x100b   :  { %3333 = vmatprep.subr.bf16.mxu1 %v3597_v24  ;;  %v1863_v2 = vrot.slane %v1862_v61, 2 }
0x100e   :  { %3334 = vmatpush3.bf16.msra.mxu1 %v1900_v1 }
0x100f   :  { %v3313_v21 = vpop.f32.mrb[40].mxu0 }
0x1010   :  { %v1829_v22 = vpop.f32.mrb[41].mxu0  ;;  %v1869_v13 = vmul.f32 0.1, %v3313_v21  ;;  %v1864_v21 = vadd.f32 %v1863_v2, %v1862_v61 }
0x1011   :  { %v1867_v30 = vmul.f32 0.1, %v1829_v22  ;;  %v3314_v10 = vpop.f32.mrb[42].mxu0 }
0x1012   :  { %v1832_v60 = vpop.f32.mrb[43].mxu0  ;;  %v1870_v56 = vmul.f32 0.1, %v3314_v10  ;;  %v4197_v16 = vsub.f32 %v3541_v6, %v1869_v13  ;;  %v1865_v22 = vrot.slane %v1864_v21, 1 }
0x1013   :  { %v1868_v37 = vmul.f32 0.1, %v1832_v60  ;;  %v4180_v26 = vsub.f32 %v3538_v57, %v1867_v30 }
0x1014   :  { %v4190_v32 = vsub.f32 %v3540_v3, %v1870_v56  ;;  %v1866_v30 = vadd.f32 %v1865_v22, %v1864_v21 }
0x1015   :  { %v4185_v63 = vsub.f32 %v3539_v47, %v1868_v37 }
0x1016   :  { %v1896_v41 = vpack.c.bf16 %v4190_v32, %v4197_v16  ;;  %v1883_v10 = vmul.f32 0.1, %v1866_v30  ;;  %v211_v30 = vsel %vm210_vm2, %v3770_v50, -inf }
0x1017   :  { %v1895_v31 = vpack.c.bf16 %v4185_v63, %v4180_v26  ;;  %v3317_v28 = vpop.f32.mrb[44].mxu0 }
0x1018   :  { %v1845_v58 = vpop.f32.mrb[45].mxu0  ;;  %v1873_v49 = vmul.f32 0.1, %v3317_v28  ;;  %v4242_v60 = vsub.f32 %v3546_v44, %v1883_v10  ;;  %v217_v10 = vsel %vm210_vm2, %v3768_v48, -inf  ;;  %v675_v44 = vsel %vm210_vm2, %v3911_v12, -inf }
0x1019   :  { %v1871_v4 = vmul.f32 0.1, %v1845_v58  ;;  %v3318_v9 = vpop.f32.mrb[46].mxu0  ;;  %3320 = vmatpush3.bf16.msra.mxu0 %v1895_v31  ;;  %v1710_v58 = vsel %vm210_vm2, %v4073_v53, 0.0 }
0x101a   :  { %v1848_v39 = vpop.f32.mrb[47].mxu0  ;;  %3321 = vmatprep.subr.bf16.mxu0 %v3597_v24  ;;  %v1874_v18 = vmul.f32 0.1, %v3318_v9  ;;  %v4223_v42 = vsub.f32 %v3545_v0, %v1873_v49  ;;  %v1905_v1 = vrot.slane %v4242_v60, %v3741_v27  ;;  %v1711_v6 = vrot.slane %v1710_v58, 4  ;;  %v3547_v49 = vld [vmem:[%s4698_s5] sm:$0x1] }
0x101b   :  { %v1872_v46 = vmul.f32 0.1, %v1848_v39  ;;  %v4205_v23 = vsub.f32 %v3542_v14, %v1871_v4 }
0x101c   :  { %v4216_v40 = vsub.f32 %v3544_v52, %v1874_v18  ;;  %v1712_v4 = vadd.f32 %v1711_v6, %v1710_v58 }
0x101d   :  { %v4210_v7 = vsub.f32 %v3543_v19, %v1872_v46  ;;  %3322 = vmatpush3.bf16.msra.mxu0 %v1896_v41 }
0x101e   :  { %3323 = vmatprep.subr.bf16.mxu0 %v3597_v24  ;;  %v1898_v29 = vpack.c.bf16 %v4216_v40, %v4223_v42  ;;  %v1713_v9 = vrot.slane %v1712_v4, 2 }
0x101f   :  { %v1897_v38 = vpack.c.bf16 %v4210_v7, %v4205_v23 }
0x1020   :  { %v1714_v39 = vadd.f32 %v1713_v9, %v1712_v4 }
0x1021   :  { %3324 = vmatpush3.bf16.msra.mxu0 %v1897_v38 }
0x1022   :  { %3325 = vmatprep.subr.bf16.mxu0 %v3597_v24  ;;  %v1715_v41 = vrot.slane %v1714_v39, 1 }
0x1024   :  { %v1716_v18 = vadd.f32 %v1715_v41, %v1714_v39 }
0x1025   :  { %3326 = vmatpush3.bf16.msra.mxu0 %v1898_v29 }
0x1026   :  { %3345 = vmatprep.subr.bf16.mxu0 %v3597_v24  ;;  %v1893_v46 = vmul.f32 0.1, %v1716_v18 }
0x1028   :  { %3328 = vmatmul.mubr.msk.bf16.vlgmr.msra.gmra.mrb[48].mxu0 %vm86_vm0, %v3711_v17  ;;  %v4255_v14 = vsub.f32 %v3547_v49, %v1893_v46 }
0x1029   :  { %3349 = vmatprep.mubr.msk.bf16.mxu0 %vm3598_vm3, %v3597_v24 }
0x102a   :  { %v1955_v19 = vrot.slane %v4255_v14, %v3741_v27 }
0x102e   :  { %3346 = vmatpush3.bf16.xpose.msra.mxu0 %v2157_v8 }
0x102f   :  { %3347 = vmatprep.subr.bf16.mxu0 %v3597_v24 }
0x1036   :  { %3348 = vmatpush3.bf16.xpose.msra.mxu0 %v2160_v51 }
0x1037   :  { %3375 = vmatprep.subr.bf16.mxu0 %v3597_v24 }
0x10fb   :  { %v1941_v56 = vpop.f32.mrb[48].mxu0 }
0x10fc   :  { %v1942_v37 = vadd.f32 %v1941_v56, %v1905_v1  ;;  %v3329_v13 = vpop.f32.mrb[49].mxu0 }
0x10fd   :  { %v1944_v59 = vpop.f32.mrb[50].mxu0 }
0x10fe   :  { %v4246_v57 = vadd.f32 %v1944_v59, %v1905_v1  ;;  %v3330_v47 = vpop.f32.mrb[51].mxu0  ;;  %v1948_v3 = vmax.f32 %v1942_v37, 0.0  ;;  %v1505_v1 = vsel %vm210_vm2, %v4150_v20, -inf }
0x1100   :  { %v1949_v31 = vmax.f32 %v4246_v57, 0.0  ;;  %vm2202_vm10 = vcmp.gt.f32.partialorder %v4246_v57, 0.0 }
0x1101   :  { %v3000_v9 = vsel %vm2202_vm10, 1.0, %v3597_v24 }
0x1102   :  { %v1950_v28 = vpack.c.bf16 %v1949_v31, %v1948_v3  ;;  %v2072_v22 = vpack.c.bf16 %v1949_v31, %v1949_v31 }
0x1104   :  { %3336 = vmatmul.mubr.msk.bf16.vlgmr.msra.gmra.mrb[48].mxu1 %vm154_vm1, %v1950_v28 }
0x11d7   :  { %v1994_v52 = vpop.f32.mrb[48].mxu1 }
0x11d8   :  { %v4259_v38 = vadd.f32 %v1994_v52, %v1955_v19  ;;  %v3337_v53 = vpop.f32.mrb[49].mxu1 }
0x11d9   :  { %v1997_v0 = vpop.f32.mrb[50].mxu1 }
0x11da   :  { %v1998_v29 = vadd.f32 %v1997_v0, %v1955_v19  ;;  %v3338_v8 = vpop.f32.mrb[51].mxu1  ;;  %v2001_v56 = vsel %vm210_vm2, %v4259_v38, -inf }
0x11dc   :  { %v2004_v51 = vsel %vm210_vm2, %v1998_v29, -inf }
0x11dd   :  { %2005 = vmax.xlane.f32.xlu1 %v2004_v51 }
0x126a   :  { %v2006_v54 = vpop.xlane.xlu1 %2005 }
0x126b   :  { %v2008_v33 = vsub.f32 %v1998_v29, %v2006_v54 }
0x126d   :  { %v2011_v61 = vmul.f32 1.442695, %v2008_v33 }
0x126f   :  { %3494 = vpow2.f32 %v2011_v61 }
0x1279   :  { %v3495_v2 = vpop.eup %3494 }
0x127a   :  { %v2016_v21 = vsel %vm210_vm2, %v3495_v2, 0.0 }
0x127b   :  { %2017 = vadd.xlane.f32.xlu1 %v2016_v21 }
0x12a8   :  { %2073 = vxpose.xlu1.c.b16.start.end [1/1] (short) (narrow) %v2072_v22, 32 }
0x12b9   :  { %212 = vmax.xlane.f32.xlu1 %v211_v30 }
0x12bd   :  { %218 = vmax.xlane.f32.xlu1 %v217_v10 }
0x12c1   :  { %676 = vmax.xlane.f32.xlu1 %v675_v44 }
0x12c5   :  { %1506 = vmax.xlane.f32.xlu1 %v1505_v1 }
0x12c9   :  { %2002 = vmax.xlane.f32.xlu1 %v2001_v56 }
0x1308   :  { %v2018_v37 = vpop.xlane.xlu1 %2017 }
0x1309   :  { %3496 = vrcp.f32 %v2018_v37 }
0x130e   :  { %v2081_v13 = vpop.trf.xlu1 }
0x130f   :  { %3341 = vmatprep.mubr.msk.bf16.mxu1 %vm318_vm4, %v2081_v13 }
0x1312   :  { %v2082_v6 = vpop.trf.xlu1 }
0x1313   :  { %v3497_v59 = vpop.eup %3496 }
0x1314   :  { %v2068_v47 = vmul.f32 %v3497_v59, %v3495_v2 }
0x1316   :  { %v2069_v3 = vsub.f32 %v2068_v47, %v4061_v11 }
0x1318   :  { %v4275_v31 = vmul.f32 0.125, %v2069_v3 }
0x131a   :  { %v2071_v28 = vpack.c.bf16 %v4275_v31, %v4275_v31 }
0x131c   :  { %3435 = vmatprep.subr.msk.bf16.mxu1 %vm325_vm5, %v2071_v28  ;;  %3350 = vmatmul.mubr.msk.bf16.vlgmr.msra.gmra.mrb[52].mxu0 %vm210_vm2, %v2071_v28  ;;  %v2096_v58 = vsel %vm325_vm5, %v2071_v28, 0 }
0x131d   :  { %3340 = vmatpush3.bf16.msra.mxu1 %v2096_v58  ;;  %3379 = vmatprep.mubr.msk.bf16.mxu0 %vm3598_vm3, %v3597_v24 }
0x1320   :  { %3342 = vmatmul.mubr.msk.bf16.vlgmr.msra.gmra.mrb[52].mxu1 %vm318_vm4, %v2082_v6 }
0x1321   :  { %3355 = vmatprep.mubr.msk.bf16.mxu1 %vm318_vm4, %v4118_v5 }
0x13ef   :  { %v2196_v4 = vpop.f32.mrb[52].mxu0 }
0x13f0   :  { %v4289_v39 = vmul.f32 %v3000_v9, %v2196_v4  ;;  %v3351_v41 = vpop.f32.mrb[53].mxu0 }
0x13f1   :  { %v2199_v18 = vpop.f32.mrb[54].mxu0 }
0x13f2   :  { %v2206_v46 = vpack.c.bf16 %v4289_v39, %v4289_v39  ;;  %v3352_v49 = vpop.f32.mrb[55].mxu0 }
0x13f3   :  { %v3343_v19 = vpop.f32.mrb[52].mxu1 }
0x13f4   :  { %v2132_v52 = vpop.f32.mrb[53].mxu1  ;;  %3436 = vmatprep.subr.msk.bf16.mxu1 %vm325_vm5, %v2206_v46  ;;  %v2208_v53 = vsel %vm325_vm5, %v2206_v46, 0  ;;  %v2302_v54 = vmul.f32 0.1, %v3343_v19 }
0x13f5   :  { %v2300_v0 = vmul.f32 0.1, %v2132_v52  ;;  %v3344_v29 = vpop.f32.mrb[54].mxu1  ;;  %3354 = vmatpush3.bf16.msra.mxu1 %v2208_v53 }
0x13f6   :  { %v2135_v57 = vpop.f32.mrb[55].mxu1  ;;  %3363 = vmatprep.subr.bf16.mxu1 %v3597_v24  ;;  %v2303_v8 = vmul.f32 0.1, %v3344_v29  ;;  %v4312_v22 = vsub.f32 %v4160_v45, %v2302_v54 }
0x13f7   :  { %v2301_v51 = vmul.f32 0.1, %v2135_v57  ;;  %v4299_v33 = vsub.f32 %v4155_v15, %v2300_v0 }
0x13f8   :  { %3356 = vmatmul.mubr.msk.bf16.vlgmr.msra.gmra.mrb[56].mxu1 %vm318_vm4, %v4127_v34  ;;  %v4307_v2 = vsub.f32 %v4165_v36, %v2303_v8 }
0x13f9   :  { %v4302_v61 = vsub.f32 %v4170_v62, %v2301_v51  ;;  %3359 = vmatprep.mubr.msk.bf16.mxu1 %vm318_vm4, %v4133_v55 }
0x13fa   :  { %v2315_v15 = vpack.c.bf16 %v4307_v2, %v4312_v22 }
0x13fb   :  { %v2314_v21 = vpack.c.bf16 %v4302_v61, %v4299_v33 }
0x13fd   :  { %3376 = vmatpush3.bf16.msra.mxu0 %v2314_v21 }
0x13fe   :  { %3377 = vmatprep.subr.bf16.mxu0 %v3597_v24 }
0x1400   :  { %3360 = vmatmul.mubr.msk.bf16.gmra.mrb[60].mxu1 %vm318_vm4, %v4140_v35 }
0x1401   :  { %3378 = vmatpush3.bf16.msra.mxu0 %v2315_v15  ;;  %3371 = vmatprep.mubr.msk.bf16.mxu1 %vm3598_vm3, %v3597_v24 }
0x14cb   :  { %v3357_v36 = vpop.f32.mrb[56].mxu1 }
0x14cc   :  { %v2244_v62 = vpop.f32.mrb[57].mxu1  ;;  %v2284_v56 = vmul.f32 0.1, %v3357_v36 }
0x14cd   :  { %v2282_v30 = vmul.f32 0.1, %v2244_v62  ;;  %v3358_v10 = vpop.f32.mrb[58].mxu1 }
0x14ce   :  { %v2247_v44 = vpop.f32.mrb[59].mxu1  ;;  %v2285_v45 = vmul.f32 0.1, %v3358_v10  ;;  %v4333_v58 = vsub.f32 %v4197_v16, %v2284_v56 }
0x14cf   :  { %v2283_v1 = vmul.f32 0.1, %v2247_v44  ;;  %v4322_v37 = vsub.f32 %v4180_v26, %v2282_v30 }
0x14d0   :  { %v4328_v59 = vsub.f32 %v4190_v32, %v2285_v45 }
0x14d1   :  { %v4325_v13 = vsub.f32 %v4185_v63, %v2283_v1 }
0x14d2   :  { %v2311_v26 = vpack.c.bf16 %v4328_v59, %v4333_v58 }
0x14d3   :  { %v2310_v47 = vpack.c.bf16 %v4325_v13, %v4322_v37  ;;  %v3361_v3 = vpop.f32.mrb[60].mxu1 }
0x14d4   :  { %v2260_v28 = vpop.f32.mrb[61].mxu1  ;;  %v2288_v41 = vmul.f32 0.1, %v3361_v3 }
0x14d5   :  { %v2286_v6 = vmul.f32 0.1, %v2260_v28  ;;  %v3362_v4 = vpop.f32.mrb[62].mxu1  ;;  %3364 = vmatpush3.bf16.msra.mxu1 %v2310_v47 }
0x14d6   :  { %v2263_v9 = vpop.f32.mrb[63].mxu1  ;;  %3365 = vmatprep.subr.bf16.mxu1 %v3597_v24  ;;  %v2289_v63 = vmul.f32 0.1, %v3362_v4  ;;  %v4351_v19 = vsub.f32 %v4223_v42, %v2288_v41  ;;  %v2275_v42 = vsel %vm154_vm1, %v4289_v39, 0.0 }
0x14d7   :  { %v2287_v32 = vmul.f32 0.1, %v2263_v9  ;;  %v4339_v18 = vsub.f32 %v4205_v23, %v2286_v6  ;;  %v2276_v52 = vrot.slane %v2275_v42, 4 }
0x14d8   :  { %v4346_v16 = vsub.f32 %v4216_v40, %v2289_v63  ;;  %v2575_v40 = vsel %vm210_vm2, %v2315_v15, 0 }
0x14d9   :  { %v4342_v46 = vsub.f32 %v4210_v7, %v2287_v32  ;;  %3366 = vmatpush3.bf16.msra.mxu1 %v2311_v26  ;;  %v2572_v7 = vsel %vm210_vm2, %v2314_v21, 0  ;;  %v2277_v53 = vadd.f32 %v2276_v52, %v2275_v42 }
0x14da   :  { %3367 = vmatprep.subr.bf16.mxu1 %v3597_v24  ;;  %v2313_v23 = vpack.c.bf16 %v4346_v16, %v4351_v19 }
0x14db   :  { %v2312_v49 = vpack.c.bf16 %v4342_v46, %v4339_v18  ;;  %v2278_v0 = vrot.slane %v2277_v53, 2 }
0x14dd   :  { %3368 = vmatpush3.bf16.msra.mxu1 %v2312_v49 }
0x14de   :  { %3369 = vmatprep.subr.bf16.mxu1 %v3597_v24 }
0x14e1   :  { %3370 = vmatpush3.bf16.msra.mxu1 %v2313_v23 }
0x14e2   :  { %3389 = vmatprep.subr.bf16.mxu1 %v3597_v24 }
0x14e4   :  { %3372 = vmatmul.mubr.msk.bf16.vlgmr.msra.gmra.mrb[64].mxu1 %vm86_vm0, %v3711_v17  ;;  %v2279_v17 = vadd.f32 %v2278_v0, %v2277_v53 }
0x14e5   :  { %3393 = vmatprep.mubr.msk.bf16.mxu1 %vm3598_vm3, %v3597_v24 }
0x14e6   :  { %v2280_v29 = vrot.slane %v2279_v17, 1 }
0x14e8   :  { %v2281_v57 = vadd.f32 %v2280_v29, %v2279_v17  ;;  %v213_v29 = vpop.xlane.xlu1 %212 }
0x14e9   :  { %vm265_vm11 = vcmp.eq.f32.partialorder %v3770_v50, %v213_v29 }
0x14ea   :  { %3390 = vmatpush3.bf16.xpose.msra.mxu1 %v2572_v7  ;;  %v2298_v8 = vmul.f32 0.1, %v2281_v57  ;;  %v4390_v57 = vand.u32 127, %v50_v25 }
0x14eb   :  { %3391 = vmatprep.subr.bf16.mxu1 %v3597_v24 }
0x14ec   :  { %v4368_v51 = vsub.f32 %v4242_v60, %v2298_v8  ;;  %v2147_v60 = vsel %vm210_vm2, %v4275_v31, 0.0  ;;  %v266_v8 = vsel %vm265_vm11, %v4390_v57, 2 }
0x14ed   :  { %v2148_v1 = vrot.slane %v2147_v60, 4 }
0x14ee   :  { %v2320_v54 = vrot.slane %v4368_v51, %v3741_v27 }
0x14ef   :  { %v2149_v56 = vadd.f32 %v2148_v1, %v2147_v60 }
0x14f1   :  { %v2150_v47 = vrot.slane %v2149_v56, 2 }
0x14f2   :  { %3392 = vmatpush3.bf16.xpose.msra.mxu1 %v2575_v40 }
0x14f3   :  { %3419 = vmatprep.subr.bf16.mxu1 %v3597_v24  ;;  %v2151_v3 = vadd.f32 %v2150_v47, %v2149_v56 }
0x14f5   :  { %v2152_v28 = vrot.slane %v2151_v3, 1 }
0x14f7   :  { %v2153_v6 = vadd.f32 %v2152_v28, %v2151_v3 }
0x14f9   :  { %v2308_v4 = vmul.f32 0.1, %v2153_v6  ;;  %v4428_v6 = vsub.f32 %v3770_v50, %v213_v29 }
0x14fb   :  { %v4379_v9 = vsub.f32 %v4255_v14, %v2308_v4 }
0x14fd   :  { %v2370_v26 = vrot.slane %v4379_v9, %v3741_v27 }
0x15b7   :  { %v2356_v21 = vpop.f32.mrb[64].mxu1 }
0x15b8   :  { %v2357_v15 = vadd.f32 %v2356_v21, %v2320_v54  ;;  %v3373_v36 = vpop.f32.mrb[65].mxu1 }
0x15b9   :  { %v2359_v62 = vpop.f32.mrb[66].mxu1 }
0x15ba   :  { %v4372_v30 = vadd.f32 %v2359_v62, %v2320_v54  ;;  %v3374_v39 = vpop.f32.mrb[67].mxu1  ;;  %v2363_v10 = vmax.f32 %v2357_v15, 0.0  ;;  %v4395_v54 = vsel %vm210_vm2, %v266_v8, 2147483647  ;;  %v1090_v15 = vsel %vm210_vm2, %v4031_v43, -inf }
0x15bb   :  { %v269_v21 = vshra.s32 %v4395_v54, 16 }
0x15bc   :  { %v2364_v44 = vmax.f32 %v4372_v30, 0.0  ;;  %vm2617_vm9 = vcmp.gt.f32.partialorder %v4372_v30, 0.0 }
0x15bd   :  { %v4400_v36 = vcvt.s32.f32 %v269_v21 }
0x15be   :  { %v2365_v45 = vpack.c.bf16 %v2364_v44, %v2363_v10  ;;  %v2487_v17 = vpack.c.bf16 %v2364_v44, %v2364_v44 }
0x15c0   :  { %3380 = vmatmul.mubr.msk.bf16.vlgmr.msra.gmra.mrb[56].mxu0 %vm154_vm1, %v2365_v45 }
0x1693   :  { %v2409_v63 = vpop.f32.mrb[56].mxu0 }
0x1694   :  { %v4383_v32 = vadd.f32 %v2409_v63, %v2370_v26  ;;  %v3381_v41 = vpop.f32.mrb[57].mxu0 }
0x1695   :  { %v2412_v49 = vpop.f32.mrb[58].mxu0 }
0x1696   :  { %v2413_v23 = vadd.f32 %v2412_v49, %v2370_v26  ;;  %v3382_v31 = vpop.f32.mrb[59].mxu0  ;;  %v2416_v7 = vsel %vm210_vm2, %v4383_v32, -inf }
0x1697   :  { %2417 = vmax.xlane.f32.xlu1 %v2416_v7 }
0x1698   :  { %v2419_v40 = vsel %vm210_vm2, %v2413_v23, -inf }
0x1699   :  { %2420 = vmax.xlane.f32.xlu0 %v2419_v40 }
0x1726   :  { %v2421_v42 = vpop.xlane.xlu0 %2420 }
0x1727   :  { %v2423_v14 = vsub.f32 %v2413_v23, %v2421_v42 }
0x1729   :  { %v2426_v52 = vmul.f32 1.442695, %v2423_v14 }
0x172b   :  { %3498 = vpow2.f32 %v2426_v52 }
0x1735   :  { %v3499_v53 = vpop.eup %3498 }
0x1736   :  { %v2431_v0 = vsel %vm210_vm2, %v3499_v53, 0.0 }
0x1737   :  { %2432 = vadd.xlane.f32.xlu0 %v2431_v0 }
0x1764   :  { %2488 = vxpose.xlu0.c.b16.start.end [1/1] (short) (narrow) %v2487_v17, 32 }
0x1775   :  { %1091 = vmax.xlane.f32.xlu0 %v1090_v15 }
0x1779   :  { %272 = vmin.xlane.f32.xlu0 %v4400_v36 }
0x17c4   :  { %v2433_v62 = vpop.xlane.xlu0 %2432 }
0x17c5   :  { %3500 = vrcp.f32 %v2433_v62 }
0x17ca   :  { %v2496_v25 = vpop.trf.xlu0 }
0x17cb   :  { %3385 = vmatprep.mubr.msk.bf16.mxu0 %vm318_vm4, %v2496_v25 }
0x17ce   :  { %v2497_v56 = vpop.trf.xlu0 }
0x17cf   :  { %v3501_v39 = vpop.eup %3500 }
0x17d0   :  { %v2483_v10 = vmul.f32 %v3501_v39, %v3499_v53 }
0x17d2   :  { %v2484_v44 = vsub.f32 %v2483_v10, %v4061_v11  ;;  %v4417_v11 = vpop.xlane.xlu1 %218 }
0x17d3   :  { %vm1599_vm12 = vcmp.eq.f32.partialorder %v3768_v48, %v4417_v11 }
0x17d4   :  { %v4405_v45 = vmul.f32 0.125, %v2484_v44  ;;  %v1600_v26 = vsel %vm1599_vm12, %v4390_v57, 2 }
0x17d5   :  { %v1601_v50 = vsel %vm210_vm2, %v1600_v26, 2147483647 }
0x17d6   :  { %v2486_v60 = vpack.c.bf16 %v4405_v45, %v4405_v45  ;;  %v4419_v47 = vpop.xlane.xlu1 %676  ;;  %v1603_v40 = vshra.s32 %v1601_v50, 16 }
0x17d7   :  { %v4439_v41 = vsub.f32 %v3911_v12, %v4419_v47 }
0x17d8   :  { %3437 = vmatprep.subr.msk.bf16.mxu0 %vm325_vm5, %v2486_v60  ;;  %3394 = vmatmul.mubr.msk.bf16.vlgmr.msra.gmra.mrb[68].mxu1 %vm210_vm2, %v2486_v60  ;;  %v2511_v1 = vsel %vm325_vm5, %v2486_v60, 0  ;;  %v1605_v0 = vcvt.s32.f32 %v1603_v40  ;;  %v1602_v40 = vand.u32 65535, %v1601_v50 }
0x17d9   :  { %3384 = vmatpush3.bf16.msra.mxu0 %v2511_v1  ;;  %3423 = vmatprep.mubr.msk.bf16.mxu1 %vm3598_vm3, %v3597_v24  ;;  %v683_v42 = vmul.f32 1.442695, %v4439_v41 }
0x17da   :  { %v4421_v3 = vpop.xlane.xlu1 %1506 }
0x17db   :  { %v4448_v14 = vsub.f32 %v4150_v20, %v4421_v3 }
0x17dc   :  { %3386 = vmatmul.mubr.msk.bf16.vlgmr.msra.gmra.mrb[60].mxu0 %vm318_vm4, %v2497_v56  ;;  %v268_v56 = vand.u32 65535, %v4395_v54  ;;  %v1604_v54 = vcvt.s32.f32 %v1602_v40 }
0x17dd   :  { %3399 = vmatprep.mubr.msk.bf16.mxu0 %vm318_vm4, %v4118_v5  ;;  %v227_v5 = vmul.f32 1.442695, %v4428_v6  ;;  %v1509_v17 = vmul.f32 1.442695, %v4448_v14 }
0x17de   :  { %v4423_v28 = vpop.xlane.xlu1 %2002  ;;  %v270_v26 = vcvt.s32.f32 %v268_v56 }
0x17df   :  { %3502 = vpow2.f32 %v227_v5 }
0x17e0   :  { %3504 = vpow2.f32 %v683_v42 }
0x17e1   :  { %3506 = vpow2.f32 %v1509_v17 }
0x17e2   :  { %v2418_v4 = vpop.xlane.xlu1 %2417 }
0x17e3   :  { %vm2451_vm13 = vcmp.eq.f32.partialorder %v4383_v32, %v2418_v4  ;;  %v4453_v29 = vsub.f32 %v4383_v32, %v2418_v4 }
0x17e4   :  { %v2452_v31 = vsel %vm2451_vm13, %v4390_v57, 2 }
0x17e5   :  { %v2453_v53 = vsel %vm210_vm2, %v2452_v31, 2147483647  ;;  %v2424_v21 = vmul.f32 1.442695, %v4453_v29 }
0x17e6   :  { %v2455_v8 = vshra.s32 %v2453_v53, 16 }
0x17e7   :  { %3508 = vpow2.f32 %v2424_v21 }
0x17e8   :  { %v2457_v15 = vcvt.s32.f32 %v2455_v8  ;;  %v2454_v8 = vand.u32 65535, %v2453_v53  ;;  %v3011_v53 = vsel %vm2617_vm9, 1.0, %v3597_v24 }
0x17e9   :  { %v3503_v62 = vpop.eup %3502 }
0x17ea   :  { %v235_v25 = vsel %vm210_vm2, %v3503_v62, 0.0  ;;  %v3505_v39 = vpop.eup %3504  ;;  %v2456_v62 = vcvt.s32.f32 %v2454_v8 }
0x17eb   :  { %v687_v10 = vsel %vm210_vm2, %v3505_v39, 0.0  ;;  %v3507_v44 = vpop.eup %3506 }
0x17ec   :  { %v1511_v32 = vsel %vm210_vm2, %v3507_v44, 0.0 }
0x17f1   :  { %v3509_v60 = vpop.eup %3508 }
0x17f2   :  { %v2428_v4 = vsel %vm210_vm2, %v3509_v60, 0.0 }
0x1802   :  { %v4431_v63 = vpop.xlane.xlu0 %1091 }
0x1803   :  { %vm1125_vm14 = vcmp.eq.f32.partialorder %v4031_v43, %v4431_v63 }
0x1804   :  { %v1126_v49 = vsel %vm1125_vm14, %v4390_v57, 2 }
0x1805   :  { %v1127_v23 = vsel %vm210_vm2, %v1126_v49, 2147483647 }
0x1806   :  { %v1129_v7 = vshra.s32 %v1127_v23, 16  ;;  %v4459_v1 = vpop.xlane.xlu0 %272  ;;  %v1128_v49 = vand.u32 65535, %v1127_v23 }
0x1807   :  { %vm274_vm15 = vcmp.eq.f32.partialorder %v4400_v36, %v4459_v1 }
0x1808   :  { %v1131_v52 = vcvt.s32.f32 %v1129_v7  ;;  %v275_v5 = vsel %vm274_vm15, %v270_v26, inf  ;;  %v1130_v7 = vcvt.s32.f32 %v1128_v49 }
0x180a   :  { %1132 = vmin.xlane.f32.xlu0 %v1131_v52 }
0x180e   :  { %1606 = vmin.xlane.f32.xlu0 %v1605_v0 }
0x1812   :  { %2458 = vmin.xlane.f32.xlu0 %v2457_v15 }
0x1816   :  { %236 = vadd.xlane.f32.xlu0 %v235_v25 }
0x181a   :  { %688 = vadd.xlane.f32.xlu0 %v687_v10 }
0x181e   :  { %1512 = vadd.xlane.f32.xlu0 %v1511_v32 }
0x1822   :  { %2429 = vadd.xlane.f32.xlu0 %v2428_v4 }
0x1826   :  { %276 = vmin.xlane.f32.xlu0 %v275_v5 }
0x1897   :  { %v4465_v31 = vpop.xlane.xlu0 %1132 }
0x1898   :  { %vm1134_vm6 = vcmp.eq.f32.partialorder %v1131_v52, %v4465_v31 }
0x1899   :  { %v1135_v42 = vsel %vm1134_vm6, %v1130_v7, inf  ;;  %v4485_v7 = vld [vmem:[%s4694_s1] sm:$0xff] }
0x189a   :  { %1136 = vmin.xlane.f32.xlu0 %v1135_v42 }
0x189b   :  { %v4468_v17 = vpop.xlane.xlu0 %1606 }
0x189c   :  { %vm1608_vm7 = vcmp.eq.f32.partialorder %v1605_v0, %v4468_v17 }
0x189d   :  { %v1609_v21 = vsel %vm1608_vm7, %v1604_v54, inf }
0x189e   :  { %1610 = vmin.xlane.f32.xlu0 %v1609_v21 }
0x189f   :  { %v4471_v36 = vpop.xlane.xlu0 %2458 }
0x18a0   :  { %vm2460_vm8 = vcmp.eq.f32.partialorder %v2457_v15, %v4471_v36 }
0x18a1   :  { %v2461_v23 = vsel %vm2460_vm8, %v2456_v62, inf }
0x18a2   :  { %2462 = vmin.xlane.f32.xlu0 %v2461_v23 }
0x18a3   :  { %v237_v50 = vpop.xlane.xlu0 %236 }
0x18a4   :  { %3510 = vlog2.f32 %v237_v50 }
0x18a7   :  { %v689_v52 = vpop.xlane.xlu0 %688 }
0x18a8   :  { %3512 = vlog2.f32 %v689_v52 }
0x18ab   :  { %v2611_v25 = vpop.f32.mrb[68].mxu1 }
0x18ac   :  { %v4476_v39 = vmul.f32 %v3011_v53, %v2611_v25  ;;  %v3395_v0 = vpop.f32.mrb[69].mxu1 }
0x18ad   :  { %v2614_v10 = vpop.f32.mrb[70].mxu1 }
0x18ae   :  { %v3511_v44 = vpop.eup %3510  ;;  %v2621_v32 = vpack.c.bf16 %v4476_v39, %v4476_v39  ;;  %v3396_v15 = vpop.f32.mrb[71].mxu1 }
0x18af   :  { %v248_v60 = vmul.f32 0.6931472, %v3511_v44  ;;  %v3387_v56 = vpop.f32.mrb[60].mxu0  ;;  %v1613_v15 = vcvt.f32.s32 %v4468_v17 }
0x18b0   :  { %v2717_v4 = vmul.f32 0.1, %v3387_v56  ;;  %v2547_v26 = vpop.f32.mrb[61].mxu0  ;;  %3438 = vmatprep.subr.msk.bf16.mxu0 %vm325_vm5, %v2621_v32  ;;  %v2623_v30 = vsel %vm325_vm5, %v2621_v32, 0 }
0x18b1   :  { %v2715_v5 = vmul.f32 0.1, %v2547_v26  ;;  %v3388_v49 = vpop.f32.mrb[62].mxu0  ;;  %3398 = vmatpush3.bf16.msra.mxu0 %v2623_v30  ;;  %v249_v40 = vsub.f32 %v4428_v6, %v248_v60  ;;  %v2465_v26 = vcvt.f32.s32 %v4471_v36 }
0x18b2   :  { %v3513_v42 = vpop.eup %3512  ;;  %v2718_v54 = vmul.f32 0.1, %v3388_v49  ;;  %v2550_v8 = vpop.f32.mrb[63].mxu0  ;;  %3407 = vmatprep.subr.bf16.mxu0 %v3597_v24  ;;  %v2721_v23 = vsub.f32 %v4312_v22, %v2717_v4  ;;  %v1614_v4 = vshll.u32 %v1613_v15, 16 }
0x18b3   :  { %v694_v21 = vmul.f32 0.6931472, %v3513_v42  ;;  %v2716_v62 = vmul.f32 0.1, %v2550_v8  ;;  %v250_v52 = vmul.f32 %v249_v40, %v4485_v7  ;;  %v2719_v25 = vsub.f32 %v4299_v33, %v2715_v5 }
0x18b4   :  { %v2722_v50 = vsub.f32 %v4307_v2, %v2718_v54  ;;  %3400 = vmatmul.mubr.msk.bf16.vlgmr.msra.gmra.mrb[64].mxu0 %vm318_vm4, %v4127_v34  ;;  %v2466_v40 = vshll.u32 %v2465_v26, 16 }
0x18b5   :  { %v2720_v6 = vsub.f32 %v4302_v61, %v2716_v62  ;;  %3403 = vmatprep.mubr.msk.bf16.mxu0 %vm318_vm4, %v4133_v55  ;;  %v695_v53 = vsub.f32 %v4439_v41, %v694_v21  ;;  %v251_v10 = vsel %vm210_vm2, %v250_v52, 0.0  ;;  %v4507_v55 = vpop.xlane.xlu0 %1512  ;;  %v1139_v41 = vcvt.f32.s32 %v4465_v31 }
0x18b6   :  { %v2730_v0 = vpack.c.bf16 %v2722_v50, %v2721_v23  ;;  %252 = vadd.xlane.f32.xlu0 %v251_v10 }
0x18b7   :  { %v2729_v22 = vpack.c.bf16 %v2720_v6, %v2719_v25  ;;  %v696_v2 = vmul.f32 %v695_v53, %v4485_v7  ;;  %v1140_v32 = vshll.u32 %v1139_v41, 16 }
0x18b9   :  { %3420 = vmatpush3.bf16.msra.mxu1 %v2729_v22  ;;  %v697_v34 = vsel %vm210_vm2, %v696_v2, 0.0  ;;  %v4509_v33 = vpop.xlane.xlu0 %2429 }
0x18ba   :  { %3421 = vmatprep.subr.bf16.mxu1 %v3597_v24  ;;  %698 = vadd.xlane.f32.xlu0 %v697_v34 }
0x18bc   :  { %3404 = vmatmul.mubr.msk.bf16.gmra.mrb[68].mxu0 %vm318_vm4, %v4140_v35 }
0x18bd   :  { %3422 = vmatpush3.bf16.msra.mxu1 %v2730_v0  ;;  %3415 = vmatprep.mubr.msk.bf16.mxu0 %vm3598_vm3, %v3597_v24  ;;  %v4511_v61 = vpop.xlane.xlu0 %276  ;;  %vm2036_vm3 = vcmp.eq.f32.partialorder %v4259_v38, %v4423_v28 }
0x1927   :  { %v1137_v44 = vpop.xlane.xlu0 %1136 }
0x1928   :  { %v1138_v60 = vcvt.f32.s32 %v1137_v44 }
0x192a   :  { %v4515_v56 = vadd.s32 %v1140_v32, %v1138_v60 }
0x192b   :  { %v1611_v35 = vpop.xlane.xlu0 %1610 }
0x192c   :  { %v1612_v30 = vcvt.f32.s32 %v1611_v35  ;;  %vm1142_vm14 = vcmp.eq.s32.totalorder %v4390_v57, %v4515_v56 }
0x192e   :  { %v4518_v5 = vadd.s32 %v1614_v4, %v1612_v30 }
0x192f   :  { %v2463_v49 = vpop.xlane.xlu0 %2462 }
0x1930   :  { %v2464_v42 = vcvt.f32.s32 %v2463_v49  ;;  %vm1616_vm6 = vcmp.eq.s32.totalorder %v4390_v57, %v4518_v5 }
0x1931   :  { %v2985_v5 = vsel %vm1616_vm6, 1.0, %v3597_v24 }
0x1932   :  { %v4520_v54 = vadd.s32 %v2466_v40, %v2464_v42 }
0x1934   :  { %vm2468_vm9 = vcmp.eq.s32.totalorder %v4390_v57, %v4520_v54 }
0x1943   :  { %v253_v31 = vpop.xlane.xlu0 %252 }
0x1944   :  { %v254_v8 = vrot.slane %v253_v31, 4 }
0x1946   :  { %v255_v21 = vadd.f32 %v254_v8, %v253_v31 }
0x1948   :  { %v256_v62 = vrot.slane %v255_v21, 2 }
0x194a   :  { %v257_v17 = vadd.f32 %v256_v62, %v255_v21  ;;  %v3548_v21 = vld [vmem:[%s4693_s0 + $0x8] sm:$0xf] }
0x194c   :  { %v258_v23 = vrot.slane %v257_v17, 1 }
0x194e   :  { %v259_v50 = vadd.f32 %v258_v23, %v257_v17 }
0x1950   :  { %3439 = vpush %v259_v50 }
0x1987   :  { %v3401_v52 = vpop.f32.mrb[64].mxu0 }
0x1988   :  { %v2699_v25 = vmul.f32 0.1, %v3401_v52  ;;  %v2659_v6 = vpop.f32.mrb[65].mxu0 }
0x1989   :  { %v2697_v36 = vmul.f32 0.1, %v2659_v6  ;;  %v3402_v53 = vpop.f32.mrb[66].mxu0 }
0x198a   :  { %v2700_v0 = vmul.f32 0.1, %v3402_v53  ;;  %v2662_v10 = vpop.f32.mrb[67].mxu0  ;;  %v2707_v2 = vsub.f32 %v4333_v58, %v2699_v25 }
0x198b   :  { %v2698_v22 = vmul.f32 0.1, %v2662_v10  ;;  %v2705_v41 = vsub.f32 %v4322_v37, %v2697_v36 }
0x198c   :  { %v2708_v34 = vsub.f32 %v4328_v59, %v2700_v0 }
0x198d   :  { %v2706_v44 = vsub.f32 %v4325_v13, %v2698_v22 }
0x198e   :  { %v2726_v32 = vpack.c.bf16 %v2708_v34, %v2707_v2 }
0x198f   :  { %v2725_v15 = vpack.c.bf16 %v2706_v44, %v2705_v41  ;;  %v3405_v60 = vpop.f32.mrb[68].mxu0 }
0x1990   :  { %v2703_v35 = vmul.f32 0.1, %v3405_v60  ;;  %v2675_v4 = vpop.f32.mrb[69].mxu0 }
0x1991   :  { %v2701_v26 = vmul.f32 0.1, %v2675_v4  ;;  %v3406_v30 = vpop.f32.mrb[70].mxu0  ;;  %3408 = vmatpush3.bf16.msra.mxu0 %v2725_v15 }
0x1992   :  { %v2704_v49 = vmul.f32 0.1, %v3406_v30  ;;  %v2678_v40 = vpop.f32.mrb[71].mxu0  ;;  %3409 = vmatprep.subr.bf16.mxu0 %v3597_v24  ;;  %v2711_v58 = vsub.f32 %v4351_v19, %v2703_v35 }
0x1993   :  { %v2702_v42 = vmul.f32 0.1, %v2678_v40  ;;  %v2709_v37 = vsub.f32 %v4339_v18, %v2701_v26  ;;  %v2690_v18 = vsel %vm154_vm1, %v4476_v39, 0.0  ;;  %v2562_v39 = vsel %vm210_vm2, %v4405_v45, 0.0 }
0x1994   :  { %v2712_v59 = vsub.f32 %v4346_v16, %v2704_v49  ;;  %v2691_v16 = vrot.slane %v2690_v18, 4  ;;  %v2563_v34 = vrot.slane %v2562_v39, 4 }
0x1995   :  { %v2710_v13 = vsub.f32 %v4342_v46, %v2702_v42  ;;  %3410 = vmatpush3.bf16.msra.mxu0 %v2726_v32 }
0x1996   :  { %v2728_v31 = vpack.c.bf16 %v2712_v59, %v2711_v58  ;;  %3411 = vmatprep.subr.bf16.mxu0 %v3597_v24  ;;  %v2692_v46 = vadd.f32 %v2691_v16, %v2690_v18  ;;  %v2564_v41 = vadd.f32 %v2563_v34, %v2562_v39  ;;  %v4566_v16 = vsub.f32 %v4031_v43, %v4431_v63 }
0x1997   :  { %v2727_v8 = vpack.c.bf16 %v2710_v13, %v2709_v37 }
0x1998   :  { %v2693_v19 = vrot.slane %v2692_v46, 2  ;;  %v2565_v44 = vrot.slane %v2564_v41, 2 }
0x1999   :  { %3412 = vmatpush3.bf16.msra.mxu0 %v2727_v8 }
0x199a   :  { %3413 = vmatprep.subr.bf16.mxu0 %v3597_v24  ;;  %v2694_v62 = vadd.f32 %v2693_v19, %v2692_v46  ;;  %v2566_v32 = vadd.f32 %v2565_v44, %v2564_v41  ;;  %v4570_v46 = vsub.f32 %v4259_v38, %v4423_v28  ;;  %v1098_v19 = vmul.f32 1.442695, %v4566_v16 }
0x199c   :  { %v2695_v17 = vrot.slane %v2694_v62, 1  ;;  %v2567_v15 = vrot.slane %v2566_v32, 1 }
0x199d   :  { %3414 = vmatpush3.bf16.msra.mxu0 %v2728_v31 }
0x199e   :  { %v2696_v23 = vadd.f32 %v2695_v17, %v2694_v62  ;;  %v2009_v17 = vmul.f32 1.442695, %v4570_v46 }
0x19a0   :  { %3416 = vmatmul.mubr.msk.bf16.vlgmr.msra.gmra.mrb[72].mxu0 %vm86_vm0, %v3548_v21  ;;  %v2713_v50 = vmul.f32 0.1, %v2696_v23  ;;  %vm710_vm0 = vcmp.eq.f32.partialorder %v3911_v12, %v4419_v47  ;;  %v4561_v21 = vsub.f32 %v3768_v48, %v4417_v11 }
0x19a1   :  { %v711_v4 = vsel %vm710_vm0, %v4390_v57, 2 }
0x19a2   :  { %v2714_v52 = vsub.f32 %v4368_v51, %v2713_v50  ;;  %v2568_v51 = vadd.f32 %v2567_v15, %v2566_v32  ;;  %v712_v45 = vsel %vm210_vm2, %v711_v4, 2147483647  ;;  %v231_v18 = vmul.f32 1.442695, %v4561_v21 }
0x19a3   :  { %v714_v47 = vshra.s32 %v712_v45, 16  ;;  %v279_v4 = vcvt.f32.s32 %v4459_v1 }
0x19a4   :  { %v2735_v25 = vrot.slane %v2714_v52, %v3741_v27  ;;  %v2723_v60 = vmul.f32 0.1, %v2568_v51  ;;  %3514 = vpow2.f32 %v231_v18 }
0x19a5   :  { %3516 = vpow2.f32 %v1098_v19 }
0x19a6   :  { %v2724_v35 = vsub.f32 %v4379_v9, %v2723_v60  ;;  %3518 = vpow2.f32 %v2009_v17 }
0x19a8   :  { %v2786_v26 = vrot.slane %v2724_v35, %v3741_v27  ;;  %v716_v27 = vcvt.s32.f32 %v714_v47 }
0x19ae   :  { %v3515_v50 = vpop.eup %3514 }
0x19af   :  { %v241_v28 = vsel %vm210_vm2, %v3515_v50, 0.0  ;;  %v3517_v52 = vpop.eup %3516 }
0x1a73   :  { %v2774_v6 = vpop.f32.mrb[72].mxu0 }
0x1a74   :  { %v2775_v36 = vadd.f32 %v2774_v6, %v2735_v25  ;;  %v3417_v53 = vpop.f32.mrb[73].mxu0  ;;  %v1102_v25 = vsel %vm210_vm2, %v3517_v52, 0.0  ;;  %v3519_v6 = vpop.eup %3518 }
0x1a75   :  { %v2777_v0 = vpop.f32.mrb[74].mxu0  ;;  %v713_v53 = vand.u32 65535, %v712_v45  ;;  %v280_v45 = vshll.u32 %v279_v4, 16 }
0x1a76   :  { %v2780_v10 = vmax.f32 %v2775_v36, 0.0  ;;  %v3418_v22 = vpop.f32.mrb[75].mxu0  ;;  %v2013_v0 = vsel %vm210_vm2, %v3519_v6, 0.0 }
0x1a78   :  { %v2781_v2 = vpack.c.bf16 %v2780_v10, %v2780_v10  ;;  %v715_v10 = vcvt.s32.f32 %v713_v53 }
0x1a7a   :  { %3424 = vmatmul.mubr.msk.bf16.vlgmr.msra.gmra.mrb[72].mxu1 %vm154_vm1, %v2781_v2  ;;  %vm1531_vm1 = vcmp.eq.f32.partialorder %v4150_v20, %v4421_v3  ;;  %v2037_v20 = vsel %vm2036_vm3, %v4390_v57, 2  ;;  %vm58_vm3 = vcmp.eq.s32.totalorder %v4390_v57, 2 }
0x1a7b   :  { %v1532_v30 = vsel %vm1531_vm1, %v4390_v57, 2  ;;  %v2038_v37 = vsel %vm210_vm2, %v2037_v20, 2147483647  ;;  %vm55_vm1 = vcmp.eq.s32.totalorder %v4390_v57, 1 }
0x1a7c   :  { %v1533_v59 = vsel %vm210_vm2, %v1532_v30, 2147483647  ;;  %v2040_v31 = vshra.s32 %v2038_v37, 16  ;;  %v2039_v15 = vand.u32 65535, %v2038_v37 }
0x1a7d   :  { %v1535_v3 = vshra.s32 %v1533_v59, 16  ;;  %v1534_v34 = vand.u32 65535, %v1533_v59 }
0x1a7e   :  { %v2042_v8 = vcvt.s32.f32 %v2040_v31  ;;  %v2041_v60 = vcvt.s32.f32 %v2039_v15 }
0x1a7f   :  { %v1537_v13 = vcvt.s32.f32 %v1535_v3  ;;  %v1536_v32 = vcvt.s32.f32 %v1534_v34 }
0x1b4d   :  { %v2825_v49 = vpop.f32.mrb[72].mxu1 }
0x1b4e   :  { %v2826_v40 = vadd.f32 %v2825_v49, %v2786_v26  ;;  %v3425_v42 = vpop.f32.mrb[73].mxu1  ;;  %v278_v26 = vcvt.f32.s32 %v4511_v61 }
0x1b4f   :  { %v2828_v12 = vpop.f32.mrb[74].mxu1 }
0x1b50   :  { %v3426_v9 = vpop.f32.mrb[75].mxu1  ;;  %v2831_v58 = vsel %vm210_vm2, %v2826_v40, -inf  ;;  %v281_v30 = vadd.s32 %v280_v45, %v278_v26 }
0x1b51   :  { %2832 = vmax.xlane.f32.xlu1 %v2831_v58 }
0x1b52   :  { %vm282_vm12 = vcmp.eq.s32.totalorder %v4390_v57, %v281_v30 }
0x1b55   :  { %717 = vmin.xlane.f32.xlu1 %v716_v27 }
0x1b59   :  { %1538 = vmin.xlane.f32.xlu1 %v1537_v13 }
0x1b5d   :  { %2043 = vmin.xlane.f32.xlu1 %v2042_v8 }
0x1bde   :  { %v2833_v62 = vpop.xlane.xlu1 %2832 }
0x1bdf   :  { %vm2857_vm4 = vcmp.eq.f32.partialorder %v2826_v40, %v2833_v62  ;;  %v4576_v43 = vsub.f32 %v2826_v40, %v2833_v62  ;;  %v2951_v40 = vsel %vm282_vm12, 1.0, %v3597_v24 }
0x1be0   :  { %v2858_v48 = vsel %vm2857_vm4, %v4390_v57, 2  ;;  %v285_v9 = vmul.f32 %v2951_v40, %v4485_v7  ;;  %vm61_vm4 = vcmp.eq.s32.totalorder %v4390_v57, 3 }
0x1be1   :  { %v2859_v11 = vsel %vm210_vm2, %v2858_v48, 2147483647  ;;  %v2835_v38 = vmul.f32 1.442695, %v4576_v43 }
0x1be2   :  { %v2861_v23 = vshra.s32 %v2859_v11, 16  ;;  %v718_v36 = vpop.xlane.xlu1 %717  ;;  %v2860_v49 = vand.u32 65535, %v2859_v11  ;;  %v286_v61 = vsel %vm210_vm2, %v285_v9, 0.0 }
0x1be3   :  { %3520 = vpow2.f32 %v2835_v38  ;;  %vm719_vm5 = vcmp.eq.f32.partialorder %v716_v27, %v718_v36  ;;  %v724_v27 = vcvt.f32.s32 %v718_v36 }
0x1be4   :  { %v2863_v63 = vcvt.s32.f32 %v2861_v23  ;;  %v720_v2 = vsel %vm719_vm5, %v715_v10, inf  ;;  %v2862_v12 = vcvt.s32.f32 %v2860_v49  ;;  %3522 = vlog2.f32 %v4507_v55 }
0x1be5   :  { %vm2908_vm5 = vcmask 1040384  }
0x1be6   :  { %2864 = vmin.xlane.f32.xlu1 %v2863_v63  ;;  %v4582_v22 = vpop.xlane.xlu1 %1538 }
0x1be7   :  { %vm1540_vm10 = vcmp.eq.f32.partialorder %v1537_v13, %v4582_v22  ;;  %v725_v13 = vshll.u32 %v724_v27, 16  ;;  %v1545_v48 = vcvt.f32.s32 %v4582_v22 }
0x1be8   :  { %v1541_v51 = vsel %vm1540_vm10, %v1536_v32, inf }
0x1be9   :  { %v1546_v6 = vshll.u32 %v1545_v48, 16 }
0x1bea   :  { %242 = vadd.xlane.f32.xlu1 %v241_v28  ;;  %v4586_v44 = vpop.xlane.xlu1 %2043 }
0x1beb   :  { %vm2045_vm11 = vcmp.eq.f32.partialorder %v2042_v8, %v4586_v44  ;;  %v2050_v36 = vcvt.f32.s32 %v4586_v44 }
0x1bec   :  { %v2046_v35 = vsel %vm2045_vm11, %v2041_v60, inf }
0x1bed   :  { %v3521_v39 = vpop.eup %3520  ;;  %v2051_v32 = vshll.u32 %v2050_v36, 16 }
0x1bee   :  { %1103 = vadd.xlane.f32.xlu1 %v1102_v25  ;;  %v2837_v41 = vsel %vm210_vm2, %v3521_v39, 0.0  ;;  %v3523_v20 = vpop.eup %3522 }
0x1bef   :  { %v1515_v3 = vmul.f32 0.6931472, %v3523_v20 }
0x1bf1   :  { %v1516_v17 = vsub.f32 %v4448_v14, %v1515_v3 }
0x1bf2   :  { %2014 = vadd.xlane.f32.xlu1 %v2013_v0 }
0x1bf3   :  { %v1517_v52 = vmul.f32 %v1516_v17, %v4485_v7 }
0x1bf6   :  { %721 = vmin.xlane.f32.xlu1 %v720_v2 }
0x1bfa   :  { %2838 = vadd.xlane.f32.xlu1 %v2837_v41  ;;  %v1518_v41 = vsel %vm210_vm2, %v1517_v52, 0.0 }
0x1bfe   :  { %1542 = vmin.xlane.f32.xlu1 %v1541_v51  ;;  %v48_v51 = vld [vmem:[%s4694_s1 + $0x10] sm:$0xff]  ;;  %s4647_s1 = spop %3439 }
0x1bff   :  { %v1619_v49 = vmul.f32 %v2985_v5, %v48_v51 }
0x1c02   :  { %2047 = vmin.xlane.f32.xlu1 %v2046_v35 }
0x1c73   :  { %v4593_v42 = vpop.xlane.xlu1 %2864 }
0x1c74   :  { %vm2866_vm13 = vcmp.eq.f32.partialorder %v2863_v63, %v4593_v42 }
0x1c75   :  { %v2867_v47 = vsel %vm2866_vm13, %v2862_v12, inf }
0x1c76   :  { %2868 = vmin.xlane.f32.xlu1 %v2867_v47 }
0x1c77   :  { %v243_v1 = vpop.xlane.xlu1 %242 }
0x1c78   :  { %3524 = vlog2.f32 %v243_v1 }
0x1c7a   :  { %287 = vadd.xlane.f32.xlu1 %v286_v61 }
0x1c7b   :  { %v1104_v58 = vpop.xlane.xlu1 %1103 }
0x1c7c   :  { %3526 = vlog2.f32 %v1104_v58 }
0x1c7f   :  { %v2015_v59 = vpop.xlane.xlu1 %2014 }
0x1c80   :  { %3528 = vlog2.f32 %v2015_v59 }
0x1c81   :  { %3530 = vlog2.f32 %v4509_v33  ;;  %v2973_v33 = vsel %vm1142_vm14, 1.0, %v3597_v24 }
0x1c82   :  { %v3525_v8 = vpop.eup %3524  ;;  %v1145_v14 = vmul.f32 %v2973_v33, %v4485_v7 }
0x1c83   :  { %v722_v37 = vpop.xlane.xlu1 %721  ;;  %v1583_v11 = vmul.f32 0.6931472, %v3525_v8 }
0x1c84   :  { %v723_v31 = vcvt.f32.s32 %v722_v37  ;;  %v1146_v15 = vsel %vm210_vm2, %v1145_v14, 0.0 }
0x1c85   :  { %v1584_v22 = vsub.f32 %v4561_v21, %v1583_v11 }
0x1c86   :  { %v3527_v55 = vpop.eup %3526  ;;  %v726_v18 = vadd.s32 %v725_v13, %v723_v31  ;;  %v699_v31 = vpop.xlane.xlu0 %698 }
0x1c87   :  { %v1109_v19 = vmul.f32 0.6931472, %v3527_v55  ;;  %v2839_v62 = vpop.xlane.xlu1 %2838  ;;  %v1585_v60 = vmul.f32 %v1584_v22, %v48_v51  ;;  %v700_v8 = vrot.slane %v699_v31, 4  ;;  %v2871_v55 = vcvt.f32.s32 %v4593_v42 }
0x1c88   :  { %3532 = vlog2.f32 %v2839_v62  ;;  %vm727_vm15 = vcmp.eq.s32.totalorder %v4390_v57, %v726_v18 }
0x1c89   :  { %v2962_v23 = vsel %vm727_vm15, 1.0, %v3597_v24  ;;  %v1110_v63 = vsub.f32 %v4566_v16, %v1109_v19  ;;  %v1586_v47 = vsel %vm210_vm2, %v1585_v60, 0.0  ;;  %v2872_v19 = vshll.u32 %v2871_v55, 16 }
0x1c8a   :  { %v3529_v50 = vpop.eup %3528  ;;  %v730_v56 = vmul.f32 %v2962_v23, %v4485_v7 }
0x1c8b   :  { %v1543_v38 = vpop.xlane.xlu1 %1542  ;;  %v1111_v28 = vmul.f32 %v1110_v63, %v4485_v7  ;;  %v3531_v25 = vpop.eup %3530  ;;  %v2020_v10 = vmul.f32 0.6931472, %v3529_v50 }
0x1c8c   :  { %v1544_v53 = vcvt.f32.s32 %v1543_v38  ;;  %v731_v0 = vsel %vm210_vm2, %v730_v56, 0.0  ;;  %v2435_v39 = vmul.f32 0.6931472, %v3531_v25 }
0x1c8d   :  { %732 = vadd.xlane.f32.xlu1 %v731_v0  ;;  %v1112_v16 = vsel %vm210_vm2, %v1111_v28, 0.0  ;;  %v2021_v35 = vsub.f32 %v4570_v46, %v2020_v10 }
0x1c8e   :  { %v1547_v2 = vadd.s32 %v1546_v6, %v1544_v53  ;;  %1113 = vadd.xlane.f32.xlu0 %v1112_v16  ;;  %v2436_v40 = vsub.f32 %v4453_v29, %v2435_v39  ;;  %v3007_v29 = vsel %vm2468_vm9, 1.0, %v3597_v24 }
0x1c8f   :  { %v2048_v34 = vpop.xlane.xlu1 %2047  ;;  %v2022_v9 = vmul.f32 %v2021_v35, %v48_v51  ;;  %v2471_v27 = vmul.f32 %v3007_v29, %v48_v51 }
0x1c90   :  { %v2049_v44 = vcvt.f32.s32 %v2048_v34  ;;  %vm1548_vm7 = vcmp.eq.s32.totalorder %v4390_v57, %v1547_v2  ;;  %v2437_v58 = vmul.f32 %v2436_v40, %v48_v51 }
0x1c91   :  { %1147 = vadd.xlane.f32.xlu1 %v1146_v15  ;;  %v2984_v21 = vsel %vm1548_vm7, 1.0, %v3597_v24  ;;  %v2023_v61 = vsel %vm210_vm2, %v2022_v9, 0.0  ;;  %v2472_v54 = vsel %vm210_vm2, %v2471_v27, 0.0 }
0x1c92   :  { %v3533_v4 = vpop.eup %3532  ;;  %v2052_v26 = vadd.s32 %v2051_v32, %v2049_v44  ;;  %1519 = vadd.xlane.f32.xlu0 %v1518_v41  ;;  %v1551_v45 = vmul.f32 %v2984_v21, %v4485_v7  ;;  %v1620_v7 = vsel %vm210_vm2, %v1619_v49, 0.0  ;;  %v2438_v3 = vsel %vm210_vm2, %v2437_v58, 0.0 }
0x1c93   :  { %v2841_v12 = vmul.f32 0.6931472, %v3533_v4 }
0x1c94   :  { %v1552_v30 = vsel %vm210_vm2, %v1551_v45, 0.0  ;;  %vm2053_vm8 = vcmp.eq.s32.totalorder %v4390_v57, %v2052_v26 }
0x1c95   :  { %1553 = vadd.xlane.f32.xlu1 %v1552_v30  ;;  %v2996_v1 = vsel %vm2053_vm8, 1.0, %v3597_v24  ;;  %v2842_v59 = vsub.f32 %v4576_v43, %v2841_v12  ;;  %v701_v43 = vadd.f32 %v700_v8, %v699_v31 }
0x1c96   :  { %1587 = vadd.xlane.f32.xlu0 %v1586_v47  ;;  %v2056_v46 = vmul.f32 %v2996_v1, %v48_v51 }
0x1c97   :  { %v2843_v37 = vmul.f32 %v2842_v59, %v48_v51  ;;  %v702_v48 = vrot.slane %v701_v43, 2 }
0x1c98   :  { %v2057_v20 = vsel %vm210_vm2, %v2056_v46, 0.0 }
0x1c99   :  { %1621 = vadd.xlane.f32.xlu1 %v1620_v7  ;;  %v2844_v13 = vsel %vm210_vm2, %v2843_v37, 0.0  ;;  %v703_v56 = vadd.f32 %v702_v48, %v701_v43 }
0x1c9a   :  { %2024 = vadd.xlane.f32.xlu0 %v2023_v61 }
0x1c9b   :  { %v704_v14 = vrot.slane %v703_v56, 1 }
0x1c9d   :  { %2058 = vadd.xlane.f32.xlu1 %v2057_v20  ;;  %v705_v6 = vadd.f32 %v704_v14, %v703_v56 }
0x1c9e   :  { %2439 = vadd.xlane.f32.xlu0 %v2438_v3 }
0x1ca1   :  { %2473 = vadd.xlane.f32.xlu1 %v2472_v54 }
0x1ca2   :  { %2845 = vadd.xlane.f32.xlu0 %v2844_v13 }
0x1d03   :  { %v2869_v18 = vpop.xlane.xlu1 %2868 }
0x1d04   :  { %v2870_v62 = vcvt.f32.s32 %v2869_v18 }
0x1d06   :  { %v2873_v17 = vadd.s32 %v2872_v19, %v2870_v62 }
0x1d07   :  { %v288_v33 = vpop.xlane.xlu1 %287 }
0x1d08   :  { %v289_v11 = vrot.slane %v288_v33, 4  ;;  %vm2874_vm0 = vcmp.eq.s32.totalorder %v4390_v57, %v2873_v17 }
0x1d09   :  { %v3018_v23 = vsel %vm2874_vm0, 1.0, %v3597_v24 }
0x1d0a   :  { %v290_v63 = vadd.f32 %v289_v11, %v288_v33  ;;  %v2877_v50 = vmul.f32 %v3018_v23, %v48_v51 }
0x1d0c   :  { %v291_v38 = vrot.slane %v290_v63, 2  ;;  %v2878_v28 = vsel %vm210_vm2, %v2877_v50, 0.0  ;;  %vm52_vm2 = vcmp.eq.s32.totalorder %v4390_v57, 0 }
0x1d0d   :  { %2879 = vadd.xlane.f32.xlu1 %v2878_v28 }
0x1d0e   :  { %v292_v42 = vadd.f32 %v291_v38, %v290_v63 }
0x1d10   :  { %v293_v52 = vrot.slane %v292_v42, 1 }
0x1d12   :  { %v294_v25 = vadd.f32 %v293_v52, %v292_v42 }
0x1d14   :  { %3441 = vpush %v294_v25 }
0x1d15   :  { %3443 = vpush %v705_v6 }
0x1d1a   :  { %v733_v36 = vpop.xlane.xlu1 %732 }
0x1d1b   :  { %v734_v53 = vrot.slane %v733_v36, 4  ;;  %v1114_v0 = vpop.xlane.xlu0 %1113 }
0x1d1c   :  { %v1115_v10 = vrot.slane %v1114_v0, 4 }
0x1d1d   :  { %v735_v16 = vadd.f32 %v734_v53, %v733_v36 }
0x1d1e   :  { %v1116_v22 = vadd.f32 %v1115_v10, %v1114_v0  ;;  %v1148_v2 = vpop.xlane.xlu1 %1147 }
0x1d1f   :  { %v736_v39 = vrot.slane %v735_v16, 2  ;;  %v1149_v34 = vrot.slane %v1148_v2, 4  ;;  %v1520_v41 = vpop.xlane.xlu0 %1519 }
0x1d20   :  { %v1117_v32 = vrot.slane %v1116_v22, 2  ;;  %v1521_v44 = vrot.slane %v1520_v41, 4 }
0x1d21   :  { %v1150_v15 = vadd.f32 %v1149_v34, %v1148_v2  ;;  %v737_v51 = vadd.f32 %v736_v39, %v735_v16 }
0x1d22   :  { %v1522_v21 = vadd.f32 %v1521_v44, %v1520_v41  ;;  %v1554_v60 = vpop.xlane.xlu1 %1553  ;;  %v1118_v5 = vadd.f32 %v1117_v32, %v1116_v22 }
0x1d23   :  { %v1151_v35 = vrot.slane %v1150_v15, 2  ;;  %v1555_v4 = vrot.slane %v1554_v60, 4  ;;  %v1588_v26 = vpop.xlane.xlu0 %1587  ;;  %v738_v45 = vrot.slane %v737_v51, 1 }
0x1d24   :  { %v1523_v30 = vrot.slane %v1522_v21, 2  ;;  %v1589_v49 = vrot.slane %v1588_v26, 4  ;;  %v1119_v40 = vrot.slane %v1118_v5, 1 }
0x1d25   :  { %v1556_v12 = vadd.f32 %v1555_v4, %v1554_v60  ;;  %v739_v47 = vadd.f32 %v738_v45, %v737_v51  ;;  %v1152_v9 = vadd.f32 %v1151_v35, %v1150_v15 }
0x1d26   :  { %v1590_v1 = vadd.f32 %v1589_v49, %v1588_v26  ;;  %v1622_v7 = vpop.xlane.xlu1 %1621  ;;  %v1120_v46 = vadd.f32 %v1119_v40, %v1118_v5  ;;  %v1524_v61 = vadd.f32 %v1523_v30, %v1522_v21  ;;  %v2941_v40 = vsel %vm52_vm2, 1.0, %v3597_v24 }
0x1d27   :  { %v1557_v58 = vrot.slane %v1556_v12, 2  ;;  %v1623_v29 = vrot.slane %v1622_v7, 4  ;;  %v2025_v59 = vpop.xlane.xlu0 %2024  ;;  %3445 = vpush %v739_v47  ;;  %v1153_v20 = vrot.slane %v1152_v9, 1 }
0x1d28   :  { %v1591_v27 = vrot.slane %v1590_v1, 2  ;;  %v2026_v3 = vrot.slane %v2025_v59, 4  ;;  %3447 = vpush %v1120_v46  ;;  %v1525_v37 = vrot.slane %v1524_v61, 1 }
0x1d29   :  { %v1624_v54 = vadd.f32 %v1623_v29, %v1622_v7  ;;  %v1154_v13 = vadd.f32 %v1153_v20, %v1152_v9  ;;  %v1558_v31 = vadd.f32 %v1557_v58, %v1556_v12  ;;  %v2942_v12 = vsel %vm55_vm1, 1.0, %v3597_v24 }
0x1d2a   :  { %v2027_v8 = vadd.f32 %v2026_v3, %v2025_v59  ;;  %v2059_v55 = vpop.xlane.xlu1 %2058  ;;  %v1526_v43 = vadd.f32 %v1525_v37, %v1524_v61  ;;  %v1592_v18 = vadd.f32 %v1591_v27, %v1590_v1  ;;  %v2943_v7 = vsel %vm58_vm3, 1.0, %v3597_v24 }
0x1d2b   :  { %v1625_v19 = vrot.slane %v1624_v54, 2  ;;  %v2060_v62 = vrot.slane %v2059_v55, 4  ;;  %v2440_v17 = vpop.xlane.xlu0 %2439  ;;  %3449 = vpush %v1154_v13  ;;  %v1559_v48 = vrot.slane %v1558_v31, 1  ;;  %v4657_v29 = vsel %vm61_vm4, 1.0, %v3597_v24 }
0x1d2c   :  { %v2028_v33 = vrot.slane %v2027_v8, 2  ;;  %v2441_v11 = vrot.slane %v2440_v17, 4  ;;  %3451 = vpush %v1526_v43  ;;  %v1593_v23 = vrot.slane %v1592_v18, 1  ;;  %v261_v37 = vstv %s4647_s1 }
0x1d2d   :  { %v2061_v63 = vadd.f32 %v2060_v62, %v2059_v55  ;;  %v1560_v50 = vadd.f32 %v1559_v48, %v1558_v31  ;;  %v1626_v56 = vadd.f32 %v1625_v19, %v1624_v54  ;;  %v262_v57 = vsub.f32 0.0, %v261_v37 }
0x1d2e   :  { %v2442_v38 = vadd.f32 %v2441_v11, %v2440_v17  ;;  %v2474_v28 = vpop.xlane.xlu1 %2473  ;;  %v1594_v42 = vadd.f32 %v1593_v23, %v1592_v18  ;;  %v2029_v14 = vadd.f32 %v2028_v33, %v2027_v8 }
0x1d2f   :  { %v2062_v52 = vrot.slane %v2061_v63, 2  ;;  %v2475_v25 = vrot.slane %v2474_v28, 4  ;;  %v2846_v6 = vpop.xlane.xlu0 %2845  ;;  %3453 = vpush %v1560_v50  ;;  %v1627_v36 = vrot.slane %v1626_v56, 1  ;;  %v264_v23 = vmul.f32 0.125, %v262_v57 }
0x1d30   :  { %v2443_v53 = vrot.slane %v2442_v38, 2  ;;  %v2847_v0 = vrot.slane %v2846_v6, 4  ;;  %3455 = vpush %v1594_v42  ;;  %v2030_v10 = vrot.slane %v2029_v14, 1 }
0x1d31   :  { %v2476_v16 = vadd.f32 %v2475_v25, %v2474_v28  ;;  %v1628_v22 = vadd.f32 %v1627_v36, %v1626_v56  ;;  %v2063_v2 = vadd.f32 %v2062_v52, %v2061_v63 }
0x1d32   :  { %v2848_v39 = vadd.f32 %v2847_v0, %v2846_v6  ;;  %v2031_v34 = vadd.f32 %v2030_v10, %v2029_v14  ;;  %v2444_v41 = vadd.f32 %v2443_v53, %v2442_v38  ;;  %v1562_v0 = vmul.f32 %v2941_v40, %v264_v23 }
0x1d33   :  { %v2477_v32 = vrot.slane %v2476_v16, 2  ;;  %3457 = vpush %v1628_v22  ;;  %v2064_v44 = vrot.slane %v2063_v2, 1 }
0x1d34   :  { %v2849_v15 = vrot.slane %v2848_v39, 2  ;;  %3459 = vpush %v2031_v34  ;;  %v2445_v51 = vrot.slane %v2444_v41, 1 }
0x1d35   :  { %v2065_v21 = vadd.f32 %v2064_v44, %v2063_v2  ;;  %v2478_v60 = vadd.f32 %v2477_v32, %v2476_v16 }
0x1d36   :  { %v2850_v5 = vadd.f32 %v2849_v15, %v2848_v39  ;;  %v2446_v35 = vadd.f32 %v2445_v51, %v2444_v41 }
0x1d37   :  { %3461 = vpush %v2065_v21  ;;  %v2479_v4 = vrot.slane %v2478_v60, 1 }
0x1d38   :  { %3463 = vpush %v2446_v35  ;;  %v2851_v26 = vrot.slane %v2850_v5, 1 }
0x1d39   :  { %v2480_v45 = vadd.f32 %v2479_v4, %v2478_v60 }
0x1d3a   :  { %v2852_v30 = vadd.f32 %v2851_v26, %v2850_v5 }
0x1d3b   :  { %3465 = vpush %v2480_v45 }
0x1d3c   :  { %3467 = vpush %v2852_v30 }
0x1d45   :  { %s3442_s24 = spop %3441 }
0x1d46   :  { %v1564_v49 = vstv %s3442_s24  ;;  %s3444_s25 = spop %3443 }
0x1d47   :  { %v1565_v9 = vmul.f32 %v2941_v40, %v1564_v49  ;;  %v707_v20 = vstv %s3444_s25 }
0x1d48   :  { %v708_v54 = vsub.f32 0.0, %v707_v20 }
0x1d4a   :  { %v709_v17 = vmul.f32 0.125, %v708_v54 }
0x1d4c   :  { %v1567_v14 = vmul.f32 %v2942_v12, %v709_v17 }
0x1d4e   :  { %v1568_v32 = vadd.f32 %v1567_v14, %v1562_v0 }
0x1d58   :  { %s3446_s4 = spop %3445 }
0x1d59   :  { %v1569_v47 = vstv %s3446_s4  ;;  %s3448_s26 = spop %3447 }
0x1d5a   :  { %v1570_v1 = vmul.f32 %v2942_v12, %v1569_v47  ;;  %v1122_v13 = vstv %s3448_s26 }
0x1d5b   :  { %v1123_v43 = vsub.f32 0.0, %v1122_v13 }
0x1d5c   :  { %v1571_v46 = vadd.f32 %v1570_v1, %v1565_v9  ;;  %s3450_s27 = spop %3449 }
0x1d5d   :  { %v1574_v61 = vstv %s3450_s27  ;;  %s3452_s28 = spop %3451  ;;  %v1124_v38 = vmul.f32 0.125, %v1123_v43 }
0x1d5e   :  { %v1575_v58 = vmul.f32 %v2943_v7, %v1574_v61  ;;  %v1528_v55 = vstv %s3452_s28 }
0x1d5f   :  { %v1529_v48 = vsub.f32 0.0, %v1528_v55  ;;  %v1572_v22 = vmul.f32 %v2943_v7, %v1124_v38 }
0x1d60   :  { %v1576_v59 = vadd.f32 %v1575_v58, %v1571_v46  ;;  %s3454_s29 = spop %3453 }
0x1d61   :  { %v1579_v27 = vstv %s3454_s29  ;;  %s3456_s30 = spop %3455  ;;  %v1530_v25 = vmul.f32 0.125, %v1529_v48  ;;  %v1573_v21 = vadd.f32 %v1572_v22, %v1568_v32 }
0x1d62   :  { %v1580_v3 = vmul.f32 %v4657_v29, %v1579_v27  ;;  %v1596_v8 = vstv %s3456_s30 }
0x1d63   :  { %v1597_v18 = vsub.f32 0.0, %v1596_v8  ;;  %v1577_v44 = vmul.f32 %v4657_v29, %v1530_v25 }
0x1d64   :  { %v4661_v31 = vadd.f32 %v1580_v3, %v1576_v59  ;;  %s3458_s8 = spop %3457 }
0x1d65   :  { %s3460_s9 = spop %3459  ;;  %v2890_v19 = vstv %s3458_s8  ;;  %v1598_v28 = vmul.f32 0.125, %v1597_v18  ;;  %v1578_v35 = vadd.f32 %v1577_v44, %v1573_v21 }
0x1d66   :  { %v2033_v24 = vstv %s3460_s9  ;;  %v2891_v63 = vmul.f32 %v2941_v40, %v2890_v19 }
0x1d67   :  { %v2034_v62 = vsub.f32 0.0, %v2033_v24  ;;  %v2888_v2 = vmul.f32 %v2941_v40, %v1598_v28 }
0x1d68   :  { %s3462_s10 = spop %3461 }
0x1d69   :  { %v2035_v33 = vmul.f32 0.125, %v2034_v62  ;;  %v2895_v11 = vstv %s3462_s10  ;;  %s3464_s11 = spop %3463 }
0x1d6a   :  { %v2896_v50 = vmul.f32 %v2942_v12, %v2895_v11  ;;  %v2448_v56 = vstv %s3464_s11 }
0x1d6b   :  { %v2449_v42 = vsub.f32 0.0, %v2448_v56  ;;  %v2893_v6 = vmul.f32 %v2942_v12, %v2035_v33 }
0x1d6c   :  { %v2897_v52 = vadd.f32 %v2896_v50, %v2891_v63  ;;  %s3466_s12 = spop %3465 }
0x1d6d   :  { %v2450_v36 = vmul.f32 0.125, %v2449_v42  ;;  %v2900_v53 = vstv %s3466_s12  ;;  %s3468_s13 = spop %3467  ;;  %v2894_v15 = vadd.f32 %v2893_v6, %v2888_v2 }
0x1d6e   :  { %v2901_v10 = vmul.f32 %v2943_v7, %v2900_v53  ;;  %v2854_v16 = vstv %s3468_s13 }
0x1d6f   :  { %v2898_v39 = vmul.f32 %v2943_v7, %v2450_v36  ;;  %v2855_v34 = vsub.f32 0.0, %v2854_v16 }
0x1d70   :  { %v2902_v41 = vadd.f32 %v2901_v10, %v2897_v52 }
0x1d71   :  { %v2856_v51 = vmul.f32 0.125, %v2855_v34  ;;  %v2899_v60 = vadd.f32 %v2898_v39, %v2894_v15 }
0x1d73   :  { %v2903_v5 = vmul.f32 %v4657_v29, %v2856_v51 }
0x1d75   :  { %v2904_v4 = vadd.f32 %v2903_v5, %v2899_v60 }
0x1d77   :  { %v2909_v26 = vsel %vm2908_vm5, %v1578_v35, %v2904_v4 }
0x1d78   :  { %2910 = vst [vmem:[#allocation2] sm:$0x3] %v2909_v26 }
0x1d79   :  { %3560 = shalt.err (!%p3557_p4)
}
0x1d7a   :  { %s3561_s18 = scalar_lea.hbm %s4699_s6, 32 }
0x1d7b   :  { %p3562_p5 = scmp.ne.s32.totalorder %s4699_s6, %s3561_s18  ;;  %p3565_p6 = scmp.lt.u32.totalorder %s3561_s18, %s4699_s6 }
0x1d7d   :  { %p3567_p7 = pnand %p3565_p6, %p3562_p5 }
0x1d7f   :  { %3570 = shalt.err (!%p3567_p7)
}
0x1d80   :  { %2922 = dma.vmem_to_hbm [thread:$0]  %s2920_s15, 32, %s4699_s6, [#allocation3]  }
0x1d81   :  { %s3600_s23 = smov [#allocation4]  }
0x1d82   :  { %s2929_s1 = sshll.u32 %s3600_s23, 4  ;;  %s2930_s1 = int_to_ptr.vmem [resolvable:$true] %s2929_s1 }
0x1d83   :  { %s3571_s6 = scalar_lea.vmem %s2930_s1, 32  ;;  %p3576_p9 = scmp.lt.s32.totalorder %s2930_s1, %s2930_s1 }
0x1d84   :  { %p3572_p8 = scmp.ne.s32.totalorder %s2930_s1, %s3571_s6  ;;  %p3577_p10 = scmp.lt.s32.totalorder %s3571_s6, %s3571_s6 }
0x1d86   :  { %p3578_p11 = por %p3577_p10, %p3576_p9 }
0x1d88   :  { %p3579_p12 = pnand %p3578_p11, %p3572_p8 }
0x1d9a   :  { %v2880_v45 = vpop.xlane.xlu1 %2879 }
0x1d9b   :  { %v2881_v30 = vrot.slane %v2880_v45, 4 }
0x1d9d   :  { %v2882_v49 = vadd.f32 %v2881_v30, %v2880_v45 }
0x1d9f   :  { %v2883_v40 = vrot.slane %v2882_v49, 2 }
0x1da1   :  { %v2884_v12 = vadd.f32 %v2883_v40, %v2882_v49 }
0x1da3   :  { %v2885_v47 = vrot.slane %v2884_v12, 1 }
0x1da5   :  { %v2886_v9 = vadd.f32 %v2885_v47, %v2884_v12 }
0x1da7   :  { %3469 = vpush %v2886_v9 }
0x1dd8   :  { %s3470_s0 = spop %3469 }
0x1dd9   :  { %v2905_v1 = vstv %s3470_s0 }
0x1dda   :  { %v2906_v7 = vmul.f32 %v4657_v29, %v2905_v1 }
0x1ddc   :  { %v2907_v46 = vadd.f32 %v2906_v7, %v2902_v41 }
0x1dde   :  { %v2911_v61 = vsel %vm2908_vm5, %v4661_v31, %v2907_v46 }
0x1ddf   :  { %2912 = vst [vmem:[#allocation4] sm:$0x3] %v2911_v61 }
0x1de0   :  { %3582 = shalt.err (!%p3579_p12)
}
0x1de1   :  { %s3583_s4 = scalar_lea.hbm %s4700_s7, 32 }
0x1de2   :  { %p3584_p13 = scmp.ne.s32.totalorder %s4700_s7, %s3583_s4  ;;  %p3587_p0 = scmp.lt.u32.totalorder %s3583_s4, %s4700_s7 }
0x1de4   :  { %p3589_p1 = pnand %p3587_p0, %p3584_p13 }
0x1de6   :  { %3592 = shalt.err (!%p3589_p1)
}
0x1de7   :  { %2932 = dma.vmem_to_hbm [thread:$0]  %s2930_s1, 32, %s4700_s7, [#allocation5]  }
0x1de8   :  { %3593 = dma.done.wait [#allocation3], 32  }
0x1de9   :  { %3594 = vsyncadd [#allocation3], 4294967264 }
0x1dea   :  { %3595 = dma.done.wait [#allocation5], 32  }
0x1deb   :  { %3596 = vsyncadd [#allocation5], 4294967264 }
0x1dec   :  { %2939 = vsyncpa [#allocation3], 1 }
0x1ded   :  { %2940 = vsyncpa [#allocation5], 1 }

</bundles_post_ra>
